<compile_context>
chip_gen: v7x
topology: tpu7x:2x2x1
jax: 0.10.0
libtpu: 0.0.40
codegen_flags: <defaults>
</compile_context>

<pallas_src>
import functools

import jax
import jax.numpy as jnp
from jax.experimental import pallas as pl
from jax.experimental.pallas import tpu as pltpu

NUM_CLASS = 100
LANE = 128
C0, C1, C2, C3 = 3, 16, 32, 512        # channels: input -> conv1 -> conv2 -> conv3


def _round_up(x, m):
    return (x + m - 1) // m * m


def _dims(H, W):
    """Static per-layer layout constants (row strides padded to multiples of 8)."""
    assert H % 4 == 0 and W % 4 == 0, "two 2x2 maxpools need H, W divisible by 4"
    H2, W2 = H // 2, W // 2
    H3, W3 = H // 4, W // 4
    R2 = _round_up(W2 + 2, 8)           # layer-2 slab row stride (8-aligned)
    R3 = _round_up(W3 + 2, 8)           # layer-3 slab row stride (8-aligned)
    return dict(
        H=H, W=W, H2=H2, W2=W2, H3=H3, W3=W3, R2=R2, R3=R3,
        K1=_round_up(9 * C0, 8),        # conv1 im2col K (27 -> 32)
        M1=H * W,                       # conv1 output rows (dense, stride W)
        L1=(H - 2) * W + W - 1,         # rows holding a full 2x2 pool window (L1)
        S2=(H2 + 2) * R2,               # layer-2 slab rows
        M2=H2 * R2,                     # conv2 output rows (stride R2)
        L2=(H2 - 2) * R2 + W2 - 1,
        S3=(H3 + 2) * R3,               # layer-3 slab rows
        M3=_round_up((H3 - 1) * R3 + W3, 8),   # conv3 output rows (<= H3*R3)
    )


# ------------------------------ fused kernel ------------------------------- #

def _vgg_fused_kernel(x_ref, w1_ref, b1_ref, w2_ref, b2_ref, w3_ref, b3_ref,
                      wfc_ref, bfc_ref, o_ref, pm1, xs2, pm2, xs3, *, d):
    H, W = d["H"], d["W"]
    H2, W2, H3, W3 = d["H2"], d["W2"], d["H3"], d["W3"]
    R2, R3 = d["R2"], d["R3"]
    M2, M3 = d["M2"], d["M3"]
    L1, L2 = d["L1"], d["L2"]

    # ---- conv1: one dense-K matmul on the wrapper-built im2col (K=27->32) ----
    z1 = jnp.dot(x_ref[0], w1_ref[...], preferred_element_type=jnp.float32)
    z1 = jnp.maximum(z1 + b1_ref[...], 0.0)                     # (H*W, C1) f32

    # ---- fused 2x2/2 max-pool (shifted-slice max) -----------------------------
    p = jnp.maximum(jnp.maximum(z1[0:L1], z1[1:L1 + 1]),
                    jnp.maximum(z1[W:W + L1], z1[W + 1:W + 1 + L1]))
    pm1[0:L1, :] = p

    # ---- scatter pooled rows into 3 kw-shifted layer-2 slab copies ------------
    xs2[...] = jnp.zeros_like(xs2)
    for i in range(H2):
        row = pm1[pl.ds(2 * i * W, W2, stride=2), :]            # (W2, C1) f32
        for kw in range(3):
            r0 = (i + 1) * R2 + 1 - kw
            xs2[kw, r0:r0 + W2, :] = row

    # ---- conv2: 9 dense (K=C1) taps, all slices 8-aligned, value accumulator --
    xv2 = xs2[...].astype(jnp.bfloat16)                          # (3, S2, C1)
    z2 = None
    for kh in range(3):
        for kw in range(3):
            t = jnp.dot(xv2[kw, kh * R2:kh * R2 + M2, :], w2_ref[kh * 3 + kw],
                        preferred_element_type=jnp.float32)
            z2 = t if z2 is None else z2 + t
    z2 = jnp.maximum(z2 + b2_ref[...], 0.0)                      # (M2, C2) f32

    p = jnp.maximum(jnp.maximum(z2[0:L2], z2[1:L2 + 1]),
                    jnp.maximum(z2[R2:R2 + L2], z2[R2 + 1:R2 + 1 + L2]))
    pm2[0:L2, :] = p

    xs3[...] = jnp.zeros_like(xs3)
    for i in range(H3):
        row = pm2[pl.ds(2 * i * R2, W3, stride=2), :]            # (W3, C2) f32
        for kw in range(3):
            r0 = (i + 1) * R3 + 1 - kw
            xs3[kw, r0:r0 + W3, :] = row

    # ---- conv3 (no pool): 9 dense (K=C2) taps, value accumulator --------------
    xv3 = xs3[...].astype(jnp.bfloat16)                          # (3, S3, C2)
    z3 = None
    for kh in range(3):
        for kw in range(3):
            t = jnp.dot(xv3[kw, kh * R3:kh * R3 + M3, :], w3_ref[kh * 3 + kw],
                        preferred_element_type=jnp.float32)
            z3 = t if z3 is None else z3 + t
    z3 = jnp.maximum(z3 + b3_ref[...], 0.0)                      # (M3, C3) f32

    # ---- GAP over the valid slab rows (mask built in-kernel via iota) ---------
    ridx = jax.lax.broadcasted_iota(jnp.int32, (M3, 1), 0)
    gmask = jnp.where(ridx % R3 < W3, 1.0 / (H3 * W3), 0.0).astype(jnp.float32)
    gap = jnp.sum(z3 * gmask, axis=0, keepdims=True)             # (1, C3) f32

    # ---- classifier Linear(512, num_class); Dropout is identity in eval mode --
    logits = jnp.dot(gap.astype(jnp.bfloat16), wfc_ref[...],
                     preferred_element_type=jnp.float32) + bfc_ref[...]
    o_ref[...] = logits[None]


# -------------------------------- wrapper ---------------------------------- #

def vgg_pallas(x_im2col, params, *, d):
    """x_im2col: (N, H*W, K1) bf16 conv1 im2col.  Returns (N, num_class_pad) f32."""
    N = x_im2col.shape[0]
    w1, b1, w2, b2, w3, b3, wfc, bfc = params
    ncp = wfc.shape[-1]
    kern = functools.partial(_vgg_fused_kernel, d=d)
    out = pl.pallas_call(
        kern,
        grid=(N,),
        in_specs=[
            pl.BlockSpec((1, d["M1"], d["K1"]), lambda n: (n, 0, 0)),
            pl.BlockSpec(w1.shape, lambda n: (0, 0)),
            pl.BlockSpec(b1.shape, lambda n: (0, 0)),
            pl.BlockSpec(w2.shape, lambda n: (0, 0, 0)),
            pl.BlockSpec(b2.shape, lambda n: (0, 0)),
            pl.BlockSpec(w3.shape, lambda n: (0, 0, 0)),
            pl.BlockSpec(b3.shape, lambda n: (0, 0)),
            pl.BlockSpec(wfc.shape, lambda n: (0, 0)),
            pl.BlockSpec(bfc.shape, lambda n: (0, 0)),
        ],
        out_specs=pl.BlockSpec((1, 1, ncp), lambda n: (n, 0, 0)),
        out_shape=jax.ShapeDtypeStruct((N, 1, ncp), jnp.float32),
        scratch_shapes=[
            pltpu.VMEM((_round_up(d["L1"], 8), C1), jnp.float32),   # pm1
            pltpu.VMEM((3, d["S2"], C1), jnp.float32),              # xs2 (kw slabs)
            pltpu.VMEM((_round_up(d["L2"], 8), C2), jnp.float32),   # pm2
            pltpu.VMEM((3, d["S3"], C2), jnp.float32),              # xs3 (kw slabs)
        ],
        compiler_params=pltpu.CompilerParams(dimension_semantics=("parallel",)),
    )(x_im2col, w1, b1, w2, b2, w3, b3, wfc, bfc)
    return out[:, 0, :]


# ---------------------- parameters & weight packing ------------------------ #

def init_raw_params(key, in_ch=C0, num_class=NUM_CLASS):
    """Plain f32 parameters (PyTorch-equivalent layout: HWIO convs, (in,out) FC)."""
    def conv_init(k, cin, cout):
        k1, k2 = jax.random.split(k)
        w = jax.random.normal(k1, (3, 3, cin, cout), jnp.float32) / jnp.sqrt(9.0 * cin)
        b = 0.01 * jax.random.normal(k2, (cout,), jnp.float32)
        return w, b
    keys = jax.random.split(key, 4)
    p1 = conv_init(keys[0], in_ch, C1)       # 3  -> 16
    p2 = conv_init(keys[1], C1, C2)          # 16 -> 32
    p3 = conv_init(keys[2], C2, C3)          # 32 -> 512
    k1, k2 = jax.random.split(keys[3])
    wfc = jax.random.normal(k1, (C3, num_class), jnp.float32) / jnp.sqrt(float(C3))
    bfc = 0.01 * jax.random.normal(k2, (num_class,), jnp.float32)
    return p1, p2, p3, (wfc, bfc)


def pack_params(raw, num_class=NUM_CLASS):
    """Kernel-ready params: bf16 MXU operands, dense K, FC padded to 128 lanes."""
    (w1, b1), (w2, b2), (w3, b3), (wfc, bfc) = raw
    K1 = _round_up(9 * C0, 8)
    w1p = jnp.zeros((K1, C1), jnp.float32).at[:9 * C0].set(w1.reshape(9 * C0, C1))
    w2p = w2.reshape(9, C1, C2)              # tap index = kh*3 + kw
    w3p = w3.reshape(9, C2, C3)
    ncp = _round_up(num_class, LANE)
    wfcp = jnp.zeros((C3, ncp), jnp.float32).at[:, :num_class].set(wfc)
    bfcp = jnp.zeros((1, ncp), jnp.float32).at[0, :num_class].set(bfc)
    return (w1p.astype(jnp.bfloat16), b1.reshape(1, C1),
            w2p.astype(jnp.bfloat16), b2.reshape(1, C2),
            w3p.astype(jnp.bfloat16), b3.reshape(1, C3),
            wfcp.astype(jnp.bfloat16), bfcp)


# --------------------------------- model ----------------------------------- #

@jax.jit
def vgg_forward(x_nchw, params):
    """VGG(features=[16,'M',32,'M',512]) -> GAP -> flatten -> Linear(512,100).
    Eval mode: classifier Dropout is identity.
    TODO(synk): training-mode Dropout (random masking) not implemented."""
    N, C, H, W = x_nchw.shape
    d = _dims(H, W)
    # NCHW -> NHWC and conv1 im2col (K = 9*C -> padded to K1); every later
    # layer's layout transform happens inside the fused kernel.
    xh = jnp.transpose(x_nchw, (0, 2, 3, 1)).astype(jnp.float32)
    xp = jnp.pad(xh, ((0, 0), (1, 1), (1, 1), (0, 0)))
    cols = [xp[:, kh:kh + H, kw:kw + W, :] for kh in range(3) for kw in range(3)]
    im = jnp.concatenate(cols, axis=-1).reshape(N, H * W, 9 * C)
    im = jnp.pad(im, ((0, 0), (0, 0), (0, d["K1"] - 9 * C))).astype(jnp.bfloat16)
    logits = vgg_pallas(im, params, d=d)
    return logits[:, :NUM_CLASS]


def reference_forward(x_nchw, raw):
    """Pure-JAX f32 reference of the same forward pass (for validation)."""
    (w1, b1), (w2, b2), (w3, b3), (wfc, bfc) = raw
    x = jnp.transpose(x_nchw, (0, 2, 3, 1)).astype(jnp.float32)

    def conv(x, w, b):
        y = jax.lax.conv_general_dilated(
            x, w, window_strides=(1, 1), padding="SAME",
            dimension_numbers=("NHWC", "HWIO", "NHWC"))
        return jax.nn.relu(y + b)

    def pool(x):
        return jax.lax.reduce_window(x, -jnp.inf, jax.lax.max,
                                     (1, 2, 2, 1), (1, 2, 2, 1), "VALID")

    x = pool(conv(x, w1, b1))
    x = pool(conv(x, w2, b2))
    x = conv(x, w3, b3)
    gap = jnp.mean(x, axis=(1, 2))
    return gap @ wfc + bfc


if __name__ == "__main__":
    key = jax.random.PRNGKey(0)
    key, xkey, pkey = jax.random.split(key, 3)
    x = jax.random.normal(xkey, (2, 3, 16, 16), jnp.float32)   # NCHW like PyTorch

    raw = init_raw_params(pkey)
    params = pack_params(raw)

    out = jax.block_until_ready(vgg_forward(x, params))
    assert out.shape == (2, NUM_CLASS) and out.dtype == jnp.float32
    assert bool(jnp.all(jnp.isfinite(out)))

    ref = jax.block_until_ready(reference_forward(x, raw))
    err = float(jnp.max(jnp.abs(out - ref)))
    assert err < 0.15, f"max |kernel - reference| = {err}"
    print("KERNEL_OK")
</pallas_src>

<mosaic_0001>
module attributes {stable_mosaic.version = 11 : i64} {
  func.func @_vgg_fused_kernel(%arg0: i32, %arg1: memref<1x256x32xbf16, #tpu.memory_space<vmem>>, %arg2: memref<32x16xbf16, #tpu.memory_space<vmem>>, %arg3: memref<1x16xf32, #tpu.memory_space<vmem>>, %arg4: memref<9x16x32xbf16, #tpu.memory_space<vmem>>, %arg5: memref<1x32xf32, #tpu.memory_space<vmem>>, %arg6: memref<9x32x512xbf16, #tpu.memory_space<vmem>>, %arg7: memref<1x512xf32, #tpu.memory_space<vmem>>, %arg8: memref<512x128xbf16, #tpu.memory_space<vmem>>, %arg9: memref<1x128xf32, #tpu.memory_space<vmem>>, %arg10: memref<1x1x128xf32, #tpu.memory_space<vmem>>, %arg11: memref<240x16xf32, #tpu.memory_space<vmem>>, %arg12: memref<3x160x16xf32, #tpu.memory_space<vmem>>, %arg13: memref<104x32xf32, #tpu.memory_space<vmem>>, %arg14: memref<3x48x32xf32, #tpu.memory_space<vmem>>) attributes {dimension_semantics = [#tpu.dimension_semantics<parallel>], iteration_bounds = array<i64: 2>, scalar_prefetch = 0 : i64, scratch_operands = 4 : i64, tpu.core_type = #tpu.core_type<tc>, window_params = [{transform_indices = @transform_0, window_bounds = array<i64: 1, 256, 32>}, {pipeline_mode = #tpu.pipeline_mode<synchronous>, transform_indices = @transform_1, window_bounds = array<i64: 32, 16>}, {pipeline_mode = #tpu.pipeline_mode<synchronous>, transform_indices = @transform_2, window_bounds = array<i64: 1, 16>}, {pipeline_mode = #tpu.pipeline_mode<synchronous>, transform_indices = @transform_3, window_bounds = array<i64: 9, 16, 32>}, {pipeline_mode = #tpu.pipeline_mode<synchronous>, transform_indices = @transform_4, window_bounds = array<i64: 1, 32>}, {pipeline_mode = #tpu.pipeline_mode<synchronous>, transform_indices = @transform_5, window_bounds = array<i64: 9, 32, 512>}, {pipeline_mode = #tpu.pipeline_mode<synchronous>, transform_indices = @transform_6, window_bounds = array<i64: 1, 512>}, {pipeline_mode = #tpu.pipeline_mode<synchronous>, transform_indices = @transform_7, window_bounds = array<i64: 512, 128>}, {pipeline_mode = #tpu.pipeline_mode<synchronous>, transform_indices = @transform_8, window_bounds = array<i64: 1, 128>}, {transform_indices = @transform_9, window_bounds = array<i64: 1, 1, 128>}]} {
    %c0 = arith.constant 0 : index
    %c0_0 = arith.constant 0 : index
    %c0_1 = arith.constant 0 : index
    %0 = vector.load %arg1[%c0, %c0_0, %c0_1] : memref<1x256x32xbf16, #tpu.memory_space<vmem>>, vector<1x256x32xbf16>
    %1 = vector.shape_cast %0 : vector<1x256x32xbf16> to vector<256x32xbf16>
    %c0_2 = arith.constant 0 : index
    %c0_3 = arith.constant 0 : index
    %2 = vector.load %arg2[%c0_2, %c0_3] : memref<32x16xbf16, #tpu.memory_space<vmem>>, vector<32x16xbf16>
    %cst = arith.constant dense<0.000000e+00> : vector<256x16xf32>
    %3 = tpu.matmul %1, %2, %cst {dimension_numbers = #tpu.dot_dimension_numbers<[1], [0], [0], [1], [0, 0, 1, 1], [], []>} : vector<256x32xbf16>, vector<32x16xbf16>, vector<256x16xf32> -> vector<256x16xf32>
    %c0_4 = arith.constant 0 : index
    %c0_5 = arith.constant 0 : index
    %4 = vector.load %arg3[%c0_4, %c0_5] : memref<1x16xf32, #tpu.memory_space<vmem>>, vector<1x16xf32>
    %5 = vector.broadcast %4 : vector<1x16xf32> to vector<256x16xf32>
    %6 = arith.addf %3, %5 : vector<256x16xf32>
    %cst_6 = arith.constant 0.000000e+00 : f32
    %7 = vector.broadcast %cst_6 : f32 to vector<256x16xf32>
    %8 = arith.maximumf %6, %7 : vector<256x16xf32>
    %9 = vector.extract_strided_slice %8 {offsets = [0, 0], sizes = [239, 16], strides = [1, 1]} : vector<256x16xf32> to vector<239x16xf32>
    %10 = vector.extract_strided_slice %8 {offsets = [1, 0], sizes = [239, 16], strides = [1, 1]} : vector<256x16xf32> to vector<239x16xf32>
    %11 = arith.maximumf %9, %10 : vector<239x16xf32>
    %12 = vector.extract_strided_slice %8 {offsets = [16, 0], sizes = [239, 16], strides = [1, 1]} : vector<256x16xf32> to vector<239x16xf32>
    %13 = vector.extract_strided_slice %8 {offsets = [17, 0], sizes = [239, 16], strides = [1, 1]} : vector<256x16xf32> to vector<239x16xf32>
    %14 = arith.maximumf %12, %13 : vector<239x16xf32>
    %15 = arith.maximumf %11, %14 : vector<239x16xf32>
    %c0_7 = arith.constant 0 : index
    %c0_8 = arith.constant 0 : index
    %16 = vector.load %arg11[%c0_7, %c0_8] : memref<240x16xf32, #tpu.memory_space<vmem>>, vector<239x16xf32>
    tpu.vector_store %arg11[%c0_7, %c0_8], %15 {strides = array<i32>} : memref<240x16xf32, #tpu.memory_space<vmem>>, vector<239x16xf32>,
    %cst_9 = arith.constant 0.000000e+00 : f32
    %17 = vector.broadcast %cst_9 : f32 to vector<3x160x16xf32>
    %c0_10 = arith.constant 0 : index
    %c0_11 = arith.constant 0 : index
    %c0_12 = arith.constant 0 : index
    %18 = vector.load %arg12[%c0_10, %c0_11, %c0_12] : memref<3x160x16xf32, #tpu.memory_space<vmem>>, vector<3x160x16xf32>
    tpu.vector_store %arg12[%c0_10, %c0_11, %c0_12], %17 {strides = array<i32>} : memref<3x160x16xf32, #tpu.memory_space<vmem>>, vector<3x160x16xf32>,
    %c0_13 = arith.constant 0 : index
    %c0_14 = arith.constant 0 : index
    %19 = tpu.strided_load %arg11[%c0_13, %c0_14] {strides = array<i32: 2, 1>} : memref<240x16xf32, #tpu.memory_space<vmem>>, vector<8x16xf32>
    %c0_15 = arith.constant 0 : index
    %c17 = arith.constant 17 : index
    %c0_16 = arith.constant 0 : index
    %20 = vector.load %arg12[%c0_15, %c17, %c0_16] : memref<3x160x16xf32, #tpu.memory_space<vmem>>, vector<1x8x16xf32>
    %21 = vector.shape_cast %20 : vector<1x8x16xf32> to vector<8x16xf32>
    %22 = vector.shape_cast %19 : vector<8x16xf32> to vector<1x8x16xf32>
    tpu.vector_store %arg12[%c0_15, %c17, %c0_16], %22 {strides = array<i32>} : memref<3x160x16xf32, #tpu.memory_space<vmem>>, vector<1x8x16xf32>,
    %c1 = arith.constant 1 : index
    %c16 = arith.constant 16 : index
    %c0_17 = arith.constant 0 : index
    %23 = vector.load %arg12[%c1, %c16, %c0_17] : memref<3x160x16xf32, #tpu.memory_space<vmem>>, vector<1x8x16xf32>
    %24 = vector.shape_cast %23 : vector<1x8x16xf32> to vector<8x16xf32>
    %25 = vector.shape_cast %19 : vector<8x16xf32> to vector<1x8x16xf32>
    tpu.vector_store %arg12[%c1, %c16, %c0_17], %25 {strides = array<i32>} : memref<3x160x16xf32, #tpu.memory_space<vmem>>, vector<1x8x16xf32>,
    %c2 = arith.constant 2 : index
    %c15 = arith.constant 15 : index
    %c0_18 = arith.constant 0 : index
    %26 = vector.load %arg12[%c2, %c15, %c0_18] : memref<3x160x16xf32, #tpu.memory_space<vmem>>, vector<1x8x16xf32>
    %27 = vector.shape_cast %26 : vector<1x8x16xf32> to vector<8x16xf32>
    %28 = vector.shape_cast %19 : vector<8x16xf32> to vector<1x8x16xf32>
    tpu.vector_store %arg12[%c2, %c15, %c0_18], %28 {strides = array<i32>} : memref<3x160x16xf32, #tpu.memory_space<vmem>>, vector<1x8x16xf32>,
    %c32 = arith.constant 32 : index
    %c0_19 = arith.constant 0 : index
    %29 = tpu.strided_load %arg11[%c32, %c0_19] {strides = array<i32: 2, 1>} : memref<240x16xf32, #tpu.memory_space<vmem>>, vector<8x16xf32>
    %c0_20 = arith.constant 0 : index
    %c33 = arith.constant 33 : index
    %c0_21 = arith.constant 0 : index
    %30 = vector.load %arg12[%c0_20, %c33, %c0_21] : memref<3x160x16xf32, #tpu.memory_space<vmem>>, vector<1x8x16xf32>
    %31 = vector.shape_cast %30 : vector<1x8x16xf32> to vector<8x16xf32>
    %32 = vector.shape_cast %29 : vector<8x16xf32> to vector<1x8x16xf32>
    tpu.vector_store %arg12[%c0_20, %c33, %c0_21], %32 {strides = array<i32>} : memref<3x160x16xf32, #tpu.memory_space<vmem>>, vector<1x8x16xf32>,
    %c1_22 = arith.constant 1 : index
    %c32_23 = arith.constant 32 : index
    %c0_24 = arith.constant 0 : index
    %33 = vector.load %arg12[%c1_22, %c32_23, %c0_24] : memref<3x160x16xf32, #tpu.memory_space<vmem>>, vector<1x8x16xf32>
    %34 = vector.shape_cast %33 : vector<1x8x16xf32> to vector<8x16xf32>
    %35 = vector.shape_cast %29 : vector<8x16xf32> to vector<1x8x16xf32>
    tpu.vector_store %arg12[%c1_22, %c32_23, %c0_24], %35 {strides = array<i32>} : memref<3x160x16xf32, #tpu.memory_space<vmem>>, vector<1x8x16xf32>,
    %c2_25 = arith.constant 2 : index
    %c31 = arith.constant 31 : index
    %c0_26 = arith.constant 0 : index
    %36 = vector.load %arg12[%c2_25, %c31, %c0_26] : memref<3x160x16xf32, #tpu.memory_space<vmem>>, vector<1x8x16xf32>
    %37 = vector.shape_cast %36 : vector<1x8x16xf32> to vector<8x16xf32>
    %38 = vector.shape_cast %29 : vector<8x16xf32> to vector<1x8x16xf32>
    tpu.vector_store %arg12[%c2_25, %c31, %c0_26], %38 {strides = array<i32>} : memref<3x160x16xf32, #tpu.memory_space<vmem>>, vector<1x8x16xf32>,
    %c64 = arith.constant 64 : index
    %c0_27 = arith.constant 0 : index
    %39 = tpu.strided_load %arg11[%c64, %c0_27] {strides = array<i32: 2, 1>} : memref<240x16xf32, #tpu.memory_space<vmem>>, vector<8x16xf32>
    %c0_28 = arith.constant 0 : index
    %c49 = arith.constant 49 : index
    %c0_29 = arith.constant 0 : index
    %40 = vector.load %arg12[%c0_28, %c49, %c0_29] : memref<3x160x16xf32, #tpu.memory_space<vmem>>, vector<1x8x16xf32>
    %41 = vector.shape_cast %40 : vector<1x8x16xf32> to vector<8x16xf32>
    %42 = vector.shape_cast %39 : vector<8x16xf32> to vector<1x8x16xf32>
    tpu.vector_store %arg12[%c0_28, %c49, %c0_29], %42 {strides = array<i32>} : memref<3x160x16xf32, #tpu.memory_space<vmem>>, vector<1x8x16xf32>,
    %c1_30 = arith.constant 1 : index
    %c48 = arith.constant 48 : index
    %c0_31 = arith.constant 0 : index
    %43 = vector.load %arg12[%c1_30, %c48, %c0_31] : memref<3x160x16xf32, #tpu.memory_space<vmem>>, vector<1x8x16xf32>
    %44 = vector.shape_cast %43 : vector<1x8x16xf32> to vector<8x16xf32>
    %45 = vector.shape_cast %39 : vector<8x16xf32> to vector<1x8x16xf32>
    tpu.vector_store %arg12[%c1_30, %c48, %c0_31], %45 {strides = array<i32>} : memref<3x160x16xf32, #tpu.memory_space<vmem>>, vector<1x8x16xf32>,
    %c2_32 = arith.constant 2 : index
    %c47 = arith.constant 47 : index
    %c0_33 = arith.constant 0 : index
    %46 = vector.load %arg12[%c2_32, %c47, %c0_33] : memref<3x160x16xf32, #tpu.memory_space<vmem>>, vector<1x8x16xf32>
    %47 = vector.shape_cast %46 : vector<1x8x16xf32> to vector<8x16xf32>
    %48 = vector.shape_cast %39 : vector<8x16xf32> to vector<1x8x16xf32>
    tpu.vector_store %arg12[%c2_32, %c47, %c0_33], %48 {strides = array<i32>} : memref<3x160x16xf32, #tpu.memory_space<vmem>>, vector<1x8x16xf32>,
    %c96 = arith.constant 96 : index
    %c0_34 = arith.constant 0 : index
    %49 = tpu.strided_load %arg11[%c96, %c0_34] {strides = array<i32: 2, 1>} : memref<240x16xf32, #tpu.memory_space<vmem>>, vector<8x16xf32>
    %c0_35 = arith.constant 0 : index
    %c65 = arith.constant 65 : index
    %c0_36 = arith.constant 0 : index
    %50 = vector.load %arg12[%c0_35, %c65, %c0_36] : memref<3x160x16xf32, #tpu.memory_space<vmem>>, vector<1x8x16xf32>
    %51 = vector.shape_cast %50 : vector<1x8x16xf32> to vector<8x16xf32>
    %52 = vector.shape_cast %49 : vector<8x16xf32> to vector<1x8x16xf32>
    tpu.vector_store %arg12[%c0_35, %c65, %c0_36], %52 {strides = array<i32>} : memref<3x160x16xf32, #tpu.memory_space<vmem>>, vector<1x8x16xf32>,
    %c1_37 = arith.constant 1 : index
    %c64_38 = arith.constant 64 : index
    %c0_39 = arith.constant 0 : index
    %53 = vector.load %arg12[%c1_37, %c64_38, %c0_39] : memref<3x160x16xf32, #tpu.memory_space<vmem>>, vector<1x8x16xf32>
    %54 = vector.shape_cast %53 : vector<1x8x16xf32> to vector<8x16xf32>
    %55 = vector.shape_cast %49 : vector<8x16xf32> to vector<1x8x16xf32>
    tpu.vector_store %arg12[%c1_37, %c64_38, %c0_39], %55 {strides = array<i32>} : memref<3x160x16xf32, #tpu.memory_space<vmem>>, vector<1x8x16xf32>,
    %c2_40 = arith.constant 2 : index
    %c63 = arith.constant 63 : index
    %c0_41 = arith.constant 0 : index
    %56 = vector.load %arg12[%c2_40, %c63, %c0_41] : memref<3x160x16xf32, #tpu.memory_space<vmem>>, vector<1x8x16xf32>
    %57 = vector.shape_cast %56 : vector<1x8x16xf32> to vector<8x16xf32>
    %58 = vector.shape_cast %49 : vector<8x16xf32> to vector<1x8x16xf32>
    tpu.vector_store %arg12[%c2_40, %c63, %c0_41], %58 {strides = array<i32>} : memref<3x160x16xf32, #tpu.memory_space<vmem>>, vector<1x8x16xf32>,
    %c128 = arith.constant 128 : index
    %c0_42 = arith.constant 0 : index
    %59 = tpu.strided_load %arg11[%c128, %c0_42] {strides = array<i32: 2, 1>} : memref<240x16xf32, #tpu.memory_space<vmem>>, vector<8x16xf32>
    %c0_43 = arith.constant 0 : index
    %c81 = arith.constant 81 : index
    %c0_44 = arith.constant 0 : index
    %60 = vector.load %arg12[%c0_43, %c81, %c0_44] : memref<3x160x16xf32, #tpu.memory_space<vmem>>, vector<1x8x16xf32>
    %61 = vector.shape_cast %60 : vector<1x8x16xf32> to vector<8x16xf32>
    %62 = vector.shape_cast %59 : vector<8x16xf32> to vector<1x8x16xf32>
    tpu.vector_store %arg12[%c0_43, %c81, %c0_44], %62 {strides = array<i32>} : memref<3x160x16xf32, #tpu.memory_space<vmem>>, vector<1x8x16xf32>,
    %c1_45 = arith.constant 1 : index
    %c80 = arith.constant 80 : index
    %c0_46 = arith.constant 0 : index
    %63 = vector.load %arg12[%c1_45, %c80, %c0_46] : memref<3x160x16xf32, #tpu.memory_space<vmem>>, vector<1x8x16xf32>
    %64 = vector.shape_cast %63 : vector<1x8x16xf32> to vector<8x16xf32>
    %65 = vector.shape_cast %59 : vector<8x16xf32> to vector<1x8x16xf32>
    tpu.vector_store %arg12[%c1_45, %c80, %c0_46], %65 {strides = array<i32>} : memref<3x160x16xf32, #tpu.memory_space<vmem>>, vector<1x8x16xf32>,
    %c2_47 = arith.constant 2 : index
    %c79 = arith.constant 79 : index
    %c0_48 = arith.constant 0 : index
    %66 = vector.load %arg12[%c2_47, %c79, %c0_48] : memref<3x160x16xf32, #tpu.memory_space<vmem>>, vector<1x8x16xf32>
    %67 = vector.shape_cast %66 : vector<1x8x16xf32> to vector<8x16xf32>
    %68 = vector.shape_cast %59 : vector<8x16xf32> to vector<1x8x16xf32>
    tpu.vector_store %arg12[%c2_47, %c79, %c0_48], %68 {strides = array<i32>} : memref<3x160x16xf32, #tpu.memory_space<vmem>>, vector<1x8x16xf32>,
    %c160 = arith.constant 160 : index
    %c0_49 = arith.constant 0 : index
    %69 = tpu.strided_load %arg11[%c160, %c0_49] {strides = array<i32: 2, 1>} : memref<240x16xf32, #tpu.memory_space<vmem>>, vector<8x16xf32>
    %c0_50 = arith.constant 0 : index
    %c97 = arith.constant 97 : index
    %c0_51 = arith.constant 0 : index
    %70 = vector.load %arg12[%c0_50, %c97, %c0_51] : memref<3x160x16xf32, #tpu.memory_space<vmem>>, vector<1x8x16xf32>
    %71 = vector.shape_cast %70 : vector<1x8x16xf32> to vector<8x16xf32>
    %72 = vector.shape_cast %69 : vector<8x16xf32> to vector<1x8x16xf32>
    tpu.vector_store %arg12[%c0_50, %c97, %c0_51], %72 {strides = array<i32>} : memref<3x160x16xf32, #tpu.memory_space<vmem>>, vector<1x8x16xf32>,
    %c1_52 = arith.constant 1 : index
    %c96_53 = arith.constant 96 : index
    %c0_54 = arith.constant 0 : index
    %73 = vector.load %arg12[%c1_52, %c96_53, %c0_54] : memref<3x160x16xf32, #tpu.memory_space<vmem>>, vector<1x8x16xf32>
    %74 = vector.shape_cast %73 : vector<1x8x16xf32> to vector<8x16xf32>
    %75 = vector.shape_cast %69 : vector<8x16xf32> to vector<1x8x16xf32>
    tpu.vector_store %arg12[%c1_52, %c96_53, %c0_54], %75 {strides = array<i32>} : memref<3x160x16xf32, #tpu.memory_space<vmem>>, vector<1x8x16xf32>,
    %c2_55 = arith.constant 2 : index
    %c95 = arith.constant 95 : index
    %c0_56 = arith.constant 0 : index
    %76 = vector.load %arg12[%c2_55, %c95, %c0_56] : memref<3x160x16xf32, #tpu.memory_space<vmem>>, vector<1x8x16xf32>
    %77 = vector.shape_cast %76 : vector<1x8x16xf32> to vector<8x16xf32>
    %78 = vector.shape_cast %69 : vector<8x16xf32> to vector<1x8x16xf32>
    tpu.vector_store %arg12[%c2_55, %c95, %c0_56], %78 {strides = array<i32>} : memref<3x160x16xf32, #tpu.memory_space<vmem>>, vector<1x8x16xf32>,
    %c192 = arith.constant 192 : index
    %c0_57 = arith.constant 0 : index
    %79 = tpu.strided_load %arg11[%c192, %c0_57] {strides = array<i32: 2, 1>} : memref<240x16xf32, #tpu.memory_space<vmem>>, vector<8x16xf32>
    %c0_58 = arith.constant 0 : index
    %c113 = arith.constant 113 : index
    %c0_59 = arith.constant 0 : index
    %80 = vector.load %arg12[%c0_58, %c113, %c0_59] : memref<3x160x16xf32, #tpu.memory_space<vmem>>, vector<1x8x16xf32>
    %81 = vector.shape_cast %80 : vector<1x8x16xf32> to vector<8x16xf32>
    %82 = vector.shape_cast %79 : vector<8x16xf32> to vector<1x8x16xf32>
    tpu.vector_store %arg12[%c0_58, %c113, %c0_59], %82 {strides = array<i32>} : memref<3x160x16xf32, #tpu.memory_space<vmem>>, vector<1x8x16xf32>,
    %c1_60 = arith.constant 1 : index
    %c112 = arith.constant 112 : index
    %c0_61 = arith.constant 0 : index
    %83 = vector.load %arg12[%c1_60, %c112, %c0_61] : memref<3x160x16xf32, #tpu.memory_space<vmem>>, vector<1x8x16xf32>
    %84 = vector.shape_cast %83 : vector<1x8x16xf32> to vector<8x16xf32>
    %85 = vector.shape_cast %79 : vector<8x16xf32> to vector<1x8x16xf32>
    tpu.vector_store %arg12[%c1_60, %c112, %c0_61], %85 {strides = array<i32>} : memref<3x160x16xf32, #tpu.memory_space<vmem>>, vector<1x8x16xf32>,
    %c2_62 = arith.constant 2 : index
    %c111 = arith.constant 111 : index
    %c0_63 = arith.constant 0 : index
    %86 = vector.load %arg12[%c2_62, %c111, %c0_63] : memref<3x160x16xf32, #tpu.memory_space<vmem>>, vector<1x8x16xf32>
    %87 = vector.shape_cast %86 : vector<1x8x16xf32> to vector<8x16xf32>
    %88 = vector.shape_cast %79 : vector<8x16xf32> to vector<1x8x16xf32>
    tpu.vector_store %arg12[%c2_62, %c111, %c0_63], %88 {strides = array<i32>} : memref<3x160x16xf32, #tpu.memory_space<vmem>>, vector<1x8x16xf32>,
    %c224 = arith.constant 224 : index
    %c0_64 = arith.constant 0 : index
    %89 = tpu.strided_load %arg11[%c224, %c0_64] {strides = array<i32: 2, 1>} : memref<240x16xf32, #tpu.memory_space<vmem>>, vector<8x16xf32>
    %c0_65 = arith.constant 0 : index
    %c129 = arith.constant 129 : index
    %c0_66 = arith.constant 0 : index
    %90 = vector.load %arg12[%c0_65, %c129, %c0_66] : memref<3x160x16xf32, #tpu.memory_space<vmem>>, vector<1x8x16xf32>
    %91 = vector.shape_cast %90 : vector<1x8x16xf32> to vector<8x16xf32>
    %92 = vector.shape_cast %89 : vector<8x16xf32> to vector<1x8x16xf32>
    tpu.vector_store %arg12[%c0_65, %c129, %c0_66], %92 {strides = array<i32>} : memref<3x160x16xf32, #tpu.memory_space<vmem>>, vector<1x8x16xf32>,
    %c1_67 = arith.constant 1 : index
    %c128_68 = arith.constant 128 : index
    %c0_69 = arith.constant 0 : index
    %93 = vector.load %arg12[%c1_67, %c128_68, %c0_69] : memref<3x160x16xf32, #tpu.memory_space<vmem>>, vector<1x8x16xf32>
    %94 = vector.shape_cast %93 : vector<1x8x16xf32> to vector<8x16xf32>
    %95 = vector.shape_cast %89 : vector<8x16xf32> to vector<1x8x16xf32>
    tpu.vector_store %arg12[%c1_67, %c128_68, %c0_69], %95 {strides = array<i32>} : memref<3x160x16xf32, #tpu.memory_space<vmem>>, vector<1x8x16xf32>,
    %c2_70 = arith.constant 2 : index
    %c127 = arith.constant 127 : index
    %c0_71 = arith.constant 0 : index
    %96 = vector.load %arg12[%c2_70, %c127, %c0_71] : memref<3x160x16xf32, #tpu.memory_space<vmem>>, vector<1x8x16xf32>
    %97 = vector.shape_cast %96 : vector<1x8x16xf32> to vector<8x16xf32>
    %98 = vector.shape_cast %89 : vector<8x16xf32> to vector<1x8x16xf32>
    tpu.vector_store %arg12[%c2_70, %c127, %c0_71], %98 {strides = array<i32>} : memref<3x160x16xf32, #tpu.memory_space<vmem>>, vector<1x8x16xf32>,
    %c0_72 = arith.constant 0 : index
    %c0_73 = arith.constant 0 : index
    %c0_74 = arith.constant 0 : index
    %99 = vector.load %arg12[%c0_72, %c0_73, %c0_74] : memref<3x160x16xf32, #tpu.memory_space<vmem>>, vector<3x160x16xf32>
    %100 = arith.truncf %99 : vector<3x160x16xf32> to vector<3x160x16xbf16>
    %101 = vector.extract_strided_slice %100 {offsets = [0, 0, 0], sizes = [1, 128, 16], strides = [1, 1, 1]} : vector<3x160x16xbf16> to vector<1x128x16xbf16>
    %102 = vector.shape_cast %101 : vector<1x128x16xbf16> to vector<128x16xbf16>
    %c0_75 = arith.constant 0 : index
    %c0_76 = arith.constant 0 : index
    %c0_77 = arith.constant 0 : index
    %103 = vector.load %arg4[%c0_75, %c0_76, %c0_77] : memref<9x16x32xbf16, #tpu.memory_space<vmem>>, vector<1x16x32xbf16>
    %104 = vector.shape_cast %103 : vector<1x16x32xbf16> to vector<16x32xbf16>
    %cst_78 = arith.constant dense<0.000000e+00> : vector<128x32xf32>
    %105 = tpu.matmul %102, %104, %cst_78 {dimension_numbers = #tpu.dot_dimension_numbers<[1], [0], [0], [1], [0, 0, 1, 1], [], []>} : vector<128x16xbf16>, vector<16x32xbf16>, vector<128x32xf32> -> vector<128x32xf32>
    %106 = vector.extract_strided_slice %100 {offsets = [1, 0, 0], sizes = [1, 128, 16], strides = [1, 1, 1]} : vector<3x160x16xbf16> to vector<1x128x16xbf16>
    %107 = vector.shape_cast %106 : vector<1x128x16xbf16> to vector<128x16xbf16>
    %c1_79 = arith.constant 1 : index
    %c0_80 = arith.constant 0 : index
    %c0_81 = arith.constant 0 : index
    %108 = vector.load %arg4[%c1_79, %c0_80, %c0_81] : memref<9x16x32xbf16, #tpu.memory_space<vmem>>, vector<1x16x32xbf16>
    %109 = vector.shape_cast %108 : vector<1x16x32xbf16> to vector<16x32xbf16>
    %cst_82 = arith.constant dense<0.000000e+00> : vector<128x32xf32>
    %110 = tpu.matmul %107, %109, %cst_82 {dimension_numbers = #tpu.dot_dimension_numbers<[1], [0], [0], [1], [0, 0, 1, 1], [], []>} : vector<128x16xbf16>, vector<16x32xbf16>, vector<128x32xf32> -> vector<128x32xf32>
    %111 = arith.addf %105, %110 : vector<128x32xf32>
    %112 = vector.extract_strided_slice %100 {offsets = [2, 0, 0], sizes = [1, 128, 16], strides = [1, 1, 1]} : vector<3x160x16xbf16> to vector<1x128x16xbf16>
    %113 = vector.shape_cast %112 : vector<1x128x16xbf16> to vector<128x16xbf16>
    %c2_83 = arith.constant 2 : index
    %c0_84 = arith.constant 0 : index
    %c0_85 = arith.constant 0 : index
    %114 = vector.load %arg4[%c2_83, %c0_84, %c0_85] : memref<9x16x32xbf16, #tpu.memory_space<vmem>>, vector<1x16x32xbf16>
    %115 = vector.shape_cast %114 : vector<1x16x32xbf16> to vector<16x32xbf16>
    %cst_86 = arith.constant dense<0.000000e+00> : vector<128x32xf32>
    %116 = tpu.matmul %113, %115, %cst_86 {dimension_numbers = #tpu.dot_dimension_numbers<[1], [0], [0], [1], [0, 0, 1, 1], [], []>} : vector<128x16xbf16>, vector<16x32xbf16>, vector<128x32xf32> -> vector<128x32xf32>
    %117 = arith.addf %111, %116 : vector<128x32xf32>
    %118 = vector.extract_strided_slice %100 {offsets = [0, 16, 0], sizes = [1, 128, 16], strides = [1, 1, 1]} : vector<3x160x16xbf16> to vector<1x128x16xbf16>
    %119 = vector.shape_cast %118 : vector<1x128x16xbf16> to vector<128x16xbf16>
    %c3 = arith.constant 3 : index
    %c0_87 = arith.constant 0 : index
    %c0_88 = arith.constant 0 : index
    %120 = vector.load %arg4[%c3, %c0_87, %c0_88] : memref<9x16x32xbf16, #tpu.memory_space<vmem>>, vector<1x16x32xbf16>
    %121 = vector.shape_cast %120 : vector<1x16x32xbf16> to vector<16x32xbf16>
    %cst_89 = arith.constant dense<0.000000e+00> : vector<128x32xf32>
    %122 = tpu.matmul %119, %121, %cst_89 {dimension_numbers = #tpu.dot_dimension_numbers<[1], [0], [0], [1], [0, 0, 1, 1], [], []>} : vector<128x16xbf16>, vector<16x32xbf16>, vector<128x32xf32> -> vector<128x32xf32>
    %123 = arith.addf %117, %122 : vector<128x32xf32>
    %124 = vector.extract_strided_slice %100 {offsets = [1, 16, 0], sizes = [1, 128, 16], strides = [1, 1, 1]} : vector<3x160x16xbf16> to vector<1x128x16xbf16>
    %125 = vector.shape_cast %124 : vector<1x128x16xbf16> to vector<128x16xbf16>
    %c4 = arith.constant 4 : index
    %c0_90 = arith.constant 0 : index
    %c0_91 = arith.constant 0 : index
    %126 = vector.load %arg4[%c4, %c0_90, %c0_91] : memref<9x16x32xbf16, #tpu.memory_space<vmem>>, vector<1x16x32xbf16>
    %127 = vector.shape_cast %126 : vector<1x16x32xbf16> to vector<16x32xbf16>
    %cst_92 = arith.constant dense<0.000000e+00> : vector<128x32xf32>
    %128 = tpu.matmul %125, %127, %cst_92 {dimension_numbers = #tpu.dot_dimension_numbers<[1], [0], [0], [1], [0, 0, 1, 1], [], []>} : vector<128x16xbf16>, vector<16x32xbf16>, vector<128x32xf32> -> vector<128x32xf32>
    %129 = arith.addf %123, %128 : vector<128x32xf32>
    %130 = vector.extract_strided_slice %100 {offsets = [2, 16, 0], sizes = [1, 128, 16], strides = [1, 1, 1]} : vector<3x160x16xbf16> to vector<1x128x16xbf16>
    %131 = vector.shape_cast %130 : vector<1x128x16xbf16> to vector<128x16xbf16>
    %c5 = arith.constant 5 : index
    %c0_93 = arith.constant 0 : index
    %c0_94 = arith.constant 0 : index
    %132 = vector.load %arg4[%c5, %c0_93, %c0_94] : memref<9x16x32xbf16, #tpu.memory_space<vmem>>, vector<1x16x32xbf16>
    %133 = vector.shape_cast %132 : vector<1x16x32xbf16> to vector<16x32xbf16>
    %cst_95 = arith.constant dense<0.000000e+00> : vector<128x32xf32>
    %134 = tpu.matmul %131, %133, %cst_95 {dimension_numbers = #tpu.dot_dimension_numbers<[1], [0], [0], [1], [0, 0, 1, 1], [], []>} : vector<128x16xbf16>, vector<16x32xbf16>, vector<128x32xf32> -> vector<128x32xf32>
    %135 = arith.addf %129, %134 : vector<128x32xf32>
    %136 = vector.extract_strided_slice %100 {offsets = [0, 32, 0], sizes = [1, 128, 16], strides = [1, 1, 1]} : vector<3x160x16xbf16> to vector<1x128x16xbf16>
    %137 = vector.shape_cast %136 : vector<1x128x16xbf16> to vector<128x16xbf16>
    %c6 = arith.constant 6 : index
    %c0_96 = arith.constant 0 : index
    %c0_97 = arith.constant 0 : index
    %138 = vector.load %arg4[%c6, %c0_96, %c0_97] : memref<9x16x32xbf16, #tpu.memory_space<vmem>>, vector<1x16x32xbf16>
    %139 = vector.shape_cast %138 : vector<1x16x32xbf16> to vector<16x32xbf16>
    %cst_98 = arith.constant dense<0.000000e+00> : vector<128x32xf32>
    %140 = tpu.matmul %137, %139, %cst_98 {dimension_numbers = #tpu.dot_dimension_numbers<[1], [0], [0], [1], [0, 0, 1, 1], [], []>} : vector<128x16xbf16>, vector<16x32xbf16>, vector<128x32xf32> -> vector<128x32xf32>
    %141 = arith.addf %135, %140 : vector<128x32xf32>
    %142 = vector.extract_strided_slice %100 {offsets = [1, 32, 0], sizes = [1, 128, 16], strides = [1, 1, 1]} : vector<3x160x16xbf16> to vector<1x128x16xbf16>
    %143 = vector.shape_cast %142 : vector<1x128x16xbf16> to vector<128x16xbf16>
    %c7 = arith.constant 7 : index
    %c0_99 = arith.constant 0 : index
    %c0_100 = arith.constant 0 : index
    %144 = vector.load %arg4[%c7, %c0_99, %c0_100] : memref<9x16x32xbf16, #tpu.memory_space<vmem>>, vector<1x16x32xbf16>
    %145 = vector.shape_cast %144 : vector<1x16x32xbf16> to vector<16x32xbf16>
    %cst_101 = arith.constant dense<0.000000e+00> : vector<128x32xf32>
    %146 = tpu.matmul %143, %145, %cst_101 {dimension_numbers = #tpu.dot_dimension_numbers<[1], [0], [0], [1], [0, 0, 1, 1], [], []>} : vector<128x16xbf16>, vector<16x32xbf16>, vector<128x32xf32> -> vector<128x32xf32>
    %147 = arith.addf %141, %146 : vector<128x32xf32>
    %148 = vector.extract_strided_slice %100 {offsets = [2, 32, 0], sizes = [1, 128, 16], strides = [1, 1, 1]} : vector<3x160x16xbf16> to vector<1x128x16xbf16>
    %149 = vector.shape_cast %148 : vector<1x128x16xbf16> to vector<128x16xbf16>
    %c8 = arith.constant 8 : index
    %c0_102 = arith.constant 0 : index
    %c0_103 = arith.constant 0 : index
    %150 = vector.load %arg4[%c8, %c0_102, %c0_103] : memref<9x16x32xbf16, #tpu.memory_space<vmem>>, vector<1x16x32xbf16>
    %151 = vector.shape_cast %150 : vector<1x16x32xbf16> to vector<16x32xbf16>
    %cst_104 = arith.constant dense<0.000000e+00> : vector<128x32xf32>
    %152 = tpu.matmul %149, %151, %cst_104 {dimension_numbers = #tpu.dot_dimension_numbers<[1], [0], [0], [1], [0, 0, 1, 1], [], []>} : vector<128x16xbf16>, vector<16x32xbf16>, vector<128x32xf32> -> vector<128x32xf32>
    %153 = arith.addf %147, %152 : vector<128x32xf32>
    %c0_105 = arith.constant 0 : index
    %c0_106 = arith.constant 0 : index
    %154 = vector.load %arg5[%c0_105, %c0_106] : memref<1x32xf32, #tpu.memory_space<vmem>>, vector<1x32xf32>
    %155 = vector.broadcast %154 : vector<1x32xf32> to vector<128x32xf32>
    %156 = arith.addf %153, %155 : vector<128x32xf32>
    %cst_107 = arith.constant 0.000000e+00 : f32
    %157 = vector.broadcast %cst_107 : f32 to vector<128x32xf32>
    %158 = arith.maximumf %156, %157 : vector<128x32xf32>
    %159 = vector.extract_strided_slice %158 {offsets = [0, 0], sizes = [103, 32], strides = [1, 1]} : vector<128x32xf32> to vector<103x32xf32>
    %160 = vector.extract_strided_slice %158 {offsets = [1, 0], sizes = [103, 32], strides = [1, 1]} : vector<128x32xf32> to vector<103x32xf32>
    %161 = arith.maximumf %159, %160 : vector<103x32xf32>
    %162 = vector.extract_strided_slice %158 {offsets = [16, 0], sizes = [103, 32], strides = [1, 1]} : vector<128x32xf32> to vector<103x32xf32>
    %163 = vector.extract_strided_slice %158 {offsets = [17, 0], sizes = [103, 32], strides = [1, 1]} : vector<128x32xf32> to vector<103x32xf32>
    %164 = arith.maximumf %162, %163 : vector<103x32xf32>
    %165 = arith.maximumf %161, %164 : vector<103x32xf32>
    %c0_108 = arith.constant 0 : index
    %c0_109 = arith.constant 0 : index
    %166 = vector.load %arg13[%c0_108, %c0_109] : memref<104x32xf32, #tpu.memory_space<vmem>>, vector<103x32xf32>
    tpu.vector_store %arg13[%c0_108, %c0_109], %165 {strides = array<i32>} : memref<104x32xf32, #tpu.memory_space<vmem>>, vector<103x32xf32>,
    %cst_110 = arith.constant 0.000000e+00 : f32
    %167 = vector.broadcast %cst_110 : f32 to vector<3x48x32xf32>
    %c0_111 = arith.constant 0 : index
    %c0_112 = arith.constant 0 : index
    %c0_113 = arith.constant 0 : index
    %168 = vector.load %arg14[%c0_111, %c0_112, %c0_113] : memref<3x48x32xf32, #tpu.memory_space<vmem>>, vector<3x48x32xf32>
    tpu.vector_store %arg14[%c0_111, %c0_112, %c0_113], %167 {strides = array<i32>} : memref<3x48x32xf32, #tpu.memory_space<vmem>>, vector<3x48x32xf32>,
    %c0_114 = arith.constant 0 : index
    %c0_115 = arith.constant 0 : index
    %169 = tpu.strided_load %arg13[%c0_114, %c0_115] {strides = array<i32: 2, 1>} : memref<104x32xf32, #tpu.memory_space<vmem>>, vector<4x32xf32>
    %c0_116 = arith.constant 0 : index
    %c9 = arith.constant 9 : index
    %c0_117 = arith.constant 0 : index
    %170 = vector.load %arg14[%c0_116, %c9, %c0_117] : memref<3x48x32xf32, #tpu.memory_space<vmem>>, vector<1x4x32xf32>
    %171 = vector.shape_cast %170 : vector<1x4x32xf32> to vector<4x32xf32>
    %172 = vector.shape_cast %169 : vector<4x32xf32> to vector<1x4x32xf32>
    tpu.vector_store %arg14[%c0_116, %c9, %c0_117], %172 {strides = array<i32>} : memref<3x48x32xf32, #tpu.memory_space<vmem>>, vector<1x4x32xf32>,
    %c1_118 = arith.constant 1 : index
    %c8_119 = arith.constant 8 : index
    %c0_120 = arith.constant 0 : index
    %173 = vector.load %arg14[%c1_118, %c8_119, %c0_120] : memref<3x48x32xf32, #tpu.memory_space<vmem>>, vector<1x4x32xf32>
    %174 = vector.shape_cast %173 : vector<1x4x32xf32> to vector<4x32xf32>
    %175 = vector.shape_cast %169 : vector<4x32xf32> to vector<1x4x32xf32>
    tpu.vector_store %arg14[%c1_118, %c8_119, %c0_120], %175 {strides = array<i32>} : memref<3x48x32xf32, #tpu.memory_space<vmem>>, vector<1x4x32xf32>,
    %c2_121 = arith.constant 2 : index
    %c7_122 = arith.constant 7 : index
    %c0_123 = arith.constant 0 : index
    %176 = vector.load %arg14[%c2_121, %c7_122, %c0_123] : memref<3x48x32xf32, #tpu.memory_space<vmem>>, vector<1x4x32xf32>
    %177 = vector.shape_cast %176 : vector<1x4x32xf32> to vector<4x32xf32>
    %178 = vector.shape_cast %169 : vector<4x32xf32> to vector<1x4x32xf32>
    tpu.vector_store %arg14[%c2_121, %c7_122, %c0_123], %178 {strides = array<i32>} : memref<3x48x32xf32, #tpu.memory_space<vmem>>, vector<1x4x32xf32>,
    %c32_124 = arith.constant 32 : index
    %c0_125 = arith.constant 0 : index
    %179 = tpu.strided_load %arg13[%c32_124, %c0_125] {strides = array<i32: 2, 1>} : memref<104x32xf32, #tpu.memory_space<vmem>>, vector<4x32xf32>
    %c0_126 = arith.constant 0 : index
    %c17_127 = arith.constant 17 : index
    %c0_128 = arith.constant 0 : index
    %180 = vector.load %arg14[%c0_126, %c17_127, %c0_128] : memref<3x48x32xf32, #tpu.memory_space<vmem>>, vector<1x4x32xf32>
    %181 = vector.shape_cast %180 : vector<1x4x32xf32> to vector<4x32xf32>
    %182 = vector.shape_cast %179 : vector<4x32xf32> to vector<1x4x32xf32>
    tpu.vector_store %arg14[%c0_126, %c17_127, %c0_128], %182 {strides = array<i32>} : memref<3x48x32xf32, #tpu.memory_space<vmem>>, vector<1x4x32xf32>,
    %c1_129 = arith.constant 1 : index
    %c16_130 = arith.constant 16 : index
    %c0_131 = arith.constant 0 : index
    %183 = vector.load %arg14[%c1_129, %c16_130, %c0_131] : memref<3x48x32xf32, #tpu.memory_space<vmem>>, vector<1x4x32xf32>
    %184 = vector.shape_cast %183 : vector<1x4x32xf32> to vector<4x32xf32>
    %185 = vector.shape_cast %179 : vector<4x32xf32> to vector<1x4x32xf32>
    tpu.vector_store %arg14[%c1_129, %c16_130, %c0_131], %185 {strides = array<i32>} : memref<3x48x32xf32, #tpu.memory_space<vmem>>, vector<1x4x32xf32>,
    %c2_132 = arith.constant 2 : index
    %c15_133 = arith.constant 15 : index
    %c0_134 = arith.constant 0 : index
    %186 = vector.load %arg14[%c2_132, %c15_133, %c0_134] : memref<3x48x32xf32, #tpu.memory_space<vmem>>, vector<1x4x32xf32>
    %187 = vector.shape_cast %186 : vector<1x4x32xf32> to vector<4x32xf32>
    %188 = vector.shape_cast %179 : vector<4x32xf32> to vector<1x4x32xf32>
    tpu.vector_store %arg14[%c2_132, %c15_133, %c0_134], %188 {strides = array<i32>} : memref<3x48x32xf32, #tpu.memory_space<vmem>>, vector<1x4x32xf32>,
    %c64_135 = arith.constant 64 : index
    %c0_136 = arith.constant 0 : index
    %189 = tpu.strided_load %arg13[%c64_135, %c0_136] {strides = array<i32: 2, 1>} : memref<104x32xf32, #tpu.memory_space<vmem>>, vector<4x32xf32>
    %c0_137 = arith.constant 0 : index
    %c25 = arith.constant 25 : index
    %c0_138 = arith.constant 0 : index
    %190 = vector.load %arg14[%c0_137, %c25, %c0_138] : memref<3x48x32xf32, #tpu.memory_space<vmem>>, vector<1x4x32xf32>
    %191 = vector.shape_cast %190 : vector<1x4x32xf32> to vector<4x32xf32>
    %192 = vector.shape_cast %189 : vector<4x32xf32> to vector<1x4x32xf32>
    tpu.vector_store %arg14[%c0_137, %c25, %c0_138], %192 {strides = array<i32>} : memref<3x48x32xf32, #tpu.memory_space<vmem>>, vector<1x4x32xf32>,
    %c1_139 = arith.constant 1 : index
    %c24 = arith.constant 24 : index
    %c0_140 = arith.constant 0 : index
    %193 = vector.load %arg14[%c1_139, %c24, %c0_140] : memref<3x48x32xf32, #tpu.memory_space<vmem>>, vector<1x4x32xf32>
    %194 = vector.shape_cast %193 : vector<1x4x32xf32> to vector<4x32xf32>
    %195 = vector.shape_cast %189 : vector<4x32xf32> to vector<1x4x32xf32>
    tpu.vector_store %arg14[%c1_139, %c24, %c0_140], %195 {strides = array<i32>} : memref<3x48x32xf32, #tpu.memory_space<vmem>>, vector<1x4x32xf32>,
    %c2_141 = arith.constant 2 : index
    %c23 = arith.constant 23 : index
    %c0_142 = arith.constant 0 : index
    %196 = vector.load %arg14[%c2_141, %c23, %c0_142] : memref<3x48x32xf32, #tpu.memory_space<vmem>>, vector<1x4x32xf32>
    %197 = vector.shape_cast %196 : vector<1x4x32xf32> to vector<4x32xf32>
    %198 = vector.shape_cast %189 : vector<4x32xf32> to vector<1x4x32xf32>
    tpu.vector_store %arg14[%c2_141, %c23, %c0_142], %198 {strides = array<i32>} : memref<3x48x32xf32, #tpu.memory_space<vmem>>, vector<1x4x32xf32>,
    %c96_143 = arith.constant 96 : index
    %c0_144 = arith.constant 0 : index
    %199 = tpu.strided_load %arg13[%c96_143, %c0_144] {strides = array<i32: 2, 1>} : memref<104x32xf32, #tpu.memory_space<vmem>>, vector<4x32xf32>
    %c0_145 = arith.constant 0 : index
    %c33_146 = arith.constant 33 : index
    %c0_147 = arith.constant 0 : index
    %200 = vector.load %arg14[%c0_145, %c33_146, %c0_147] : memref<3x48x32xf32, #tpu.memory_space<vmem>>, vector<1x4x32xf32>
    %201 = vector.shape_cast %200 : vector<1x4x32xf32> to vector<4x32xf32>
    %202 = vector.shape_cast %199 : vector<4x32xf32> to vector<1x4x32xf32>
    tpu.vector_store %arg14[%c0_145, %c33_146, %c0_147], %202 {strides = array<i32>} : memref<3x48x32xf32, #tpu.memory_space<vmem>>, vector<1x4x32xf32>,
    %c1_148 = arith.constant 1 : index
    %c32_149 = arith.constant 32 : index
    %c0_150 = arith.constant 0 : index
    %203 = vector.load %arg14[%c1_148, %c32_149, %c0_150] : memref<3x48x32xf32, #tpu.memory_space<vmem>>, vector<1x4x32xf32>
    %204 = vector.shape_cast %203 : vector<1x4x32xf32> to vector<4x32xf32>
    %205 = vector.shape_cast %199 : vector<4x32xf32> to vector<1x4x32xf32>
    tpu.vector_store %arg14[%c1_148, %c32_149, %c0_150], %205 {strides = array<i32>} : memref<3x48x32xf32, #tpu.memory_space<vmem>>, vector<1x4x32xf32>,
    %c2_151 = arith.constant 2 : index
    %c31_152 = arith.constant 31 : index
    %c0_153 = arith.constant 0 : index
    %206 = vector.load %arg14[%c2_151, %c31_152, %c0_153] : memref<3x48x32xf32, #tpu.memory_space<vmem>>, vector<1x4x32xf32>
    %207 = vector.shape_cast %206 : vector<1x4x32xf32> to vector<4x32xf32>
    %208 = vector.shape_cast %199 : vector<4x32xf32> to vector<1x4x32xf32>
    tpu.vector_store %arg14[%c2_151, %c31_152, %c0_153], %208 {strides = array<i32>} : memref<3x48x32xf32, #tpu.memory_space<vmem>>, vector<1x4x32xf32>,
    %c0_154 = arith.constant 0 : index
    %c0_155 = arith.constant 0 : index
    %c0_156 = arith.constant 0 : index
    %209 = vector.load %arg14[%c0_154, %c0_155, %c0_156] : memref<3x48x32xf32, #tpu.memory_space<vmem>>, vector<3x48x32xf32>
    %210 = arith.truncf %209 : vector<3x48x32xf32> to vector<3x48x32xbf16>
    %211 = vector.extract_strided_slice %210 {offsets = [0, 0, 0], sizes = [1, 32, 32], strides = [1, 1, 1]} : vector<3x48x32xbf16> to vector<1x32x32xbf16>
    %212 = vector.shape_cast %211 : vector<1x32x32xbf16> to vector<32x32xbf16>
    %c0_157 = arith.constant 0 : index
    %c0_158 = arith.constant 0 : index
    %c0_159 = arith.constant 0 : index
    %213 = vector.load %arg6[%c0_157, %c0_158, %c0_159] : memref<9x32x512xbf16, #tpu.memory_space<vmem>>, vector<1x32x512xbf16>
    %214 = vector.shape_cast %213 : vector<1x32x512xbf16> to vector<32x512xbf16>
    %cst_160 = arith.constant dense<0.000000e+00> : vector<32x512xf32>
    %215 = tpu.matmul %212, %214, %cst_160 {dimension_numbers = #tpu.dot_dimension_numbers<[1], [0], [0], [1], [0, 0, 1, 1], [], []>} : vector<32x32xbf16>, vector<32x512xbf16>, vector<32x512xf32> -> vector<32x512xf32>
    %216 = vector.extract_strided_slice %210 {offsets = [1, 0, 0], sizes = [1, 32, 32], strides = [1, 1, 1]} : vector<3x48x32xbf16> to vector<1x32x32xbf16>
    %217 = vector.shape_cast %216 : vector<1x32x32xbf16> to vector<32x32xbf16>
    %c1_161 = arith.constant 1 : index
    %c0_162 = arith.constant 0 : index
    %c0_163 = arith.constant 0 : index
    %218 = vector.load %arg6[%c1_161, %c0_162, %c0_163] : memref<9x32x512xbf16, #tpu.memory_space<vmem>>, vector<1x32x512xbf16>
    %219 = vector.shape_cast %218 : vector<1x32x512xbf16> to vector<32x512xbf16>
    %cst_164 = arith.constant dense<0.000000e+00> : vector<32x512xf32>
    %220 = tpu.matmul %217, %219, %cst_164 {dimension_numbers = #tpu.dot_dimension_numbers<[1], [0], [0], [1], [0, 0, 1, 1], [], []>} : vector<32x32xbf16>, vector<32x512xbf16>, vector<32x512xf32> -> vector<32x512xf32>
    %221 = arith.addf %215, %220 : vector<32x512xf32>
    %222 = vector.extract_strided_slice %210 {offsets = [2, 0, 0], sizes = [1, 32, 32], strides = [1, 1, 1]} : vector<3x48x32xbf16> to vector<1x32x32xbf16>
    %223 = vector.shape_cast %222 : vector<1x32x32xbf16> to vector<32x32xbf16>
    %c2_165 = arith.constant 2 : index
    %c0_166 = arith.constant 0 : index
    %c0_167 = arith.constant 0 : index
    %224 = vector.load %arg6[%c2_165, %c0_166, %c0_167] : memref<9x32x512xbf16, #tpu.memory_space<vmem>>, vector<1x32x512xbf16>
    %225 = vector.shape_cast %224 : vector<1x32x512xbf16> to vector<32x512xbf16>
    %cst_168 = arith.constant dense<0.000000e+00> : vector<32x512xf32>
    %226 = tpu.matmul %223, %225, %cst_168 {dimension_numbers = #tpu.dot_dimension_numbers<[1], [0], [0], [1], [0, 0, 1, 1], [], []>} : vector<32x32xbf16>, vector<32x512xbf16>, vector<32x512xf32> -> vector<32x512xf32>
    %227 = arith.addf %221, %226 : vector<32x512xf32>
    %228 = vector.extract_strided_slice %210 {offsets = [0, 8, 0], sizes = [1, 32, 32], strides = [1, 1, 1]} : vector<3x48x32xbf16> to vector<1x32x32xbf16>
    %229 = vector.shape_cast %228 : vector<1x32x32xbf16> to vector<32x32xbf16>
    %c3_169 = arith.constant 3 : index
    %c0_170 = arith.constant 0 : index
    %c0_171 = arith.constant 0 : index
    %230 = vector.load %arg6[%c3_169, %c0_170, %c0_171] : memref<9x32x512xbf16, #tpu.memory_space<vmem>>, vector<1x32x512xbf16>
    %231 = vector.shape_cast %230 : vector<1x32x512xbf16> to vector<32x512xbf16>
    %cst_172 = arith.constant dense<0.000000e+00> : vector<32x512xf32>
    %232 = tpu.matmul %229, %231, %cst_172 {dimension_numbers = #tpu.dot_dimension_numbers<[1], [0], [0], [1], [0, 0, 1, 1], [], []>} : vector<32x32xbf16>, vector<32x512xbf16>, vector<32x512xf32> -> vector<32x512xf32>
    %233 = arith.addf %227, %232 : vector<32x512xf32>
    %234 = vector.extract_strided_slice %210 {offsets = [1, 8, 0], sizes = [1, 32, 32], strides = [1, 1, 1]} : vector<3x48x32xbf16> to vector<1x32x32xbf16>
    %235 = vector.shape_cast %234 : vector<1x32x32xbf16> to vector<32x32xbf16>
    %c4_173 = arith.constant 4 : index
    %c0_174 = arith.constant 0 : index
    %c0_175 = arith.constant 0 : index
    %236 = vector.load %arg6[%c4_173, %c0_174, %c0_175] : memref<9x32x512xbf16, #tpu.memory_space<vmem>>, vector<1x32x512xbf16>
    %237 = vector.shape_cast %236 : vector<1x32x512xbf16> to vector<32x512xbf16>
    %cst_176 = arith.constant dense<0.000000e+00> : vector<32x512xf32>
    %238 = tpu.matmul %235, %237, %cst_176 {dimension_numbers = #tpu.dot_dimension_numbers<[1], [0], [0], [1], [0, 0, 1, 1], [], []>} : vector<32x32xbf16>, vector<32x512xbf16>, vector<32x512xf32> -> vector<32x512xf32>
    %239 = arith.addf %233, %238 : vector<32x512xf32>
    %240 = vector.extract_strided_slice %210 {offsets = [2, 8, 0], sizes = [1, 32, 32], strides = [1, 1, 1]} : vector<3x48x32xbf16> to vector<1x32x32xbf16>
    %241 = vector.shape_cast %240 : vector<1x32x32xbf16> to vector<32x32xbf16>
    %c5_177 = arith.constant 5 : index
    %c0_178 = arith.constant 0 : index
    %c0_179 = arith.constant 0 : index
    %242 = vector.load %arg6[%c5_177, %c0_178, %c0_179] : memref<9x32x512xbf16, #tpu.memory_space<vmem>>, vector<1x32x512xbf16>
    %243 = vector.shape_cast %242 : vector<1x32x512xbf16> to vector<32x512xbf16>
    %cst_180 = arith.constant dense<0.000000e+00> : vector<32x512xf32>
    %244 = tpu.matmul %241, %243, %cst_180 {dimension_numbers = #tpu.dot_dimension_numbers<[1], [0], [0], [1], [0, 0, 1, 1], [], []>} : vector<32x32xbf16>, vector<32x512xbf16>, vector<32x512xf32> -> vector<32x512xf32>
    %245 = arith.addf %239, %244 : vector<32x512xf32>
    %246 = vector.extract_strided_slice %210 {offsets = [0, 16, 0], sizes = [1, 32, 32], strides = [1, 1, 1]} : vector<3x48x32xbf16> to vector<1x32x32xbf16>
    %247 = vector.shape_cast %246 : vector<1x32x32xbf16> to vector<32x32xbf16>
    %c6_181 = arith.constant 6 : index
    %c0_182 = arith.constant 0 : index
    %c0_183 = arith.constant 0 : index
    %248 = vector.load %arg6[%c6_181, %c0_182, %c0_183] : memref<9x32x512xbf16, #tpu.memory_space<vmem>>, vector<1x32x512xbf16>
    %249 = vector.shape_cast %248 : vector<1x32x512xbf16> to vector<32x512xbf16>
    %cst_184 = arith.constant dense<0.000000e+00> : vector<32x512xf32>
    %250 = tpu.matmul %247, %249, %cst_184 {dimension_numbers = #tpu.dot_dimension_numbers<[1], [0], [0], [1], [0, 0, 1, 1], [], []>} : vector<32x32xbf16>, vector<32x512xbf16>, vector<32x512xf32> -> vector<32x512xf32>
    %251 = arith.addf %245, %250 : vector<32x512xf32>
    %252 = vector.extract_strided_slice %210 {offsets = [1, 16, 0], sizes = [1, 32, 32], strides = [1, 1, 1]} : vector<3x48x32xbf16> to vector<1x32x32xbf16>
    %253 = vector.shape_cast %252 : vector<1x32x32xbf16> to vector<32x32xbf16>
    %c7_185 = arith.constant 7 : index
    %c0_186 = arith.constant 0 : index
    %c0_187 = arith.constant 0 : index
    %254 = vector.load %arg6[%c7_185, %c0_186, %c0_187] : memref<9x32x512xbf16, #tpu.memory_space<vmem>>, vector<1x32x512xbf16>
    %255 = vector.shape_cast %254 : vector<1x32x512xbf16> to vector<32x512xbf16>
    %cst_188 = arith.constant dense<0.000000e+00> : vector<32x512xf32>
    %256 = tpu.matmul %253, %255, %cst_188 {dimension_numbers = #tpu.dot_dimension_numbers<[1], [0], [0], [1], [0, 0, 1, 1], [], []>} : vector<32x32xbf16>, vector<32x512xbf16>, vector<32x512xf32> -> vector<32x512xf32>
    %257 = arith.addf %251, %256 : vector<32x512xf32>
    %258 = vector.extract_strided_slice %210 {offsets = [2, 16, 0], sizes = [1, 32, 32], strides = [1, 1, 1]} : vector<3x48x32xbf16> to vector<1x32x32xbf16>
    %259 = vector.shape_cast %258 : vector<1x32x32xbf16> to vector<32x32xbf16>
    %c8_189 = arith.constant 8 : index
    %c0_190 = arith.constant 0 : index
    %c0_191 = arith.constant 0 : index
    %260 = vector.load %arg6[%c8_189, %c0_190, %c0_191] : memref<9x32x512xbf16, #tpu.memory_space<vmem>>, vector<1x32x512xbf16>
    %261 = vector.shape_cast %260 : vector<1x32x512xbf16> to vector<32x512xbf16>
    %cst_192 = arith.constant dense<0.000000e+00> : vector<32x512xf32>
    %262 = tpu.matmul %259, %261, %cst_192 {dimension_numbers = #tpu.dot_dimension_numbers<[1], [0], [0], [1], [0, 0, 1, 1], [], []>} : vector<32x32xbf16>, vector<32x512xbf16>, vector<32x512xf32> -> vector<32x512xf32>
    %263 = arith.addf %257, %262 : vector<32x512xf32>
    %c0_193 = arith.constant 0 : index
    %c0_194 = arith.constant 0 : index
    %264 = vector.load %arg7[%c0_193, %c0_194] : memref<1x512xf32, #tpu.memory_space<vmem>>, vector<1x512xf32>
    %265 = vector.broadcast %264 : vector<1x512xf32> to vector<32x512xf32>
    %266 = arith.addf %263, %265 : vector<32x512xf32>
    %cst_195 = arith.constant 0.000000e+00 : f32
    %267 = vector.broadcast %cst_195 : f32 to vector<32x512xf32>
    %268 = arith.maximumf %266, %267 : vector<32x512xf32>
    %269 = tpu.iota {dimensions = array<i32: 0>} : vector<32x1xi32>
    %c8_i32 = arith.constant 8 : i32
    %c0_i32 = arith.constant 0 : i32
    %270 = arith.cmpi eq, %c8_i32, %c0_i32 : i32
    %c1_i32 = arith.constant 1 : i32
    %271 = arith.select %270, %c1_i32, %c8_i32 : i32
    %272 = vector.broadcast %271 : i32 to vector<32x1xi32>
    %273 = arith.remsi %269, %272 : vector<32x1xi32>
    %c0_i32_196 = arith.constant 0 : i32
    %274 = vector.broadcast %c0_i32_196 : i32 to vector<32x1xi32>
    %275 = arith.cmpi ne, %273, %274 : vector<32x1xi32>
    %c0_i32_197 = arith.constant 0 : i32
    %276 = vector.broadcast %c0_i32_197 : i32 to vector<32x1xi32>
    %277 = arith.cmpi slt, %273, %276 : vector<32x1xi32>
    %c0_i32_198 = arith.constant 0 : i32
    %278 = arith.cmpi slt, %271, %c0_i32_198 : i32
    %279 = vector.broadcast %278 : i1 to vector<32x1xi1>
    %280 = vector.broadcast %279 : vector<32x1xi1> to vector<32x1xi1>
    %281 = arith.xori %277, %280 : vector<32x1xi1>
    %282 = arith.andi %281, %275 : vector<32x1xi1>
    %283 = vector.broadcast %271 : i32 to vector<32x1xi32>
    %284 = arith.addi %273, %283 : vector<32x1xi32>
    %285 = arith.select %282, %284, %273 : vector<32x1xi1>, vector<32x1xi32>
    %c4_i32 = arith.constant 4 : i32
    %286 = vector.broadcast %c4_i32 : i32 to vector<32x1xi32>
    %287 = arith.cmpi slt, %285, %286 : vector<32x1xi32>
    %cst_199 = arith.constant 6.250000e-02 : f32
    %cst_200 = arith.constant 0.000000e+00 : f32
    %288 = vector.broadcast %cst_199 : f32 to vector<32x1xf32>
    %289 = vector.broadcast %cst_200 : f32 to vector<32x1xf32>
    %290 = arith.select %287, %288, %289 : vector<32x1xi1>, vector<32x1xf32>
    %291 = vector.broadcast %290 : vector<32x1xf32> to vector<32x512xf32>
    %292 = arith.mulf %268, %291 : vector<32x512xf32>
    %cst_201 = arith.constant dense<0.000000e+00> : vector<512xf32>
    %293 = vector.multi_reduction <add>, %292, %cst_201 [0] : vector<32x512xf32> to vector<512xf32>
    %294 = vector.shape_cast %293 : vector<512xf32> to vector<1x512xf32>
    %295 = arith.truncf %294 : vector<1x512xf32> to vector<1x512xbf16>
    %c0_202 = arith.constant 0 : index
    %c0_203 = arith.constant 0 : index
    %296 = vector.load %arg8[%c0_202, %c0_203] : memref<512x128xbf16, #tpu.memory_space<vmem>>, vector<512x128xbf16>
    %cst_204 = arith.constant dense<0.000000e+00> : vector<1x128xf32>
    %297 = tpu.matmul %295, %296, %cst_204 {dimension_numbers = #tpu.dot_dimension_numbers<[1], [0], [0], [1], [0, 0, 1, 1], [], []>} : vector<1x512xbf16>, vector<512x128xbf16>, vector<1x128xf32> -> vector<1x128xf32>
    %c0_205 = arith.constant 0 : index
    %c0_206 = arith.constant 0 : index
    %298 = vector.load %arg9[%c0_205, %c0_206] : memref<1x128xf32, #tpu.memory_space<vmem>>, vector<1x128xf32>
    %299 = arith.addf %297, %298 : vector<1x128xf32>
    %300 = vector.shape_cast %299 : vector<1x128xf32> to vector<1x1x128xf32>
    %c0_207 = arith.constant 0 : index
    %c0_208 = arith.constant 0 : index
    %c0_209 = arith.constant 0 : index
    %301 = vector.load %arg10[%c0_207, %c0_208, %c0_209] : memref<1x1x128xf32, #tpu.memory_space<vmem>>, vector<1x1x128xf32>
    tpu.vector_store %arg10[%c0_207, %c0_208, %c0_209], %300 {strides = array<i32>} : memref<1x1x128xf32, #tpu.memory_space<vmem>>, vector<1x1x128xf32>,
    return
  }
  func.func @transform_0(%arg0: i32) -> (i32, i32, i32) {
    %c0_i32 = arith.constant 0 : i32
    %c0_i32_0 = arith.constant 0 : i32
    %c0_i32_1 = arith.constant 0 : i32
    return %arg0, %c0_i32, %c0_i32_0 : i32, i32, i32
  }
  func.func @transform_1(%arg0: i32) -> (i32, i32) {
    %c0_i32 = arith.constant 0 : i32
    %c0_i32_0 = arith.constant 0 : i32
    %c0_i32_1 = arith.constant 0 : i32
    return %c0_i32, %c0_i32_0 : i32, i32
  }
  func.func @transform_2(%arg0: i32) -> (i32, i32) {
    %c0_i32 = arith.constant 0 : i32
    %c0_i32_0 = arith.constant 0 : i32
    %c0_i32_1 = arith.constant 0 : i32
    return %c0_i32, %c0_i32_0 : i32, i32
  }
  func.func @transform_3(%arg0: i32) -> (i32, i32, i32) {
    %c0_i32 = arith.constant 0 : i32
    %c0_i32_0 = arith.constant 0 : i32
    %c0_i32_1 = arith.constant 0 : i32
    %c0_i32_2 = arith.constant 0 : i32
    return %c0_i32, %c0_i32_0, %c0_i32_1 : i32, i32, i32
  }
  func.func @transform_4(%arg0: i32) -> (i32, i32) {
    %c0_i32 = arith.constant 0 : i32
    %c0_i32_0 = arith.constant 0 : i32
    %c0_i32_1 = arith.constant 0 : i32
    return %c0_i32, %c0_i32_0 : i32, i32
  }
  func.func @transform_5(%arg0: i32) -> (i32, i32, i32) {
    %c0_i32 = arith.constant 0 : i32
    %c0_i32_0 = arith.constant 0 : i32
    %c0_i32_1 = arith.constant 0 : i32
    %c0_i32_2 = arith.constant 0 : i32
    return %c0_i32, %c0_i32_0, %c0_i32_1 : i32, i32, i32
  }
  func.func @transform_6(%arg0: i32) -> (i32, i32) {
    %c0_i32 = arith.constant 0 : i32
    %c0_i32_0 = arith.constant 0 : i32
    %c0_i32_1 = arith.constant 0 : i32
    return %c0_i32, %c0_i32_0 : i32, i32
  }
  func.func @transform_7(%arg0: i32) -> (i32, i32) {
    %c0_i32 = arith.constant 0 : i32
    %c0_i32_0 = arith.constant 0 : i32
    %c0_i32_1 = arith.constant 0 : i32
    return %c0_i32, %c0_i32_0 : i32, i32
  }
  func.func @transform_8(%arg0: i32) -> (i32, i32) {
    %c0_i32 = arith.constant 0 : i32
    %c0_i32_0 = arith.constant 0 : i32
    %c0_i32_1 = arith.constant 0 : i32
    return %c0_i32, %c0_i32_0 : i32, i32
  }
  func.func @transform_9(%arg0: i32) -> (i32, i32, i32) {
    %c0_i32 = arith.constant 0 : i32
    %c0_i32_0 = arith.constant 0 : i32
    %c0_i32_1 = arith.constant 0 : i32
    return %arg0, %c0_i32, %c0_i32_0 : i32, i32, i32
  }
}

</mosaic_0001>

<bundles_post_ra>
// kernel: vgg_forward.1
= control target key start
LH: loop header
LB: loop body
LE: loop exit
PB: predicated region body
PF: predicated region fallthrough
CT: control target
= control target key end

     0   :  { %14 = vsyncpa [#allocation7], 0  ;;  %s6990_s0 = inlined_call_operand.vmem [shape: bf16[2,256,32], index: 0, kind: input, shape index: {}]   ;;  %s6991_s1 = inlined_call_operand.vmem [shape: bf16[32,16], index: 1, kind: input, shape index: {}]   ;;  %s6992_s2 = inlined_call_operand.vmem [shape: f32[1,16], index: 2, kind: input, shape index: {}]   ;;  %s6993_s3 = inlined_call_operand.vmem [shape: bf16[9,16,32], index: 3, kind: input, shape index: {}]   ;;  %s6994_s4 = inlined_call_operand.vmem [shape: f32[1,32], index: 4, kind: input, shape index: {}]   ;;  %s6995_s5 = inlined_call_operand.vmem [shape: bf16[9,32,512], index: 5, kind: input, shape index: {}]   ;;  %s6996_s6 = inlined_call_operand.vmem [shape: f32[1,512], index: 6, kind: input, shape index: {}]   ;;  %s6997_s7 = inlined_call_operand.vmem [shape: bf16[512,128], index: 7, kind: input, shape index: {}]   ;;  %s6998_s8 = inlined_call_operand.vmem [shape: f32[1,128], index: 8, kind: input, shape index: {}]   ;;  %s6999_s9 = inlined_call_operand.hbm [shape: f32[2,1,128], index: 9, kind: output, shape index: {}]  }
   0x1   :  { %16 = vsyncpa [#allocation7 + $0x1], 0  ;;  %s5863_s30 = smov 0   ;;  %s5865_s10 = smov 0  }
   0x2   :  { %s5867_s11 = smov 0   ;;  %s5869_s12 = smov 0  }
   0x3 LB: > { %s5884_s13 = sadd.s32 4294967295, %s5808_s12   ;;  %s4622_s14 = sadd.s32 4294967294, %s5808_s12   ;;  %s5808_s12 = sphi %s5869_s12, %s7005_s12   ;;  %s5804_s11 = sphi %s5867_s11, %s7004_s11   ;;  %s5800_s10 = sphi %s5865_s10, %s7003_s10   ;;  %s5796_s30 = sphi %s5863_s30, %s7002_s30  }
   0x4   : > { %s5888_s15 = sadd.s32 1, %s5808_s12   ;;  %s223_s16 = sadd.s32 1, %s5804_s11 }
   0x5   : > { %s220_s17 = ssub.s32 %s5808_s12, %s5888_s15  ;;  %p233_p0 = scmp.ne.s32.totalorder %s5804_s11, %s5800_s10 }
   0x6   : > { %p221_p1 = scmp.eq.s32.totalorder %s220_s17, 0  ;;  %p234_p2 = scmp.eq.s32.totalorder %s5884_s13, 1 }
   0x7   : > { %p239_p3 = scmp.ne.s32.totalorder %s5800_s10, %s5796_s30  ;;  %p240_p4 = scmp.eq.s32.totalorder %s4622_s14, 1 }
   0x8   : > { %s5899_s18 = scalar_select %p221_p1, %s5804_s11, %s223_s16  }
   0x9   : > { %p5901_p5 = por %p234_p2, %p233_p0  ;;  %p5905_p6 = por %p240_p4, %p239_p3 }
   0xa   : > { %p4625_p7 = scmp.ge.s32.totalorder %s5808_s12, 1  ;;  %p290_p8 = scmp.lt.s32.totalorder %s5808_s12, 3 }
   0xc   : > { %p291_p9 = pnand %p4625_p7, %p290_p8 }
   0xd   : > { %v5579_v0 = vld [vmem:[%s6991_s1] sm:$0xff] (!%p291_p9)   ;;  %p325_p10 = scmp.lt.s32.totalorder (!%p291_p9), %s5884_s13, 1  ;;  %v5580_v1 = vld [vmem:[%s6991_s1 + $0x8] sm:$0xff] (!%p291_p9)   ;;  %vm466_vm0 = vcmask (!%p291_p9), 261120   ;;  %vm900_vm1 = vcmask (!%p291_p9), 130048   ;;  %v5810_v18 = vmov (!%p291_p9), 0.0  }
   0xe   : > { %294 = sbr.rel (%p291_p9) target bundleno = 1569 (0x621), region = 56  ;;  %5112 = vmatprep.subr.bf16.mxu0 (!%p291_p9), %v5579_v0  ;;  %5310 = vmatprep.subr.bf16.mxu1 (!%p291_p9), %v5579_v0  ;;  %934 = vst.msk [vmem:[#allocation3 + $0x10] sm:$0xff] (!%p291_p9), %vm900_vm1, %v5810_v18  ;;  %935 = vst.msk [vmem:[#allocation3 + $0x18] sm:$0xff] (!%p291_p9), %vm900_vm1, %v5810_v18  ;;  %v5597_v19 = vld [vmem:[%s6993_s3 + $0x8] sm:$0xff] (!%p291_p9)   ;;  %v6119_v23 = vld [vmem:[%s6993_s3] sm:$0xff] (!%p291_p9)   ;;  %vm738_vm2 = vcmask (!%p291_p9), 1046528  }
   0xf   : > { %5113 = vmatpush3.bf16.msra.mxu0 (!%p291_p9), %v5579_v0  ;;  %5312 = vmatpush3.bf16.msra.mxu1 (!%p291_p9), %v5579_v0  ;;  %932 = vst.msk [vmem:[#allocation3] sm:$0xff] (!%p291_p9), %vm900_vm1, %v5810_v18  ;;  %933 = vst.msk [vmem:[#allocation3 + $0x8] sm:$0xff] (!%p291_p9), %vm900_vm1, %v5810_v18  ;;  %v6125_v24 = vld [vmem:[%s6992_s2] ss:$0 sm:$0xff] (!%p291_p9)  ;;  %vm930_vm3 = vcmask (!%p291_p9), 129024   ;;  %vm2421_vm4 = vcmask (!%p291_p9), 257024  }
  0x10   : > { %5114 = vmatprep.subr.bf16.mxu0 (!%p291_p9), %v5580_v1  ;;  %5311 = vmatprep.subr.bf16.mxu1 (!%p291_p9), %v5580_v1  ;;  %936 = vst.msk [vmem:[#allocation3 + $0x20] sm:$0xff] (!%p291_p9), %vm900_vm1, %v5810_v18  ;;  %937 = vst.msk [vmem:[#allocation3 + $0x28] sm:$0xff] (!%p291_p9), %vm900_vm1, %v5810_v18  ;;  %vm2400_vm5 = vcmask (!%p291_p9), 260096   ;;  %vm2979_vm6 = vcmask (!%p291_p9), 1043456   ;;  %s323_s22 = sand.u32 (!%p291_p9), 1, %s5800_s10   ;;  %s5812_s17 = smov (!%p291_p9), [#allocation6]  }
  0x11   : > { %938 = vst.msk [vmem:[#allocation3 + $0x30] sm:$0xff] (!%p291_p9), %vm900_vm1, %v5810_v18  ;;  %939 = vst.msk [vmem:[#allocation3 + $0x38] sm:$0xff] (!%p291_p9), %vm900_vm1, %v5810_v18  ;;  %s4555_s16 = scalar_lea.sflag (!%p291_p9), [#allocation7], %s323_s22  ;;  %s5750_s21 = sshll.u32 (!%p291_p9), %s5812_s17, 4  ;;  %s5751_s21 = int_to_ptr.vmem [resolvable:$false] %s5750_s21 }
  0x12   : > { %940 = vst.msk [vmem:[#allocation3 + $0x40] sm:$0xff] (!%p291_p9), %vm900_vm1, %v5810_v18  ;;  %941 = vst.msk [vmem:[#allocation3 + $0x48] sm:$0xff] (!%p291_p9), %vm900_vm1, %v5810_v18  ;;  %s5752_s23 = scalar_lea.vmem (!%p291_p9), %s5751_s21, 32 }
  0x13   : > { %5115 = vmatpush3.bf16.msra.mxu0 (!%p291_p9), %v5580_v1  ;;  %5313 = vmatpush3.bf16.msra.mxu1 (!%p291_p9), %v5580_v1  ;;  %942 = vst.msk [vmem:[#allocation3 + $0x50] sm:$0xff] (!%p291_p9), %vm900_vm1, %v5810_v18  ;;  %943 = vst.msk [vmem:[#allocation3 + $0x58] sm:$0xff] (!%p291_p9), %vm900_vm1, %v5810_v18 }
  0x14   : > { %944 = vst.msk [vmem:[#allocation3 + $0x60] sm:$0xff] (!%p291_p9), %vm900_vm1, %v5810_v18  ;;  %945 = vst.msk [vmem:[#allocation3 + $0x68] sm:$0xff] (!%p291_p9), %vm900_vm1, %v5810_v18  ;;  %5148 = vmatprep.subr.bf16.mxu1 (!%p291_p9), %v5597_v19 }
  0x15   : > { %s326_s25 = scalar_select %p325_p10, %s5884_s13, 1  ;;  %946 = vst.msk [vmem:[#allocation3 + $0x70] sm:$0xff] %vm900_vm1, %v5810_v18  ;;  %947 = vst.msk [vmem:[#allocation3 + $0x78] sm:$0xff] %vm900_vm1, %v5810_v18 }
  0x16   : > { %948 = vst.msk [vmem:[#allocation3 + $0x80] sm:$0xff] %vm900_vm1, %v5810_v18  ;;  %949 = vst.msk [vmem:[#allocation3 + $0x88] sm:$0xff] %vm900_vm1, %v5810_v18 }
  0x17   : > { %s4968_s26 = sshll.u32 %s326_s25, 7  ;;  %950 = vst.msk [vmem:[#allocation3 + $0x90] sm:$0xff] %vm900_vm1, %v5810_v18  ;;  %951 = vst.msk [vmem:[#allocation3 + $0x98] sm:$0xff] %vm900_vm1, %v5810_v18  ;;  %s4965_s25 = sshll.u32 %s5884_s13, 4 }
  0x18   : > { %s5922_s29 = scalar_lea.vmem %s6990_s0, %s4968_s26  ;;  %952 = vst.msk [vmem:[#allocation3 + $0xa0] sm:$0xff] %vm900_vm1, %v5810_v18  ;;  %953 = vst.msk [vmem:[#allocation3 + $0xa8] sm:$0xff] %vm900_vm1, %v5810_v18  ;;  %s324_s26 = scalar_lea.vmem [#allocation6], %s323_s22 }
  0x19   : > { %v5581_v2 = vld [vmem:[%s5922_s29] sm:$0xff]   ;;  %v5582_v3 = vld [vmem:[%s5922_s29 + $0x8] sm:$0xff]   ;;  %v5583_v4 = vld [vmem:[%s5922_s29 + $0x10] sm:$0xff]   ;;  %954 = vst.msk [vmem:[#allocation3 + $0xb0] sm:$0xff] %vm900_vm1, %v5810_v18  ;;  %s4567_s27 = sshll.u32 %s324_s26, 4  ;;  %s6948_s14 = scalar_lea.hbm %s6999_s9, %s4965_s25  ;;  %s6950_s27 = int_to_ptr.vmem [resolvable:$true] %s4567_s27 }
  0x1a   : > { %5116 = vmatprep.mubr.msk.bf16.mxu0 %vm466_vm0, %v5581_v2  ;;  %v5584_v5 = vld [vmem:[%s5922_s29 + $0x18] sm:$0xff]   ;;  %v5585_v6 = vld [vmem:[%s5922_s29 + $0x20] sm:$0xff]   ;;  %v5593_v7 = vld [vmem:[%s5922_s29 + $0x70] sm:$0xff]   ;;  %955 = vst.msk [vmem:[#allocation3 + $0xb8] sm:$0xff] %vm900_vm1, %v5810_v18  ;;  %s5746_s13 = scalar_lea.vmem %s6950_s27, 16  ;;  %p5753_p0 = scmp.lt.s32.totalorder %s6950_s27, %s5751_s21 }
  0x1b   : > { %5117 = vmatmul.mubr.msk.bf16.vlgmr.msra.gmra.mrb[0].mxu0 %vm466_vm0, %v5582_v3  ;;  %v5594_v8 = vld [vmem:[%s5922_s29 + $0x78] sm:$0xff]   ;;  %v5586_v9 = vld [vmem:[%s5922_s29 + $0x28] sm:$0xff]   ;;  %5144 = vmatprep.mubr.msk.bf16.mxu1 %vm466_vm0, %v5593_v7  ;;  %v5587_v10 = vld [vmem:[%s5922_s29 + $0x30] sm:$0xff]   ;;  %956 = vst.msk [vmem:[#allocation3 + $0xc0] sm:$0xff] %vm900_vm1, %v5810_v18  ;;  %p5747_p11 = scmp.ne.s32.totalorder %s6950_s27, %s5746_s13  ;;  %p5754_p1 = scmp.lt.s32.totalorder %s5752_s23, %s5746_s13 }
  0x1c   : > { %5120 = vmatprep.mubr.msk.bf16.mxu0 %vm466_vm0, %v5583_v4  ;;  %5145 = vmatmul.mubr.msk.bf16.vlgmr.msra.gmra.mrb[0].mxu1 %vm466_vm0, %v5594_v8  ;;  %v5588_v11 = vld [vmem:[%s5922_s29 + $0x38] sm:$0xff]   ;;  %v5589_v12 = vld [vmem:[%s5922_s29 + $0x40] sm:$0xff]   ;;  %v5590_v13 = vld [vmem:[%s5922_s29 + $0x48] sm:$0xff]   ;;  %957 = vst.msk [vmem:[#allocation3 + $0xc8] sm:$0xff] %vm900_vm1, %v5810_v18 }
  0x1d   : > { %v5591_v14 = vld [vmem:[%s5922_s29 + $0x50] sm:$0xff]   ;;  %v5592_v15 = vld [vmem:[%s5922_s29 + $0x58] sm:$0xff]   ;;  %v5595_v16 = vld [vmem:[%s5922_s29 + $0x60] sm:$0xff]   ;;  %958 = vst.msk [vmem:[#allocation3 + $0xd0] sm:$0xff] %vm900_vm1, %v5810_v18  ;;  %5149 = vmatpush3.bf16.msra.mxu1 %v5597_v19  ;;  %p5748_p12 = pnand %p5747_p11, %p5901_p5  ;;  %p5755_p2 = por %p5754_p1, %p5753_p0 }
  0x1e   : > { %v5596_v17 = vld [vmem:[%s5922_s29 + $0x68] sm:$0xff]   ;;  %959 = vst.msk [vmem:[#allocation3 + $0xd8] sm:$0xff] %vm900_vm1, %v5810_v18  ;;  %960 = vst.msk [vmem:[#allocation3 + $0xe0] sm:$0xff] %vm900_vm1, %v5810_v18  ;;  %5166 = vmatprep.subr.bf16.mxu1 %v6119_v23 }
  0x1f   : > { %961 = vst.msk [vmem:[#allocation3 + $0xe8] sm:$0xff] %vm900_vm1, %v5810_v18  ;;  %962 = vst.msk [vmem:[#allocation3 + $0xf0] sm:$0xff] %vm900_vm1, %v5810_v18  ;;  %v1053_v20 = vld [vmem:[#allocation3 + $0xa0] sm:$0xff]  ;;  %v1054_v21 = vld [vmem:[#allocation3 + $0xa8] sm:$0xff]  ;;  %p5749_p13 = pneg %p5748_p12 }
  0x20   : > { %963 = vst.msk [vmem:[#allocation3 + $0xf8] sm:$0xff] %vm900_vm1, %v5810_v18  ;;  %964 = vst.msk [vmem:[#allocation3 + $0x100] sm:$0xff] %vm900_vm1, %v5810_v18  ;;  %v1103_v22 = vpack.c.bf16 %v1054_v21, %v1053_v20 }
  0x21   : > { %965 = vst.msk [vmem:[#allocation3 + $0x108] sm:$0xff] %vm900_vm1, %v5810_v18  ;;  %966 = vst.msk [vmem:[#allocation3 + $0x110] sm:$0xff] %vm900_vm1, %v5810_v18  ;;  %p5756_p3 = pnand %p5755_p2, %p5749_p13 }
  0x22   : > { %967 = vst.msk [vmem:[#allocation3 + $0x118] sm:$0xff] %vm900_vm1, %v5810_v18  ;;  %968 = vst.msk [vmem:[#allocation3 + $0x120] sm:$0xff] %vm900_vm1, %v5810_v18  ;;  %5150 = vmatprep.mubr.msk.bf16.mxu1 %vm900_vm1, %v1103_v22 }
  0x23   : > { %5121 = vmatmul.mubr.msk.bf16.gmra.mrb[4].mxu0 %vm466_vm0, %v5584_v5  ;;  %969 = vst.msk [vmem:[#allocation3 + $0x128] sm:$0xff] %vm900_vm1, %v5810_v18  ;;  %970 = vst.msk [vmem:[#allocation3 + $0x130] sm:$0xff] %vm900_vm1, %v5810_v18 }
  0x24   : > { %5124 = vmatprep.mubr.msk.bf16.mxu0 %vm466_vm0, %v5585_v6  ;;  %971 = vst.msk [vmem:[#allocation3 + $0x138] sm:$0xff] %vm900_vm1, %v5810_v18  ;;  %972 = vst.msk [vmem:[#allocation3 + $0x140] sm:$0xff] %vm900_vm1, %v5810_v18 }
  0x25   : > { %973 = vst.msk [vmem:[#allocation3 + $0x148] sm:$0xff] %vm900_vm1, %v5810_v18  ;;  %974 = vst.msk [vmem:[#allocation3 + $0x150] sm:$0xff] %vm900_vm1, %v5810_v18 }
  0x26   : > { %975 = vst.msk [vmem:[#allocation3 + $0x158] sm:$0xff] %vm900_vm1, %v5810_v18  ;;  %976 = vst.msk [vmem:[#allocation3 + $0x160] sm:$0xff] %vm900_vm1, %v5810_v18 }
  0x27   : > { %977 = vst.msk [vmem:[#allocation3 + $0x168] sm:$0xff] %vm900_vm1, %v5810_v18  ;;  %978 = vst.msk [vmem:[#allocation3 + $0x170] sm:$0xff] %vm900_vm1, %v5810_v18 }
  0x28   : > { %979 = vst.msk [vmem:[#allocation3 + $0x178] sm:$0xff] %vm900_vm1, %v5810_v18  ;;  %980 = vst.msk [vmem:[#allocation3 + $0x180] sm:$0xff] %vm900_vm1, %v5810_v18 }
  0x29   : > { %981 = vst.msk [vmem:[#allocation3 + $0x188] sm:$0xff] %vm900_vm1, %v5810_v18  ;;  %982 = vst.msk [vmem:[#allocation3 + $0x190] sm:$0xff] %vm900_vm1, %v5810_v18 }
  0x2a   : > { %983 = vst.msk [vmem:[#allocation3 + $0x198] sm:$0xff] %vm900_vm1, %v5810_v18  ;;  %984 = vst.msk [vmem:[#allocation3 + $0x1a0] sm:$0xff] %vm900_vm1, %v5810_v18 }
  0x2b   : > { %5125 = vmatmul.mubr.msk.bf16.gmra.mrb[8].mxu0 %vm466_vm0, %v5586_v9  ;;  %985 = vst.msk [vmem:[#allocation3 + $0x1a8] sm:$0xff] %vm900_vm1, %v5810_v18  ;;  %986 = vst.msk [vmem:[#allocation3 + $0x1b0] sm:$0xff] %vm900_vm1, %v5810_v18 }
  0x2c   : > { %5128 = vmatprep.mubr.msk.bf16.mxu0 %vm466_vm0, %v5587_v10  ;;  %987 = vst.msk [vmem:[#allocation3 + $0x1b8] sm:$0xff] %vm900_vm1, %v5810_v18  ;;  %988 = vst.msk [vmem:[#allocation3 + $0x1c0] sm:$0xff] %vm900_vm1, %v5810_v18 }
  0x2d   : > { %989 = vst.msk [vmem:[#allocation3 + $0x1c8] sm:$0xff] %vm900_vm1, %v5810_v18  ;;  %990 = vst.msk [vmem:[#allocation3 + $0x1d0] sm:$0xff] %vm900_vm1, %v5810_v18 }
  0x2e   : > { %991 = vst.msk [vmem:[#allocation3 + $0x1d8] sm:$0xff] %vm900_vm1, %v5810_v18 }
  0x2f   : > { %2402 = vst.msk [vmem:[#allocation5] sm:$0xff] %vm466_vm0, %v5810_v18  ;;  %2403 = vst.msk [vmem:[#allocation5 + $0x8] sm:$0xff] %vm466_vm0, %v5810_v18 }
  0x30   : > { %2404 = vst.msk [vmem:[#allocation5 + $0x10] sm:$0xff] %vm466_vm0, %v5810_v18  ;;  %2405 = vst.msk [vmem:[#allocation5 + $0x18] sm:$0xff] %vm466_vm0, %v5810_v18 }
  0x31   : > { %2406 = vst.msk [vmem:[#allocation5 + $0x20] sm:$0xff] %vm466_vm0, %v5810_v18  ;;  %2407 = vst.msk [vmem:[#allocation5 + $0x28] sm:$0xff] %vm466_vm0, %v5810_v18 }
  0x32   : > { %2408 = vst.msk [vmem:[#allocation5 + $0x30] sm:$0xff] %vm466_vm0, %v5810_v18  ;;  %2409 = vst.msk [vmem:[#allocation5 + $0x38] sm:$0xff] %vm466_vm0, %v5810_v18 }
  0x33   : > { %5129 = vmatmul.mubr.msk.bf16.gmra.mrb[12].mxu0 %vm466_vm0, %v5588_v11  ;;  %2410 = vst.msk [vmem:[#allocation5 + $0x40] sm:$0xff] %vm466_vm0, %v5810_v18  ;;  %2411 = vst.msk [vmem:[#allocation5 + $0x48] sm:$0xff] %vm466_vm0, %v5810_v18 }
  0x34   : > { %5132 = vmatprep.mubr.msk.bf16.mxu0 %vm466_vm0, %v5589_v12  ;;  %2412 = vst.msk [vmem:[#allocation5 + $0x50] sm:$0xff] %vm466_vm0, %v5810_v18  ;;  %2413 = vst.msk [vmem:[#allocation5 + $0x58] sm:$0xff] %vm466_vm0, %v5810_v18 }
  0x35   : > { %2414 = vst.msk [vmem:[#allocation5 + $0x60] sm:$0xff] %vm466_vm0, %v5810_v18  ;;  %2415 = vst.msk [vmem:[#allocation5 + $0x68] sm:$0xff] %vm466_vm0, %v5810_v18 }
  0x36   : > { %2416 = vst.msk [vmem:[#allocation5 + $0x70] sm:$0xff] %vm466_vm0, %v5810_v18  ;;  %2417 = vst.msk [vmem:[#allocation5 + $0x78] sm:$0xff] %vm466_vm0, %v5810_v18 }
  0x37   : > { %2418 = vst.msk [vmem:[#allocation5 + $0x80] sm:$0xff] %vm466_vm0, %v5810_v18  ;;  %2419 = vst.msk [vmem:[#allocation5 + $0x88] sm:$0xff] %vm466_vm0, %v5810_v18 }
  0x3b   : > { %5133 = vmatmul.mubr.msk.bf16.gmra.mrb[16].mxu0 %vm466_vm0, %v5590_v13 }
  0x3c   : > { %5136 = vmatprep.mubr.msk.bf16.mxu0 %vm466_vm0, %v5591_v14 }
  0x43   : > { %5137 = vmatmul.mubr.msk.bf16.gmra.mrb[20].mxu0 %vm466_vm0, %v5592_v15 }
  0x44   : > { %5140 = vmatprep.mubr.msk.bf16.mxu0 %vm466_vm0, %v5595_v16 }
  0x4b   : > { %5141 = vmatmul.mubr.msk.bf16.gmra.mrb[24].mxu0 %vm466_vm0, %v5596_v17 }
  0xee   : > { %v5118_v25 = vpop.f32.mrb[0].mxu0 }
  0xef   : > { %v558_v26 = vadd.f32 %v5118_v25, %v6125_v24  ;;  %v549_v27 = vpop.f32.mrb[1].mxu0  ;;  %v5146_v55 = vpop.f32.mrb[0].mxu1 }
  0xf0   : > { %v550_v28 = vadd.f32 %v6125_v24, %v549_v27  ;;  %v5119_v29 = vpop.f32.mrb[2].mxu0  ;;  %v670_v58 = vadd.f32 %v5146_v55, %v6125_v24  ;;  %v661_v59 = vpop.f32.mrb[1].mxu1 }
  0xf1   : > { %v678_v30 = vmax.f32 %v558_v26, 0.0  ;;  %v561_v31 = vadd.f32 %v5119_v29, %v6125_v24  ;;  %v552_v32 = vpop.f32.mrb[3].mxu0  ;;  %v6140_v62 = vadd.f32 %v6125_v24, %v661_v59  ;;  %v5147_v63 = vpop.f32.mrb[2].mxu1 }
  0xf2   : > { %v676_v33 = vmax.f32 %v550_v28, 0.0  ;;  %v553_v34 = vadd.f32 %v6125_v24, %v552_v32  ;;  %v706_v2 = vmax.f32 %v670_v58, 0.0  ;;  %v673_v3 = vadd.f32 %v5147_v63, %v6125_v24  ;;  %v664_v4 = vpop.f32.mrb[3].mxu1 }
  0xf3   : > { %v679_v35 = vmax.f32 %v561_v31, 0.0  ;;  %v742_v37 = vrot.slane %v678_v30, 1  ;;  %v704_v7 = vmax.f32 %v6140_v62, 0.0  ;;  %v6147_v12 = vadd.f32 %v6125_v24, %v664_v4 }
  0xf4   : > { %v677_v36 = vmax.f32 %v553_v34, 0.0  ;;  %v739_v39 = vrot.slane %v676_v33, 1  ;;  %v707_v11 = vmax.f32 %v673_v3, 0.0  ;;  %v860_v17 = vrot.slane %v706_v2, 1 }
  0xf5   : > { %v744_v38 = vrot.slane %v679_v35, 1 }
  0xf6   : > { %v740_v40 = vrot.slane %v677_v36, 1  ;;  %v5122_v41 = vpop.f32.mrb[4].mxu0  ;;  %v862_v34 = vrot.slane %v707_v11, 1 }
  0xf7   : > { %v745_v42 = vsel %vm738_vm2, %v742_v37, %v744_v38  ;;  %v574_v43 = vadd.f32 %v5122_v41, %v6125_v24  ;;  %v565_v44 = vpop.f32.mrb[5].mxu0 }
  0xf8   : > { %v830_v45 = vmax.f32 %v678_v30, %v745_v42  ;;  %v741_v46 = vsel %vm738_vm2, %v739_v39, %v740_v40  ;;  %v743_v47 = vsel %vm738_vm2, %v740_v40, %v742_v37  ;;  %v566_v48 = vadd.f32 %v6125_v24, %v565_v44  ;;  %v5123_v49 = vpop.f32.mrb[6].mxu0 }
  0xf9   : > { %v828_v50 = vmax.f32 %v676_v33, %v741_v46  ;;  %v829_v51 = vmax.f32 %v677_v36, %v743_v47  ;;  %v682_v52 = vmax.f32 %v574_v43, 0.0  ;;  %v577_v53 = vadd.f32 %v5123_v49, %v6125_v24  ;;  %v568_v54 = vpop.f32.mrb[7].mxu0 }
  0xfa   : > { %v680_v56 = vmax.f32 %v566_v48, 0.0  ;;  %v569_v57 = vadd.f32 %v6125_v24, %v568_v54  ;;  %v863_v39 = vsel %vm738_vm2, %v860_v17, %v862_v34  ;;  %v6161_v40 = vrot.slane %v704_v7, 1 }
  0xfb   : > { %v870_v60 = vmax.f32 %v828_v50, %v830_v45  ;;  %v683_v61 = vmax.f32 %v577_v53, 0.0  ;;  %v750_v5 = vrot.slane %v682_v52, 1  ;;  %v868_v41 = vmax.f32 %v706_v2, %v863_v39 }
  0xfc   : > { %v746_v0 = vrot.slane %v680_v56, 1  ;;  %v681_v1 = vmax.f32 %v569_v57, 0.0  ;;  %v705_v42 = vmax.f32 %v6147_v12, 0.0 }
  0xfd   : > { %901 = vst.msk [vmem:[#allocation2] sm:$0xff] %vm900_vm1, %v870_v60  ;;  %v752_v6 = vrot.slane %v683_v61, 1 }
  0xfe   : > { %v747_v8 = vsel %vm738_vm2, %v744_v38, %v746_v0  ;;  %v748_v9 = vrot.slane %v681_v1, 1  ;;  %v5126_v10 = vpop.f32.mrb[8].mxu0 }
  0xff   : > { %v753_v13 = vsel %vm738_vm2, %v750_v5, %v752_v6  ;;  %v831_v14 = vmax.f32 %v679_v35, %v747_v8  ;;  %v590_v15 = vadd.f32 %v5126_v10, %v6125_v24  ;;  %v581_v16 = vpop.f32.mrb[9].mxu0 }
 0x100   : > { %v834_v19 = vmax.f32 %v682_v52, %v753_v13  ;;  %v749_v20 = vsel %vm738_vm2, %v746_v0, %v748_v9  ;;  %v751_v21 = vsel %vm738_vm2, %v748_v9, %v750_v5  ;;  %v582_v22 = vadd.f32 %v6125_v24, %v581_v16  ;;  %v5127_v25 = vpop.f32.mrb[10].mxu0 }
 0x101   : > { %v832_v26 = vmax.f32 %v680_v56, %v749_v20  ;;  %v833_v27 = vmax.f32 %v681_v1, %v751_v21  ;;  %v871_v28 = vmax.f32 %v829_v51, %v831_v14  ;;  %v686_v29 = vmax.f32 %v590_v15, 0.0  ;;  %v584_v30 = vpop.f32.mrb[11].mxu0 }
 0x102   : > { %v684_v31 = vmax.f32 %v582_v22, 0.0  ;;  %v593_v32 = vadd.f32 %v5127_v25, %v6125_v24  ;;  %v585_v33 = vadd.f32 %v6125_v24, %v584_v30  ;;  %v869_v51 = vmax.f32 %v707_v11, %v862_v34 }
 0x103   : > { %v874_v35 = vmax.f32 %v832_v26, %v834_v19  ;;  %902 = vst.msk [vmem:[#allocation2 + $0x8] sm:$0xff] %vm900_vm1, %v871_v28  ;;  %v758_v43 = vrot.slane %v686_v29, 1  ;;  %v796_v52 = vrot.slane %v705_v42, 1 }
 0x104   : > { %v754_v36 = vrot.slane %v684_v31, 1  ;;  %v687_v37 = vmax.f32 %v593_v32, 0.0  ;;  %v685_v38 = vmax.f32 %v585_v33, 0.0 }
 0x105   : > { %905 = vst.msk [vmem:[#allocation2 + $0x20] sm:$0xff] %vm900_vm1, %v874_v35  ;;  %v857_v13 = vmax.f32 %v705_v42, %v796_v52 }
 0x106   : > { %v755_v44 = vsel %vm738_vm2, %v752_v6, %v754_v36  ;;  %v760_v45 = vrot.slane %v687_v37, 1  ;;  %v756_v46 = vrot.slane %v685_v38, 1  ;;  %v5130_v47 = vpop.f32.mrb[12].mxu0  ;;  %v797_v6 = vsel %vm738_vm2, %v6161_v40, %v796_v52 }
 0x107   : > { %v835_v48 = vmax.f32 %v683_v61, %v755_v44  ;;  %v606_v49 = vadd.f32 %v5130_v47, %v6125_v24  ;;  %v597_v50 = vpop.f32.mrb[13].mxu0  ;;  %v856_v12 = vmax.f32 %v704_v7, %v797_v6  ;;  %v899_v25 = vmax.f32 %v857_v13, %v869_v51  ;;  %v6205_v44 = vld [vmem:[%s6993_s3 + $0x10] sm:$0xff]  }
 0x108   : > { %v761_v53 = vsel %vm738_vm2, %v758_v43, %v760_v45  ;;  %v757_v54 = vsel %vm738_vm2, %v754_v36, %v756_v46  ;;  %v759_v55 = vsel %vm738_vm2, %v756_v46, %v758_v43  ;;  %v598_v56 = vadd.f32 %v6125_v24, %v597_v50  ;;  %v5131_v57 = vpop.f32.mrb[14].mxu0 }
 0x109   : > { %v838_v58 = vmax.f32 %v686_v29, %v761_v53  ;;  %v836_v59 = vmax.f32 %v684_v31, %v757_v54  ;;  %v837_v60 = vmax.f32 %v685_v38, %v759_v55  ;;  %v875_v63 = vmax.f32 %v833_v27, %v835_v48  ;;  %v600_v0 = vpop.f32.mrb[15].mxu0  ;;  %v1056_v29 = vld [vmem:[#allocation3 + $0xb8] sm:$0xff]  ;;  %931 = vst.msk [vmem:[#allocation2 + $0xe8] sm:$0x7f] %vm930_vm3, %v899_v25 }
 0x10a   : > { %v992_v61 = vld [vmem:[#allocation2] ss:$2 sm:$0xff]  ;;  %v690_v1 = vmax.f32 %v606_v49, 0.0  ;;  %v688_v2 = vmax.f32 %v598_v56, 0.0  ;;  %v6171_v3 = vadd.f32 %v5131_v57, %v6125_v24  ;;  %v601_v4 = vadd.f32 %v6125_v24, %v600_v0  ;;  %v1058_v0 = vld [vmem:[#allocation3 + $0xc8] sm:$0xff] }
 0x10b   : > { %993 = vst.msk [vmem:[#allocation3 + $0x11] sm:$0xff] %vm900_vm1, %v992_v61  ;;  %995 = vst.msk [vmem:[#allocation3 + $0xb0] sm:$0xff] %vm900_vm1, %v992_v61  ;;  %v878_v5 = vmax.f32 %v836_v59, %v838_v58  ;;  %v898_v22 = vmax.f32 %v856_v12, %v868_v41 }
 0x10c   : > { %997 = vst.msk [vmem:[#allocation3 + $0x14f] sm:$0xff] %vm900_vm1, %v992_v61  ;;  %906 = vst.msk [vmem:[#allocation2 + $0x28] sm:$0xff] %vm900_vm1, %v875_v63  ;;  %v762_v8 = vrot.slane %v688_v2, 1  ;;  %v691_v9 = vmax.f32 %v6171_v3, 0.0  ;;  %v689_v10 = vmax.f32 %v601_v4, 0.0  ;;  %v766_v11 = vrot.slane %v690_v1, 1 }
 0x10d   : > { %909 = vst.msk [vmem:[#allocation2 + $0x40] sm:$0xff] %vm900_vm1, %v878_v5  ;;  %929 = vst.msk [vmem:[#allocation2 + $0xe0] sm:$0xff] %vm900_vm1, %v898_v22 }
 0x10e   : > { %v763_v14 = vsel %vm738_vm2, %v760_v45, %v762_v8  ;;  %v768_v15 = vrot.slane %v691_v9, 1  ;;  %v764_v16 = vrot.slane %v689_v10, 1  ;;  %v5134_v17 = vpop.f32.mrb[16].mxu0 }
 0x10f   : > { %v839_v19 = vmax.f32 %v687_v37, %v763_v14  ;;  %v622_v20 = vadd.f32 %v5134_v17, %v6125_v24  ;;  %v613_v21 = vpop.f32.mrb[17].mxu0 }
 0x110   : > { %v769_v26 = vsel %vm738_vm2, %v766_v11, %v768_v15  ;;  %v765_v27 = vsel %vm738_vm2, %v762_v8, %v764_v16  ;;  %v767_v28 = vsel %vm738_vm2, %v764_v16, %v766_v11  ;;  %v614_v62 = vadd.f32 %v6125_v24, %v613_v21  ;;  %v5135_v7 = vpop.f32.mrb[18].mxu0 }
 0x111   : > { %v842_v30 = vmax.f32 %v690_v1, %v769_v26  ;;  %v840_v31 = vmax.f32 %v688_v2, %v765_v27  ;;  %v841_v32 = vmax.f32 %v689_v10, %v767_v28  ;;  %v879_v33 = vmax.f32 %v837_v60, %v839_v19  ;;  %v616_v34 = vpop.f32.mrb[19].mxu0 }
 0x112   : > { %v694_v35 = vmax.f32 %v622_v20, 0.0  ;;  %v692_v36 = vmax.f32 %v614_v62, 0.0  ;;  %v6193_v37 = vadd.f32 %v5135_v7, %v6125_v24  ;;  %v617_v38 = vadd.f32 %v6125_v24, %v616_v34  ;;  %v1055_v39 = vld [vmem:[#allocation3 + $0xb0] sm:$0xff] }
 0x113   : > { %v999_v41 = vld [vmem:[#allocation2 + $0x20] ss:$2 sm:$0xff]  ;;  %v882_v42 = vmax.f32 %v840_v31, %v842_v30  ;;  %910 = vst.msk [vmem:[#allocation2 + $0x48] sm:$0xff] %vm900_vm1, %v879_v33  ;;  %v6197_v43 = vpack.c.bf16 %v1056_v29, %v1055_v39 }
 0x114   : > { %1001 = vst.msk [vmem:[#allocation3 + $0xc0] sm:$0xff] %vm900_vm1, %v999_v41  ;;  %1002 = vst.msk [vmem:[#allocation3 + $0x15f] sm:$0xff] %vm900_vm1, %v999_v41  ;;  %v770_v45 = vrot.slane %v692_v36, 1  ;;  %v695_v46 = vmax.f32 %v6193_v37, 0.0  ;;  %v693_v47 = vmax.f32 %v617_v38, 0.0  ;;  %v774_v48 = vrot.slane %v694_v35, 1 }
 0x115   : > { %1000 = vst.msk [vmem:[#allocation3 + $0x21] sm:$0xff] %vm900_vm1, %v999_v41  ;;  %913 = vst.msk [vmem:[#allocation2 + $0x60] sm:$0xff] %vm900_vm1, %v882_v42  ;;  %5151 = vmatmul.mubr.msk.bf16.vlgmr.msra.gmra.mrb[4].mxu1 %vm900_vm1, %v6197_v43  ;;  %v1029_v63 = vld [vmem:[#allocation2 + $0xe0] ss:$2 sm:$0xff] }
 0x116   : > { %v771_v49 = vsel %vm738_vm2, %v768_v15, %v770_v45  ;;  %v776_v50 = vrot.slane %v695_v46, 1  ;;  %v772_v51 = vrot.slane %v693_v47, 1  ;;  %v5138_v52 = vpop.f32.mrb[20].mxu0  ;;  %5167 = vmatpush3.bf16.msra.mxu1 %v6119_v23  ;;  %1030 = vst.msk [vmem:[#allocation3 + $0x81] sm:$0xff] %vm900_vm1, %v1029_v63  ;;  %1031 = vst.msk [vmem:[#allocation3 + $0x120] sm:$0xff] %vm900_vm1, %v1029_v63  ;;  %v1060_v30 = vld [vmem:[#allocation3 + $0xd8] sm:$0xff] }
 0x117   : > { %v843_v53 = vmax.f32 %v691_v9, %v771_v49  ;;  %v638_v54 = vadd.f32 %v5138_v52, %v6125_v24  ;;  %v629_v55 = vpop.f32.mrb[21].mxu0  ;;  %5184 = vmatprep.subr.bf16.mxu1 %v6205_v44  ;;  %1032 = vst.msk [vmem:[#allocation3 + $0x1bf] sm:$0xff] %vm900_vm1, %v1029_v63 }
 0x118   : > { %v777_v56 = vsel %vm738_vm2, %v774_v48, %v776_v50  ;;  %v773_v57 = vsel %vm738_vm2, %v770_v45, %v772_v51  ;;  %v775_v58 = vsel %vm738_vm2, %v772_v51, %v774_v48  ;;  %v630_v59 = vadd.f32 %v6125_v24, %v629_v55  ;;  %v5139_v60 = vpop.f32.mrb[22].mxu0 }
 0x119   : > { %v846_v61 = vmax.f32 %v694_v35, %v777_v56  ;;  %v844_v1 = vmax.f32 %v692_v36, %v773_v57  ;;  %v845_v23 = vmax.f32 %v693_v47, %v775_v58  ;;  %v883_v2 = vmax.f32 %v841_v32, %v843_v53  ;;  %v632_v3 = vpop.f32.mrb[23].mxu0 }
 0x11a   : > { %v698_v4 = vmax.f32 %v638_v54, 0.0  ;;  %v696_v5 = vmax.f32 %v630_v59, 0.0  ;;  %v641_v6 = vadd.f32 %v5139_v60, %v6125_v24  ;;  %v633_v8 = vadd.f32 %v6125_v24, %v632_v3  ;;  %v1004_v10 = vld [vmem:[#allocation2 + $0x40] ss:$2 sm:$0xff] }
 0x11b   : > { %v1057_v9 = vld [vmem:[#allocation3 + $0xc0] sm:$0xff]  ;;  %v886_v11 = vmax.f32 %v844_v1, %v846_v61  ;;  %914 = vst.msk [vmem:[#allocation2 + $0x68] sm:$0xff] %vm900_vm1, %v883_v2  ;;  %1006 = vst.msk [vmem:[#allocation3 + $0xd0] sm:$0xff] %vm900_vm1, %v1004_v10 }
 0x11c   : > { %v6225_v12 = vpack.c.bf16 %v1058_v0, %v1057_v9  ;;  %1005 = vst.msk [vmem:[#allocation3 + $0x31] sm:$0xff] %vm900_vm1, %v1004_v10  ;;  %1007 = vst.msk [vmem:[#allocation3 + $0x16f] sm:$0xff] %vm900_vm1, %v1004_v10  ;;  %v778_v13 = vrot.slane %v696_v5, 1  ;;  %v699_v14 = vmax.f32 %v641_v6, 0.0  ;;  %v697_v15 = vmax.f32 %v633_v8, 0.0  ;;  %v1062_v0 = vld [vmem:[#allocation3 + $0xe8] sm:$0xff] }
 0x11d   : > { %917 = vst.msk [vmem:[#allocation2 + $0x80] sm:$0xff] %vm900_vm1, %v886_v11  ;;  %v782_v16 = vrot.slane %v698_v4, 1  ;;  %v1066_v10 = vld [vmem:[#allocation3 + $0x108] sm:$0xff]  ;;  %v1033_v11 = vld [vmem:[#allocation3] sm:$0xff] }
 0x11e   : > { %5154 = vmatprep.mubr.msk.bf16.mxu1 %vm900_vm1, %v6225_v12  ;;  %v779_v17 = vsel %vm738_vm2, %v776_v50, %v778_v13  ;;  %v784_v19 = vrot.slane %v699_v14, 1  ;;  %v780_v20 = vrot.slane %v697_v15, 1  ;;  %v5142_v21 = vpop.f32.mrb[24].mxu0 }
 0x11f   : > { %v847_v22 = vmax.f32 %v695_v46, %v779_v17  ;;  %v654_v25 = vadd.f32 %v5142_v21, %v6125_v24  ;;  %v645_v26 = vpop.f32.mrb[25].mxu0  ;;  %v1035_v21 = vld [vmem:[#allocation3 + $0x10] sm:$0xff] }
 0x120   : > { %v785_v27 = vsel %vm738_vm2, %v782_v16, %v784_v19  ;;  %v781_v28 = vsel %vm738_vm2, %v778_v13, %v780_v20  ;;  %v783_v62 = vsel %vm738_vm2, %v780_v20, %v782_v16  ;;  %v646_v7 = vadd.f32 %v6125_v24, %v645_v26  ;;  %v5143_v29 = vpop.f32.mrb[26].mxu0  ;;  %v1034_v13 = vld [vmem:[#allocation3 + $0x8] sm:$0xff] }
 0x121   : > { %v850_v31 = vmax.f32 %v698_v4, %v785_v27  ;;  %v848_v32 = vmax.f32 %v696_v5, %v781_v28  ;;  %v849_v33 = vmax.f32 %v697_v15, %v783_v62  ;;  %v887_v34 = vmax.f32 %v845_v23, %v847_v22  ;;  %v648_v35 = vpop.f32.mrb[27].mxu0  ;;  %v1064_v4 = vld [vmem:[#allocation3 + $0xf8] sm:$0xff]  ;;  %v1038_v26 = vld [vmem:[#allocation3 + $0x28] sm:$0xff] }
 0x122   : > { %v702_v36 = vmax.f32 %v654_v25, 0.0  ;;  %v700_v37 = vmax.f32 %v646_v7, 0.0  ;;  %v657_v38 = vadd.f32 %v5143_v29, %v6125_v24  ;;  %v649_v39 = vadd.f32 %v6125_v24, %v648_v35  ;;  %v1059_v41 = vld [vmem:[#allocation3 + $0xd0] sm:$0xff]  ;;  %v1068_v15 = vld [vmem:[#allocation3 + $0x118] sm:$0xff]  ;;  %v1037_v25 = vld [vmem:[#allocation3 + $0x20] sm:$0xff] }
 0x123   : > { %v1009_v42 = vld [vmem:[#allocation2 + $0x60] ss:$2 sm:$0xff]  ;;  %v890_v45 = vmax.f32 %v848_v32, %v850_v31  ;;  %918 = vst.msk [vmem:[#allocation2 + $0x88] sm:$0xff] %vm900_vm1, %v887_v34  ;;  %v6242_v46 = vpack.c.bf16 %v1060_v30, %v1059_v41  ;;  %v5600_v28 = vld [vmem:[%s6993_s3 + $0x18] sm:$0xff]   ;;  %v6288_v62 = vpack.c.bf16 %v1038_v26, %v1037_v25 }
 0x124   : > { %1011 = vst.msk [vmem:[#allocation3 + $0xe0] sm:$0xff] %vm900_vm1, %v1009_v42  ;;  %1010 = vst.msk [vmem:[#allocation3 + $0x41] sm:$0xff] %vm900_vm1, %v1009_v42  ;;  %v786_v47 = vrot.slane %v700_v37, 1  ;;  %v703_v48 = vmax.f32 %v657_v38, 0.0  ;;  %v701_v49 = vmax.f32 %v649_v39, 0.0  ;;  %v790_v24 = vrot.slane %v702_v36, 1 }
 0x125   : > { %1012 = vst.msk [vmem:[#allocation3 + $0x17f] sm:$0xff] %vm900_vm1, %v1009_v42  ;;  %921 = vst.msk [vmem:[#allocation2 + $0xa0] sm:$0xff] %vm900_vm1, %v890_v45  ;;  %5155 = vmatmul.mubr.msk.bf16.gmra.mrb[8].mxu1 %vm900_vm1, %v6242_v46  ;;  %v1036_v22 = vld [vmem:[#allocation3 + $0x18] sm:$0xff]  ;;  %v1039_v7 = vld [vmem:[#allocation3 + $0x30] sm:$0xff] }
 0x126   : > { %v787_v50 = vsel %vm738_vm2, %v784_v19, %v786_v47  ;;  %v792_v51 = vrot.slane %v703_v48, 1  ;;  %v788_v52 = vrot.slane %v701_v49, 1  ;;  %v1093_v19 = vpack.c.bf16 %v1034_v13, %v1033_v11  ;;  %v1040_v29 = vld [vmem:[#allocation3 + $0x38] sm:$0xff]  ;;  %v1073_v42 = vld [vmem:[#allocation3 + $0x140] sm:$0xff]  ;;  %v1074_v45 = vld [vmem:[#allocation3 + $0x148] sm:$0xff] }
 0x127   : > { %v851_v53 = vmax.f32 %v699_v14, %v787_v50  ;;  %v1094_v27 = vpack.c.bf16 %v1036_v22, %v1035_v21  ;;  %v6294_v32 = vpack.c.bf16 %v1040_v29, %v1039_v7  ;;  %v1075_v50 = vld [vmem:[#allocation3 + $0x150] sm:$0xff]  ;;  %v5603_v13 = vld [vmem:[%s6993_s3 + $0x30] sm:$0xff]   ;;  %v1090_v21 = vld [vmem:[#allocation3 + $0x1c8] sm:$0xff] }
 0x128   : > { %v793_v54 = vsel %vm738_vm2, %v790_v24, %v792_v51  ;;  %v795_v55 = vsel %vm738_vm2, %v792_v51, %v6161_v40  ;;  %v789_v56 = vsel %vm738_vm2, %v786_v47, %v788_v52  ;;  %v791_v57 = vsel %vm738_vm2, %v788_v52, %v790_v24  ;;  %v1078_v24 = vld [vmem:[#allocation3 + $0x168] sm:$0xff]  ;;  %v1077_v52 = vld [vmem:[#allocation3 + $0x160] sm:$0xff]  ;;  %v5605_v25 = vld [vmem:[%s6993_s3 + $0x40] sm:$0xff]  }
 0x129   : > { %v854_v58 = vmax.f32 %v702_v36, %v793_v54  ;;  %v855_v59 = vmax.f32 %v703_v48, %v795_v55  ;;  %v852_v60 = vmax.f32 %v700_v37, %v789_v56  ;;  %v853_v63 = vmax.f32 %v701_v49, %v791_v57  ;;  %v1076_v49 = vld [vmem:[#allocation3 + $0x158] sm:$0xff]  ;;  %v1079_v57 = vld [vmem:[#allocation3 + $0x170] sm:$0xff] }
 0x12a   : > { %v891_v61 = vmax.f32 %v849_v33, %v851_v53  ;;  %v1014_v23 = vld [vmem:[#allocation2 + $0x80] ss:$2 sm:$0xff]  ;;  %v1113_v48 = vpack.c.bf16 %v1074_v45, %v1073_v42  ;;  %v1114_v51 = vpack.c.bf16 %v1076_v49, %v1075_v50  ;;  %v6318_v54 = vpack.c.bf16 %v1078_v24, %v1077_v52 }
 0x12b   : > { %v1061_v1 = vld [vmem:[#allocation3 + $0xe0] sm:$0xff]  ;;  %1016 = vst.msk [vmem:[#allocation3 + $0xf0] sm:$0xff] %vm900_vm1, %v1014_v23  ;;  %1015 = vst.msk [vmem:[#allocation3 + $0x51] sm:$0xff] %vm900_vm1, %v1014_v23  ;;  %v894_v2 = vmax.f32 %v852_v60, %v854_v58  ;;  %v895_v40 = vmax.f32 %v853_v63, %v855_v59  ;;  %v1042_v31 = vld [vmem:[#allocation3 + $0x48] sm:$0xff] }
 0x12c   : > { %1017 = vst.msk [vmem:[#allocation3 + $0x18f] sm:$0xff] %vm900_vm1, %v1014_v23  ;;  %922 = vst.msk [vmem:[#allocation2 + $0xa8] sm:$0xff] %vm900_vm1, %v891_v61  ;;  %v6260_v3 = vpack.c.bf16 %v1062_v0, %v1061_v1  ;;  %v1041_v30 = vld [vmem:[#allocation3 + $0x40] sm:$0xff]  ;;  %v5601_v53 = vld [vmem:[%s6993_s3 + $0x20] sm:$0xff]  }
 0x12d   : > { %925 = vst.msk [vmem:[#allocation2 + $0xc0] sm:$0xff] %vm900_vm1, %v894_v2  ;;  %926 = vst.msk [vmem:[#allocation2 + $0xc8] sm:$0xff] %vm900_vm1, %v895_v40  ;;  %v6296_v33 = vpack.c.bf16 %v1042_v31, %v1041_v30  ;;  %v1080_v55 = vld [vmem:[#allocation3 + $0x178] sm:$0xff]  ;;  %v1081_v59 = vld [vmem:[#allocation3 + $0x180] sm:$0xff] }
 0x12e   : > { %5158 = vmatprep.mubr.msk.bf16.mxu1 %vm900_vm1, %v6260_v3  ;;  %v6323_v58 = vpack.c.bf16 %v1080_v55, %v1079_v57  ;;  %v1051_v26 = vld [vmem:[#allocation3 + $0x90] sm:$0xff] }
 0x12f   : > { %v5606_v45 = vld [vmem:[%s6995_s5 + $0x40] ss:$16 sps:$4 sm:$0xff]  }
 0x132   : > { %v1063_v5 = vld [vmem:[#allocation3 + $0xf0] sm:$0xff] }
 0x133   : > { %v6266_v6 = vpack.c.bf16 %v1064_v4, %v1063_v5  ;;  %v1019_v8 = vld [vmem:[#allocation2 + $0xa0] ss:$2 sm:$0xff]  ;;  %v1082_v56 = vld [vmem:[#allocation3 + $0x188] sm:$0xff] }
 0x134   : > { %1021 = vst.msk [vmem:[#allocation3 + $0x100] sm:$0xff] %vm900_vm1, %v1019_v8  ;;  %1020 = vst.msk [vmem:[#allocation3 + $0x61] sm:$0xff] %vm900_vm1, %v1019_v8  ;;  %v1024_v9 = vld [vmem:[#allocation2 + $0xc0] ss:$2 sm:$0xff]  ;;  %v6325_v60 = vpack.c.bf16 %v1082_v56, %v1081_v59 }
 0x135   : > { %1022 = vst.msk [vmem:[#allocation3 + $0x19f] sm:$0xff] %vm900_vm1, %v1019_v8  ;;  %5159 = vmatmul.mubr.msk.bf16.gmra.mrb[12].mxu1 %vm900_vm1, %v6266_v6  ;;  %1025 = vst.msk [vmem:[#allocation3 + $0x71] sm:$0xff] %vm900_vm1, %v1024_v9  ;;  %v1043_v34 = vld [vmem:[#allocation3 + $0x50] sm:$0xff]  ;;  %v1088_v4 = vld [vmem:[#allocation3 + $0x1b8] sm:$0xff] }
 0x136   : > { %1026 = vst.msk [vmem:[#allocation3 + $0x110] sm:$0xff] %vm900_vm1, %v1024_v9  ;;  %1027 = vst.msk [vmem:[#allocation3 + $0x1af] sm:$0xff] %vm900_vm1, %v1024_v9  ;;  %v1083_v61 = vld [vmem:[#allocation3 + $0x190] sm:$0xff]  ;;  %v5602_v8 = vld [vmem:[%s6993_s3 + $0x28] sm:$0xff]  }
 0x137   : > { %v1049_v9 = vld [vmem:[#allocation3 + $0x80] sm:$0xff] }
 0x138   : > { %v5611_v59 = vld [vmem:[%s6995_s5 + $0x64] ss:$16 sps:$4 sm:$0xff]  }
 0x13b   : > { %v1065_v14 = vld [vmem:[#allocation3 + $0x100] sm:$0xff]  ;;  %v1046_v36 = vld [vmem:[#allocation3 + $0x68] sm:$0xff] }
 0x13c   : > { %v6276_v16 = vpack.c.bf16 %v1066_v10, %v1065_v14  ;;  %v1045_v35 = vld [vmem:[#allocation3 + $0x60] sm:$0xff]  ;;  %v1047_v39 = vld [vmem:[#allocation3 + $0x70] sm:$0xff]  ;;  %v1048_v41 = vld [vmem:[#allocation3 + $0x78] sm:$0xff] }
 0x13d   : > { %v1067_v17 = vld [vmem:[#allocation3 + $0x110] sm:$0xff]  ;;  %v6304_v38 = vpack.c.bf16 %v1046_v36, %v1045_v35  ;;  %v6310_v47 = vpack.c.bf16 %v1048_v41, %v1047_v39  ;;  %v1084_v63 = vld [vmem:[#allocation3 + $0x198] sm:$0xff]  ;;  %v1086_v0 = vld [vmem:[#allocation3 + $0x1a8] sm:$0xff] }
 0x13e   : > { %5162 = vmatprep.mubr.msk.bf16.mxu1 %vm900_vm1, %v6276_v16  ;;  %v6280_v20 = vpack.c.bf16 %v1068_v15, %v1067_v17  ;;  %v6331_v1 = vpack.c.bf16 %v1084_v63, %v1083_v61  ;;  %v1085_v23 = vld [vmem:[#allocation3 + $0x1a0] sm:$0xff]  ;;  %v1087_v40 = vld [vmem:[#allocation3 + $0x1b0] sm:$0xff]  ;;  %v1050_v10 = vld [vmem:[#allocation3 + $0x88] sm:$0xff]  ;;  %v5811_v63 = vmov 0  }
 0x13f   : > { %v6333_v2 = vpack.c.bf16 %v1086_v0, %v1085_v23  ;;  %v6339_v5 = vpack.c.bf16 %v1088_v4, %v1087_v40  ;;  %v1101_v11 = vpack.c.bf16 %v1050_v10, %v1049_v9  ;;  %v1070_v14 = vld [vmem:[#allocation3 + $0x128] sm:$0xff]  ;;  %2564 = vmatprep.mubr.bf16.mxu0 %v5811_v63 }
 0x140   : > { %5163 = vmatmul.mubr.msk.bf16.gmra.mrb[16].mxu1 %vm900_vm1, %v6280_v20  ;;  %v5604_v17 = vld [vmem:[%s6993_s3 + $0x38] sm:$0xff]  }
 0x141   : > { %5168 = vmatprep.mubr.msk.bf16.mxu1 %vm900_vm1, %v1093_v19  ;;  %v1089_v19 = vld [vmem:[#allocation3 + $0x1c0] sm:$0xff]  ;;  %v5614_v0 = vld [vmem:[%s6995_s5 + $0x4c] ss:$16 sps:$4 sm:$0xff]  }
 0x142   : > { %v1121_v22 = vpack.c.bf16 %v1090_v21, %v1089_v19 }
 0x148   : > { %5169 = vmatmul.mubr.msk.bf16.vlgmr.msra.gmra.mrb[4].mxu1 %vm900_vm1, %v1094_v27 }
 0x149   : > { %5185 = vmatpush3.bf16.msra.mxu1 %v6205_v44  ;;  %5172 = vmatprep.mubr.msk.bf16.mxu1 %vm900_vm1, %v6288_v62  ;;  %v1044_v44 = vld [vmem:[#allocation3 + $0x58] sm:$0xff] }
 0x14a   : > { %5202 = vmatprep.subr.bf16.mxu1 %v5600_v28  ;;  %v6302_v37 = vpack.c.bf16 %v1044_v44, %v1043_v34  ;;  %v1091_v34 = vld [vmem:[#allocation3 + $0x1d0] sm:$0xff]  ;;  %v1092_v44 = vld [vmem:[#allocation3 + $0x1d8] sm:$0xff] }
 0x14b   : > { %v1122_v35 = vpack.c.bf16 %v1092_v44, %v1091_v34 }
 0x150   : > { %5173 = vmatmul.mubr.msk.bf16.gmra.mrb[8].mxu1 %vm900_vm1, %v6294_v32 }
 0x151   : > { %5176 = vmatprep.mubr.msk.bf16.mxu1 %vm900_vm1, %v6296_v33 }
 0x158   : > { %5177 = vmatmul.mubr.msk.bf16.gmra.mrb[12].mxu1 %vm900_vm1, %v6302_v37 }
 0x159   : > { %5180 = vmatprep.mubr.msk.bf16.mxu1 %vm900_vm1, %v6304_v38 }
 0x160   : > { %5181 = vmatmul.mubr.msk.bf16.gmra.mrb[20].mxu1 %vm900_vm1, %v6310_v47 }
 0x161   : > { %5186 = vmatprep.mubr.msk.bf16.mxu1 %vm900_vm1, %v1113_v48 }
 0x168   : > { %5187 = vmatmul.mubr.msk.bf16.vlgmr.msra.gmra.mrb[4].mxu1 %vm900_vm1, %v1114_v51 }
 0x169   : > { %5203 = vmatpush3.bf16.msra.mxu1 %v5600_v28  ;;  %5190 = vmatprep.mubr.msk.bf16.mxu1 %vm900_vm1, %v6318_v54 }
 0x16a   : > { %5220 = vmatprep.subr.bf16.mxu1 %v5601_v53 }
 0x170   : > { %5191 = vmatmul.mubr.msk.bf16.gmra.mrb[8].mxu1 %vm900_vm1, %v6323_v58 }
 0x171   : > { %5194 = vmatprep.mubr.msk.bf16.mxu1 %vm900_vm1, %v6325_v60 }
 0x178   : > { %5195 = vmatmul.mubr.msk.bf16.gmra.mrb[12].mxu1 %vm900_vm1, %v6331_v1 }
 0x179   : > { %5198 = vmatprep.mubr.msk.bf16.mxu1 %vm900_vm1, %v6333_v2 }
 0x180   : > { %5199 = vmatmul.mubr.msk.bf16.gmra.mrb[24].mxu1 %vm900_vm1, %v6339_v5 }
 0x181   : > { %5204 = vmatprep.mubr.msk.bf16.mxu1 %vm900_vm1, %v1094_v27  ;;  %v1052_v27 = vld [vmem:[#allocation3 + $0x98] sm:$0xff] }
 0x182   : > { %v1102_v28 = vpack.c.bf16 %v1052_v27, %v1051_v26 }
 0x188   : > { %5205 = vmatmul.mubr.msk.bf16.vlgmr.msra.gmra.mrb[4].mxu1 %vm900_vm1, %v6288_v62 }
 0x189   : > { %5221 = vmatpush3.bf16.msra.mxu1 %v5601_v53  ;;  %5208 = vmatprep.mubr.msk.bf16.mxu1 %vm900_vm1, %v6294_v32 }
 0x18a   : > { %5238 = vmatprep.subr.bf16.mxu1 %v5602_v8 }
 0x190   : > { %5209 = vmatmul.mubr.msk.bf16.gmra.mrb[8].mxu1 %vm900_vm1, %v6296_v33 }
 0x191   : > { %5212 = vmatprep.mubr.msk.bf16.mxu1 %vm900_vm1, %v6302_v37 }
 0x198   : > { %5213 = vmatmul.mubr.msk.bf16.gmra.mrb[12].mxu1 %vm900_vm1, %v6304_v38 }
 0x199   : > { %5216 = vmatprep.mubr.msk.bf16.mxu1 %vm900_vm1, %v6310_v47 }
 0x1a0   : > { %5217 = vmatmul.mubr.msk.bf16.gmra.mrb[28].mxu1 %vm900_vm1, %v1101_v11 }
 0x1a1   : > { %5222 = vmatprep.mubr.msk.bf16.mxu1 %vm900_vm1, %v6197_v43  ;;  %v1069_v43 = vld [vmem:[#allocation3 + $0x120] sm:$0xff] }
 0x1a2   : > { %v1111_v15 = vpack.c.bf16 %v1070_v14, %v1069_v43 }
 0x1a8   : > { %5223 = vmatmul.mubr.msk.bf16.vlgmr.msra.gmra.mrb[4].mxu1 %vm900_vm1, %v6225_v12 }
 0x1a9   : > { %5239 = vmatpush3.bf16.msra.mxu1 %v5602_v8  ;;  %5226 = vmatprep.mubr.msk.bf16.mxu1 %vm900_vm1, %v6242_v46 }
 0x1aa   : > { %5256 = vmatprep.subr.bf16.mxu1 %v5603_v13 }
 0x1b0   : > { %5227 = vmatmul.mubr.msk.bf16.gmra.mrb[8].mxu1 %vm900_vm1, %v6260_v3 }
 0x1b1   : > { %5230 = vmatprep.mubr.msk.bf16.mxu1 %vm900_vm1, %v6266_v6 }
 0x1b8   : > { %5231 = vmatmul.mubr.msk.bf16.gmra.mrb[12].mxu1 %vm900_vm1, %v6276_v16 }
 0x1b9   : > { %5234 = vmatprep.mubr.msk.bf16.mxu1 %vm900_vm1, %v6280_v20 }
 0x1c0   : > { %5235 = vmatmul.mubr.msk.bf16.gmra.mrb[32].mxu1 %vm900_vm1, %v1111_v15 }
 0x1c1   : > { %5240 = vmatprep.mubr.msk.bf16.mxu1 %vm900_vm1, %v1114_v51 }
 0x1c8   : > { %5241 = vmatmul.mubr.msk.bf16.vlgmr.msra.gmra.mrb[4].mxu1 %vm900_vm1, %v6318_v54 }
 0x1c9   : > { %5257 = vmatpush3.bf16.msra.mxu1 %v5603_v13  ;;  %5244 = vmatprep.mubr.msk.bf16.mxu1 %vm900_vm1, %v6323_v58 }
 0x1ca   : > { %5274 = vmatprep.subr.bf16.mxu1 %v5604_v17 }
 0x1d0   : > { %5245 = vmatmul.mubr.msk.bf16.gmra.mrb[8].mxu1 %vm900_vm1, %v6325_v60 }
 0x1d1   : > { %5248 = vmatprep.mubr.msk.bf16.mxu1 %vm900_vm1, %v6331_v1 }
 0x1d8   : > { %5249 = vmatmul.mubr.msk.bf16.gmra.mrb[12].mxu1 %vm900_vm1, %v6333_v2 }
 0x1d9   : > { %5252 = vmatprep.mubr.msk.bf16.mxu1 %vm900_vm1, %v6339_v5 }
 0x1e0   : > { %5253 = vmatmul.mubr.msk.bf16.gmra.mrb[36].mxu1 %vm900_vm1, %v1121_v22 }
 0x1e1   : > { %5258 = vmatprep.mubr.msk.bf16.mxu1 %vm900_vm1, %v6288_v62 }
 0x1e8   : > { %5259 = vmatmul.mubr.msk.bf16.vlgmr.msra.gmra.mrb[4].mxu1 %vm900_vm1, %v6294_v32 }
 0x1e9   : > { %5275 = vmatpush3.bf16.msra.mxu1 %v5604_v17  ;;  %5262 = vmatprep.mubr.msk.bf16.mxu1 %vm900_vm1, %v6296_v33 }
 0x1ea   : > { %5292 = vmatprep.subr.bf16.mxu1 %v5605_v25 }
 0x1f0   : > { %5263 = vmatmul.mubr.msk.bf16.gmra.mrb[8].mxu1 %vm900_vm1, %v6302_v37 }
 0x1f1   : > { %5266 = vmatprep.mubr.msk.bf16.mxu1 %vm900_vm1, %v6304_v38 }
 0x1f8   : > { %5267 = vmatmul.mubr.msk.bf16.gmra.mrb[12].mxu1 %vm900_vm1, %v6310_v47  ;;  %v5608_v47 = vld [vmem:[%s6995_s5 + $0x44] ss:$16 sps:$4 sm:$0xff]  }
 0x1f9   : > { %5270 = vmatprep.mubr.msk.bf16.mxu1 %vm900_vm1, %v1101_v11  ;;  %2532 = vmatprep.subr.bf16.mxu0 %v5608_v47 }
 0x1fa   : > { %2533 = vmatpush1.bf16.msra.mxu0 %v5606_v45 }
 0x1fb   : > { %2534 = vmatprep.subr.bf16.mxu0 %v5611_v59 }
 0x200   : > { %5271 = vmatmul.mubr.msk.bf16.gmra.mrb[40].mxu1 %vm900_vm1, %v1102_v28 }
 0x201   : > { %5276 = vmatprep.mubr.msk.bf16.mxu1 %vm900_vm1, %v6225_v12  ;;  %v1071_v12 = vld [vmem:[#allocation3 + $0x130] sm:$0xff] }
 0x208   : > { %5277 = vmatmul.mubr.msk.bf16.vlgmr.msra.gmra.mrb[4].mxu1 %vm900_vm1, %v6242_v46  ;;  %v1072_v46 = vld [vmem:[#allocation3 + $0x138] sm:$0xff] }
 0x209   : > { %5293 = vmatpush3.bf16.msra.mxu1 %v5605_v25  ;;  %5280 = vmatprep.mubr.msk.bf16.mxu1 %vm900_vm1, %v6260_v3  ;;  %v1112_v31 = vpack.c.bf16 %v1072_v46, %v1071_v12 }
 0x210   : > { %5281 = vmatmul.mubr.msk.bf16.gmra.mrb[8].mxu1 %vm900_vm1, %v6266_v6 }
 0x211   : > { %5284 = vmatprep.mubr.msk.bf16.mxu1 %vm900_vm1, %v6276_v16 }
 0x213   : > { %v5164_v62 = vpop.f32.mrb[16].mxu1 }
 0x214   : > { %v1240_v7 = vpop.f32.mrb[17].mxu1 }
 0x215   : > { %v5165_v29 = vpop.f32.mrb[18].mxu1 }
 0x216   : > { %v1243_v30 = vpop.f32.mrb[19].mxu1 }
 0x218   : > { %5285 = vmatmul.mubr.msk.bf16.gmra.mrb[12].mxu1 %vm900_vm1, %v6280_v20 }
 0x219   : > { %5288 = vmatprep.mubr.msk.bf16.mxu1 %vm900_vm1, %v1111_v15 }
 0x220   : > { %5289 = vmatmul.mubr.msk.bf16.gmra.mrb[44].mxu1 %vm900_vm1, %v1112_v31 }
 0x221   : > { %5294 = vmatprep.mubr.msk.bf16.mxu1 %vm900_vm1, %v6318_v54 }
 0x228   : > { %5295 = vmatmul.mubr.msk.bf16.vlgmr.msra.gmra.mrb[4].mxu1 %vm900_vm1, %v6323_v58 }
 0x229   : > { %5298 = vmatprep.mubr.msk.bf16.mxu1 %vm900_vm1, %v6325_v60  ;;  %v5609_v60 = vld [vmem:[%s6995_s5 + $0x60] ss:$16 sps:$4 sm:$0xff]  }
 0x22a   : > { %2535 = vmatpush1.bf16.msra.mxu0 %v5609_v60 }
 0x22b   : > { %2585 = vmatprep.subr.bf16.mxu0 %v5614_v0 }
 0x230   : > { %5299 = vmatmul.mubr.msk.bf16.gmra.mrb[8].mxu1 %vm900_vm1, %v6331_v1 }
 0x231   : > { %5302 = vmatprep.mubr.msk.bf16.mxu1 %vm900_vm1, %v6333_v2 }
 0x233   : > { %v5182_v3 = vpop.f32.mrb[20].mxu1 }
 0x234   : > { %v1375_v6 = vadd.f32 %v5182_v3, %v5164_v62  ;;  %v1366_v16 = vpop.f32.mrb[21].mxu1 }
 0x235   : > { %v1367_v20 = vadd.f32 %v1366_v16, %v1240_v7  ;;  %v5183_v32 = vpop.f32.mrb[22].mxu1 }
 0x236   : > { %v1369_v33 = vpop.f32.mrb[23].mxu1 }
 0x238   : > { %5303 = vmatmul.mubr.msk.bf16.gmra.mrb[12].mxu1 %vm900_vm1, %v6339_v5 }
 0x239   : > { %5306 = vmatprep.mubr.msk.bf16.mxu1 %vm900_vm1, %v1121_v22  ;;  %v6463_v22 = vld [vmem:[%s6994_s4] ss:$0 sm:$0xff] }
 0x240   : > { %5307 = vmatmul.mubr.msk.bf16.gmra.mrb[48].mxu1 %vm900_vm1, %v1122_v35 }
 0x253   : > { %v5200_v36 = vpop.f32.mrb[24].mxu1 }
 0x254   : > { %v1523_v37 = vadd.f32 %v5200_v36, %v1375_v6  ;;  %v1495_v38 = vpop.f32.mrb[25].mxu1 }
 0x255   : > { %v1521_v39 = vadd.f32 %v1495_v38, %v1367_v20  ;;  %v5201_v41 = vpop.f32.mrb[26].mxu1 }
 0x256   : > { %v1498_v42 = vpop.f32.mrb[27].mxu1 }
 0x273   : > { %v5218_v48 = vpop.f32.mrb[28].mxu1 }
 0x274   : > { %v1646_v49 = vadd.f32 %v5218_v48, %v1523_v37  ;;  %v1618_v24 = vpop.f32.mrb[29].mxu1 }
 0x275   : > { %v1644_v50 = vadd.f32 %v1618_v24, %v1521_v39  ;;  %v5219_v51 = vpop.f32.mrb[30].mxu1 }
 0x276   : > { %v1621_v52 = vpop.f32.mrb[31].mxu1 }
 0x293   : > { %v5236_v53 = vpop.f32.mrb[32].mxu1 }
 0x294   : > { %v1769_v54 = vadd.f32 %v5236_v53, %v1646_v49  ;;  %v1741_v55 = vpop.f32.mrb[33].mxu1 }
 0x295   : > { %v1767_v56 = vadd.f32 %v1741_v55, %v1644_v50  ;;  %v5237_v57 = vpop.f32.mrb[34].mxu1 }
 0x296   : > { %v1744_v58 = vpop.f32.mrb[35].mxu1 }
 0x2b3   : > { %v5254_v61 = vpop.f32.mrb[36].mxu1 }
 0x2b4   : > { %v1892_v1 = vadd.f32 %v5254_v61, %v1769_v54  ;;  %v1864_v23 = vpop.f32.mrb[37].mxu1 }
 0x2b5   : > { %v1890_v2 = vadd.f32 %v1864_v23, %v1767_v56  ;;  %v5255_v40 = vpop.f32.mrb[38].mxu1 }
 0x2b6   : > { %v1867_v4 = vpop.f32.mrb[39].mxu1 }
 0x2d3   : > { %v5272_v5 = vpop.f32.mrb[40].mxu1 }
 0x2d4   : > { %v2015_v8 = vadd.f32 %v5272_v5, %v1892_v1  ;;  %v1987_v9 = vpop.f32.mrb[41].mxu1 }
 0x2d5   : > { %v2013_v10 = vadd.f32 %v1987_v9, %v1890_v2  ;;  %v5273_v11 = vpop.f32.mrb[42].mxu1 }
 0x2d6   : > { %v1990_v13 = vpop.f32.mrb[43].mxu1 }
 0x2f3   : > { %v5290_v43 = vpop.f32.mrb[44].mxu1 }
 0x2f4   : > { %v6456_v14 = vadd.f32 %v5290_v43, %v2015_v8  ;;  %v2110_v15 = vpop.f32.mrb[45].mxu1 }
 0x2f5   : > { %v6458_v17 = vadd.f32 %v2110_v15, %v2013_v10  ;;  %v5291_v19 = vpop.f32.mrb[46].mxu1 }
 0x2f6   : > { %v2113_v21 = vpop.f32.mrb[47].mxu1 }
 0x2fb   : > { %v5296_v25 = vpop.f32.mrb[4].mxu1 }
 0x2fc   : > { %v2271_v26 = vadd.f32 %v5296_v25, %v6463_v22  ;;  %v2185_v27 = vpop.f32.mrb[5].mxu1 }
 0x2fd   : > { %v2269_v28 = vadd.f32 %v6463_v22, %v2185_v27  ;;  %v5297_v62 = vpop.f32.mrb[6].mxu1 }
 0x2fe   : > { %v2286_v7 = vmax.f32 %v2271_v26, 0.0  ;;  %v2272_v29 = vadd.f32 %v5297_v62, %v6463_v22  ;;  %v2188_v30 = vpop.f32.mrb[7].mxu1 }
 0x2ff   : > { %v2284_v12 = vmax.f32 %v2269_v28, 0.0  ;;  %v2270_v46 = vadd.f32 %v6463_v22, %v2188_v30 }
 0x300   : > { %v2287_v31 = vmax.f32 %v2272_v29, 0.0  ;;  %v2315_v6 = vrot.slane %v2286_v7, 1 }
 0x301   : > { %v2285_v3 = vmax.f32 %v2270_v46, 0.0  ;;  %v2312_v20 = vrot.slane %v2284_v12, 1 }
 0x302   : > { %v2317_v16 = vrot.slane %v2287_v31, 1 }
 0x303   : > { %v2313_v32 = vrot.slane %v2285_v3, 1  ;;  %v5300_v33 = vpop.f32.mrb[8].mxu1 }
 0x304   : > { %v2318_v34 = vsel %vm738_vm2, %v2315_v6, %v2317_v16  ;;  %v2275_v44 = vadd.f32 %v5300_v33, %v6463_v22  ;;  %v2201_v35 = vpop.f32.mrb[9].mxu1  ;;  %v2448_v6 = vld [vmem:[#allocation5 + $0x30] sm:$0xff] }
 0x305   : > { %v2352_v36 = vmax.f32 %v2286_v7, %v2318_v34  ;;  %v2314_v37 = vsel %vm738_vm2, %v2312_v20, %v2313_v32  ;;  %v2273_v38 = vadd.f32 %v6463_v22, %v2201_v35  ;;  %v5301_v39 = vpop.f32.mrb[10].mxu1 }
 0x306   : > { %v2350_v41 = vmax.f32 %v2284_v12, %v2314_v37  ;;  %v2290_v42 = vmax.f32 %v2275_v44, 0.0  ;;  %v2276_v45 = vadd.f32 %v5301_v39, %v6463_v22  ;;  %v2204_v47 = vpop.f32.mrb[11].mxu1  ;;  %v5620_v39 = vld [vmem:[%s6995_s5 + $0x4] ss:$16 sps:$4 sm:$0xff]  }
 0x307   : > { %v2288_v48 = vmax.f32 %v2273_v38, 0.0  ;;  %v2274_v49 = vadd.f32 %v6463_v22, %v2204_v47  ;;  %v5615_v38 = vld [vmem:[%s6995_s5 + $0x68] ss:$16 sps:$4 sm:$0xff]  }
 0x308   : > { %v2375_v24 = vmax.f32 %v2350_v41, %v2352_v36  ;;  %v2291_v50 = vmax.f32 %v2276_v45, 0.0  ;;  %v2323_v53 = vrot.slane %v2290_v42, 1 }
 0x309   : > { %v2319_v51 = vrot.slane %v2288_v48, 1  ;;  %v2289_v52 = vmax.f32 %v2274_v49, 0.0 }
 0x30a   : > { %2388 = vst.msk [vmem:[#allocation4] sm:$0xff] %vm466_vm0, %v2375_v24  ;;  %v2325_v54 = vrot.slane %v2291_v50, 1  ;;  %v5618_v24 = vld [vmem:[%s6995_s5] ss:$16 sps:$4 sm:$0xff]   ;;  %v5623_v50 = vld [vmem:[%s6995_s5 + $0x24] ss:$16 sps:$4 sm:$0xff]  }
 0x30b   : > { %v2321_v55 = vrot.slane %v2289_v52, 1  ;;  %v5304_v56 = vpop.f32.mrb[12].mxu1  ;;  %v5626_v52 = vld [vmem:[%s6995_s5 + $0xc] ss:$16 sps:$4 sm:$0xff]  }
 0x30c   : > { %v2326_v57 = vsel %vm738_vm2, %v2323_v53, %v2325_v54  ;;  %v2279_v58 = vadd.f32 %v5304_v56, %v6463_v22  ;;  %v2217_v59 = vpop.f32.mrb[13].mxu1  ;;  %v2442_v53 = vld [vmem:[#allocation5] sm:$0xff] }
 0x30d   : > { %v2356_v60 = vmax.f32 %v2290_v42, %v2326_v57  ;;  %v2322_v0 = vsel %vm738_vm2, %v2319_v51, %v2321_v55  ;;  %v2277_v61 = vadd.f32 %v6463_v22, %v2217_v59  ;;  %v5305_v1 = vpop.f32.mrb[14].mxu1  ;;  %v5621_v51 = vld [vmem:[%s6995_s5 + $0x20] ss:$16 sps:$4 sm:$0xff]   ;;  %v5624_v55 = vld [vmem:[%s6995_s5 + $0x8] ss:$16 sps:$4 sm:$0xff]  }
 0x30e   : > { %v2354_v23 = vmax.f32 %v2288_v48, %v2322_v0  ;;  %v2220_v2 = vpop.f32.mrb[15].mxu1  ;;  %v2294_v40 = vmax.f32 %v2279_v58, 0.0  ;;  %v2280_v5 = vadd.f32 %v5305_v1, %v6463_v22  ;;  %v5629_v57 = vld [vmem:[%s6995_s5 + $0x2c] ss:$16 sps:$4 sm:$0xff]   ;;  %v5627_v58 = vld [vmem:[%s6995_s5 + $0x28] ss:$16 sps:$4 sm:$0xff]  }
 0x30f   : > { %v2292_v4 = vmax.f32 %v2277_v61, 0.0  ;;  %v2278_v8 = vadd.f32 %v6463_v22, %v2220_v2  ;;  %v5632_v59 = vld [vmem:[%s6995_s5 + $0x84] ss:$16 sps:$4 sm:$0xff]   ;;  %v5630_v1 = vld [vmem:[%s6995_s5 + $0x80] ss:$16 sps:$4 sm:$0xff]  }
 0x310   : > { %v2379_v9 = vmax.f32 %v2354_v23, %v2356_v60  ;;  %v2295_v13 = vmax.f32 %v2280_v5, 0.0  ;;  %v2331_v15 = vrot.slane %v2294_v40, 1  ;;  %v5635_v23 = vld [vmem:[%s6995_s5 + $0xa4] ss:$16 sps:$4 sm:$0xff]   ;;  %v5633_v2 = vld [vmem:[%s6995_s5 + $0xa0] ss:$16 sps:$4 sm:$0xff]  }
 0x311   : > { %v2420_v10 = vld [vmem:[#allocation4] ss:$2 sm:$0xf]  ;;  %v2327_v11 = vrot.slane %v2292_v4, 1  ;;  %v2293_v43 = vmax.f32 %v2278_v8, 0.0 }
 0x312   : > { %2422 = vst.msk [vmem:[#allocation5 + $0x9] sm:$0xf] %vm2421_vm4, %v2420_v10  ;;  %2424 = vst.msk [vmem:[#allocation5 + $0x38] sm:$0xf] %vm2421_vm4, %v2420_v10  ;;  %v2333_v19 = vrot.slane %v2295_v13, 1 }
 0x313   : > { %2426 = vst.msk [vmem:[#allocation5 + $0x67] sm:$0xf] %vm2421_vm4, %v2420_v10  ;;  %v2329_v21 = vrot.slane %v2293_v43, 1  ;;  %v5308_v25 = vpop.f32.mrb[48].mxu1  ;;  %v5636_v5 = vld [vmem:[%s6995_s5 + $0x88] ss:$16 sps:$4 sm:$0xff]  }
 0x314   : > { %2392 = vst.msk [vmem:[#allocation4 + $0x20] sm:$0xff] %vm466_vm0, %v2379_v9  ;;  %v2261_v26 = vadd.f32 %v5308_v25, %v6456_v14  ;;  %v2233_v27 = vpop.f32.mrb[49].mxu1  ;;  %v2334_v28 = vsel %vm738_vm2, %v2331_v15, %v2333_v19  ;;  %v5612_v14 = vld [vmem:[%s6995_s5 + $0x48] ss:$16 sps:$4 sm:$0xff]   ;;  %v5641_v10 = vld [vmem:[%s6995_s5 + $0xac] ss:$16 sps:$4 sm:$0xff]  }
 0x315   : > { %v2330_v62 = vsel %vm738_vm2, %v2327_v11, %v2329_v21  ;;  %v2259_v7 = vadd.f32 %v2233_v27, %v6458_v17  ;;  %v5309_v29 = vpop.f32.mrb[50].mxu1  ;;  %v2360_v30 = vmax.f32 %v2294_v40, %v2334_v28  ;;  %v5638_v40 = vld [vmem:[%s6995_s5 + $0x8c] ss:$16 sps:$4 sm:$0xff]   ;;  %v5639_v11 = vld [vmem:[%s6995_s5 + $0xa8] ss:$16 sps:$4 sm:$0xff]  }
 0x316   : > { %v2358_v12 = vmax.f32 %v2292_v4, %v2330_v62  ;;  %v2236_v46 = vpop.f32.mrb[51].mxu1  ;;  %v2283_v31 = vadd.f32 %v6463_v22, %v2261_v26  ;;  %v5644_v13 = vld [vmem:[%s6995_s5 + $0xc4] ss:$16 sps:$4 sm:$0xff]   ;;  %v5642_v21 = vld [vmem:[%s6995_s5 + $0xc0] ss:$16 sps:$4 sm:$0xff]  }
 0x317   : > { %v2281_v3 = vadd.f32 %v6463_v22, %v2259_v7  ;;  %v5617_v22 = vld [vmem:[%s6995_s5 + $0x6c] ss:$16 sps:$4 sm:$0xff]   ;;  %v5647_v25 = vld [vmem:[%s6995_s5 + $0xe4] ss:$16 sps:$4 sm:$0xff]   ;;  %v5645_v26 = vld [vmem:[%s6995_s5 + $0xe0] ss:$16 sps:$4 sm:$0xff]  }
 0x318   : > { %v2383_v16 = vmax.f32 %v2358_v12, %v2360_v30  ;;  %v2298_v32 = vmax.f32 %v2283_v31, 0.0  ;;  %v5650_v27 = vld [vmem:[%s6995_s5 + $0xcc] ss:$16 sps:$4 sm:$0xff]   ;;  %v2447_v7 = vld [vmem:[#allocation5 + $0x28] sm:$0xff]  ;;  %v5648_v29 = vld [vmem:[%s6995_s5 + $0xc8] ss:$16 sps:$4 sm:$0xff]  }
 0x319   : > { %v2296_v33 = vmax.f32 %v2281_v3, 0.0  ;;  %v2449_v34 = vld [vmem:[#allocation5 + $0x38] sm:$0xff]  ;;  %v2443_v54 = vld [vmem:[#allocation5 + $0x8] sm:$0xff]  ;;  %v5653_v12 = vld [vmem:[%s6995_s5 + $0xec] ss:$16 sps:$4 sm:$0xff]  }
 0x31a   : > { %2396 = vst.msk [vmem:[#allocation4 + $0x40] sm:$0xff] %vm466_vm0, %v2383_v16  ;;  %v6499_v17 = vpack.c.bf16 %v2449_v34, %v2448_v6  ;;  %v2367_v44 = vrot.slane %v2298_v32, 1  ;;  %v6545_v56 = vpack.c.bf16 %v2443_v54, %v2442_v53  ;;  %v2454_v8 = vld [vmem:[#allocation5 + $0x60] sm:$0xff]  ;;  %v5656_v6 = vld [vmem:[%s6995_s5 + $0x104] ss:$16 sps:$4 sm:$0xff]  }
 0x31b   : > { %v2428_v20 = vld [vmem:[#allocation4 + $0x20] ss:$2 sm:$0xf]  ;;  %v2335_v35 = vrot.slane %v2296_v33, 1  ;;  %v5651_v3 = vld [vmem:[%s6995_s5 + $0xe8] ss:$16 sps:$4 sm:$0xff]  }
 0x31c   : > { %2431 = vst.msk [vmem:[#allocation5 + $0x6f] sm:$0xf] %vm2421_vm4, %v2428_v20  ;;  %2429 = vst.msk [vmem:[#allocation5 + $0x11] sm:$0xf] %vm2421_vm4, %v2428_v20  ;;  %4777 = vmatmul.mubr.msk.bf16.vlgmr.msra.gmra.mrb[28].mxu0 %vm466_vm0, %v6499_v17  ;;  %v2374_v36 = vmax.f32 %v2298_v32, %v2367_v44  ;;  %v2980_v30 = vrot.slane %v6545_v56, 4  ;;  %v2459_v54 = vld [vmem:[#allocation5 + $0x88] sm:$0xff] }
 0x31d   : > { %2430 = vst.msk [vmem:[#allocation5 + $0x40] sm:$0xf] %vm2421_vm4, %v2428_v20  ;;  %v2362_v37 = vmax.f32 %v2296_v33, %v2335_v35  ;;  %2586 = vmatpush1.bf16.msra.mxu0 %v5612_v14  ;;  %2574 = vmatprep.mubr.bf16.mxu0 %v5811_v63  ;;  %v5654_v20 = vld [vmem:[%s6995_s5 + $0x100] ss:$16 sps:$4 sm:$0xff]   ;;  %v5659_v32 = vld [vmem:[%s6995_s5 + $0x124] ss:$16 sps:$4 sm:$0xff]  }
 0x31e   : > { %2587 = vmatprep.subr.bf16.mxu0 %v5617_v22  ;;  %v5657_v33 = vld [vmem:[%s6995_s5 + $0x120] ss:$16 sps:$4 sm:$0xff]   ;;  %v5662_v34 = vld [vmem:[%s6995_s5 + $0x10c] ss:$16 sps:$4 sm:$0xff]  }
 0x31f   : > { %v2387_v41 = vmax.f32 %v2362_v37, %v2374_v36  ;;  %v2453_v35 = vld [vmem:[#allocation5 + $0x58] sm:$0xff]  ;;  %v5660_v36 = vld [vmem:[%s6995_s5 + $0x108] ss:$16 sps:$4 sm:$0xff]   ;;  %v3165_v37 = vrot.slane %v6499_v17, 4 }
 0x321   : > { %v2433_v42 = vld [vmem:[#allocation4 + $0x40] ss:$2 sm:$0xf]  ;;  %2401 = vst.msk [vmem:[#allocation4 + $0x60] sm:$0x7f] %vm2400_vm5, %v2387_v41  ;;  %2588 = vmatpush1.bf16.msra.mxu0 %v5615_v38 }
 0x322   : > { %2434 = vst.msk [vmem:[#allocation5 + $0x19] sm:$0xf] %vm2421_vm4, %v2433_v42  ;;  %2435 = vst.msk [vmem:[#allocation5 + $0x48] sm:$0xf] %vm2421_vm4, %v2433_v42  ;;  %2684 = vmatprep.subr.bf16.mxu0 %v5620_v39  ;;  %v5665_v38 = vld [vmem:[%s6995_s5 + $0x12c] ss:$16 sps:$4 sm:$0xff]  }
 0x323   : > { %2436 = vst.msk [vmem:[#allocation5 + $0x77] sm:$0xf] %vm2421_vm4, %v2433_v42  ;;  %v2444_v0 = vld [vmem:[#allocation5 + $0x10] sm:$0xff]  ;;  %v2455_v4 = vld [vmem:[#allocation5 + $0x68] sm:$0xff] }
 0x324   : > { %v2450_v47 = vld [vmem:[#allocation5 + $0x40] sm:$0xff]  ;;  %v6585_v9 = vpack.c.bf16 %v2455_v4, %v2454_v8  ;;  %v5681_v4 = vld [vmem:[%s6995_s5 + $0x1a0] ss:$16 sps:$4 sm:$0xff]  }
 0x325   : > { %v5663_v42 = vld [vmem:[%s6995_s5 + $0x128] ss:$16 sps:$4 sm:$0xff]  }
 0x326   : > { %v5684_v8 = vld [vmem:[%s6995_s5 + $0x188] ss:$16 sps:$4 sm:$0xff]  }
 0x328   : > { %v2438_v45 = vld [vmem:[#allocation4 + $0x60] ss:$2 sm:$0xf] }
 0x329   : > { %2439 = vst.msk [vmem:[#allocation5 + $0x21] sm:$0xf] %vm2421_vm4, %v2438_v45  ;;  %2440 = vst.msk [vmem:[#allocation5 + $0x50] sm:$0xf] %vm2421_vm4, %v2438_v45  ;;  %v2451_v48 = vld [vmem:[#allocation5 + $0x48] sm:$0xff]  ;;  %v2445_v60 = vld [vmem:[#allocation5 + $0x18] sm:$0xff] }
 0x32a   : > { %2441 = vst.msk [vmem:[#allocation5 + $0x7f] sm:$0xf] %vm2421_vm4, %v2438_v45  ;;  %v6519_v49 = vpack.c.bf16 %v2451_v48, %v2450_v47  ;;  %v6559_v61 = vpack.c.bf16 %v2445_v60, %v2444_v0  ;;  %v2456_v15 = vld [vmem:[#allocation5 + $0x70] sm:$0xff]  ;;  %v5666_v48 = vld [vmem:[%s6995_s5 + $0x140] ss:$16 sps:$4 sm:$0xff]  }
 0x32b   : > { %v5675_v60 = vld [vmem:[%s6995_s5 + $0x168] ss:$16 sps:$4 sm:$0xff]   ;;  %v5680_v0 = vld [vmem:[%s6995_s5 + $0x184] ss:$16 sps:$4 sm:$0xff]  }
 0x32c   : > { %4778 = vmatmul.mubr.msk.bf16.gmra.mrb[32].mxu0 %vm466_vm0, %v6519_v49  ;;  %v2981_v28 = vrot.slane %v6559_v61, 4  ;;  %v3166_v22 = vrot.slane %v6519_v49, 4 }
 0x32d   : > { %2617 = vmatprep.mubr.bf16.mxu0 %v5811_v63 }
 0x32e   : > { %v2982_v46 = vsel %vm2979_vm6, %v2980_v30, %v2981_v28  ;;  %v3167_v39 = vsel %vm2979_vm6, %v3165_v37, %v3166_v22  ;;  %v5713_v30 = vld [vmem:[%s6995_s5 + $0x22c] ss:$16 sps:$4 sm:$0xff]   ;;  %v5730_v37 = vld [vmem:[%s6997_s7 + $0xc0] sm:$0xff]  }
 0x330   : > { %v2446_v62 = vld [vmem:[#allocation5 + $0x20] sm:$0xff]  ;;  %v2452_v44 = vld [vmem:[#allocation5 + $0x50] sm:$0xff] }
 0x331   : > { %v2457_v43 = vld [vmem:[#allocation5 + $0x78] sm:$0xff]  ;;  %v6631_v31 = vpack.c.bf16 %v2447_v7, %v2446_v62  ;;  %v6670_v41 = vpack.c.bf16 %v2453_v35, %v2452_v44  ;;  %v2458_v53 = vld [vmem:[#allocation5 + $0x80] sm:$0xff] }
 0x332   : > { %v6599_v19 = vpack.c.bf16 %v2457_v43, %v2456_v15  ;;  %v5695_v43 = vld [vmem:[%s6995_s5 + $0x1e4] ss:$16 sps:$4 sm:$0xff]   ;;  %v5693_v15 = vld [vmem:[%s6995_s5 + $0x1e0] ss:$16 sps:$4 sm:$0xff]   ;;  %v5728_v35 = vld [vmem:[%s6997_s7 + $0x78] sm:$0xff]  }
 0x333   : > { %v2983_v16 = vrot.slane %v6631_v31, 4  ;;  %v3168_v45 = vrot.slane %v6670_v41, 4  ;;  %v5707_v62 = vld [vmem:[%s6995_s5 + $0x224] ss:$16 sps:$4 sm:$0xff]   ;;  %v5705_v7 = vld [vmem:[%s6995_s5 + $0x220] ss:$16 sps:$4 sm:$0xff]  }
 0x334   : > { %4779 = vmatmul.mubr.msk.bf16.vlgmr.msra.gmra.mrb[36].mxu0 %vm466_vm0, %v6499_v17  ;;  %v5668_v17 = vld [vmem:[%s6995_s5 + $0x144] ss:$16 sps:$4 sm:$0xff]  }
 0x335   : > { %2685 = vmatpush1.bf16.msra.mxu0 %v5618_v24  ;;  %2627 = vmatprep.mubr.bf16.mxu0 %v5811_v63  ;;  %v2984_v14 = vsel %vm2979_vm6, %v2981_v28, %v2983_v16  ;;  %v3169_v47 = vsel %vm2979_vm6, %v3166_v22, %v3168_v45  ;;  %v5671_v24 = vld [vmem:[%s6995_s5 + $0x164] ss:$16 sps:$4 sm:$0xff]   ;;  %v5702_v28 = vld [vmem:[%s6995_s5 + $0x200] ss:$16 sps:$4 sm:$0xff]   ;;  %v5720_v16 = vld [vmem:[%s6997_s7 + $0x58] sm:$0xff]  }
 0x336   : > { %2686 = vmatprep.subr.bf16.mxu0 %v5623_v50  ;;  %v5669_v50 = vld [vmem:[%s6995_s5 + $0x160] ss:$16 sps:$4 sm:$0xff]  }
 0x337   : > { %v5726_v22 = vld [vmem:[%s6997_s7 + $0x70] sm:$0xff]  }
 0x338   : > { %v5727_v44 = vld [vmem:[%s6997_s7 + $0x30] sm:$0xff]  }
 0x339   : > { %2687 = vmatpush1.bf16.msra.mxu0 %v5621_v51  ;;  %v5674_v51 = vld [vmem:[%s6995_s5 + $0x14c] ss:$16 sps:$4 sm:$0xff]  }
 0x33a   : > { %2737 = vmatprep.subr.bf16.mxu0 %v5626_v52  ;;  %v3351_v52 = vrot.slane %v6599_v19, 4 }
 0x33c   : > { %4780 = vmatmul.mubr.msk.bf16.gmra.mrb[40].mxu0 %vm466_vm0, %v6519_v49 }
 0x33d   : > { %2716 = vmatprep.mubr.bf16.mxu0 %v5811_v63 }
 0x344   : > { %4789 = vmatmul.mubr.msk.bf16.vlgmr.msra.gmra.mrb[28].mxu0 %vm466_vm0, %v6545_v56 }
 0x345   : > { %2738 = vmatpush1.bf16.msra.mxu0 %v5624_v55  ;;  %2726 = vmatprep.mubr.bf16.mxu0 %v5811_v63  ;;  %v5672_v55 = vld [vmem:[%s6995_s5 + $0x148] ss:$16 sps:$4 sm:$0xff]  }
 0x346   : > { %2739 = vmatprep.subr.bf16.mxu0 %v5629_v57  ;;  %v5677_v57 = vld [vmem:[%s6995_s5 + $0x16c] ss:$16 sps:$4 sm:$0xff]  }
 0x349   : > { %2740 = vmatpush1.bf16.msra.mxu0 %v5627_v58 }
 0x34a   : > { %2845 = vmatprep.subr.bf16.mxu0 %v5632_v59  ;;  %v6709_v59 = vpack.c.bf16 %v2459_v54, %v2458_v53 }
 0x34c   : > { %4790 = vmatmul.mubr.msk.bf16.gmra.mrb[32].mxu0 %vm466_vm0, %v6559_v61 }
 0x34d   : > { %2769 = vmatprep.mubr.bf16.mxu0 %v5811_v63 }
 0x354   : > { %4791 = vmatmul.mubr.msk.bf16.vlgmr.msra.gmra.mrb[36].mxu0 %vm466_vm0, %v6545_v56  ;;  %v3350_v56 = vrot.slane %v6585_v9, 4 }
 0x355   : > { %2846 = vmatpush1.bf16.msra.mxu0 %v5630_v1  ;;  %2779 = vmatprep.mubr.bf16.mxu0 %v5811_v63  ;;  %v3353_v1 = vrot.slane %v6709_v59, 4 }
 0x356   : > { %2847 = vmatprep.subr.bf16.mxu0 %v5635_v23  ;;  %v3352_v58 = vsel %vm2979_vm6, %v3350_v56, %v3351_v52 }
 0x357   : > { %v3354_v23 = vsel %vm2979_vm6, %v3351_v52, %v3353_v1 }
 0x359   : > { %2848 = vmatpush1.bf16.msra.mxu0 %v5633_v2  ;;  %v5678_v2 = vld [vmem:[%s6995_s5 + $0x180] ss:$16 sps:$4 sm:$0xff]  }
 0x35a   : > { %2898 = vmatprep.subr.bf16.mxu0 %v5638_v40  ;;  %v5683_v40 = vld [vmem:[%s6995_s5 + $0x1a4] ss:$16 sps:$4 sm:$0xff]  }
 0x35c   : > { %4792 = vmatmul.mubr.msk.bf16.gmra.mrb[40].mxu0 %vm466_vm0, %v6559_v61 }
 0x35d   : > { %2877 = vmatprep.mubr.bf16.mxu0 %v5811_v63 }
 0x364   : > { %4809 = vmatmul.mubr.msk.bf16.vlgmr.msra.gmra.mrb[28].mxu0 %vm466_vm0, %v6585_v9 }
 0x365   : > { %2899 = vmatpush1.bf16.msra.mxu0 %v5636_v5  ;;  %2887 = vmatprep.mubr.bf16.mxu0 %v5811_v63  ;;  %v5686_v5 = vld [vmem:[%s6995_s5 + $0x18c] ss:$16 sps:$4 sm:$0xff]  }
 0x366   : > { %2900 = vmatprep.subr.bf16.mxu0 %v5641_v10  ;;  %v5687_v10 = vld [vmem:[%s6995_s5 + $0x1a8] ss:$16 sps:$4 sm:$0xff]  }
 0x369   : > { %2901 = vmatpush1.bf16.msra.mxu0 %v5639_v11  ;;  %v5692_v11 = vld [vmem:[%s6995_s5 + $0x1c4] ss:$16 sps:$4 sm:$0xff]  }
 0x36a   : > { %3031 = vmatprep.subr.bf16.mxu0 %v5644_v13  ;;  %v5690_v13 = vld [vmem:[%s6995_s5 + $0x1c0] ss:$16 sps:$4 sm:$0xff]  }
 0x36c   : > { %4810 = vmatmul.mubr.msk.bf16.gmra.mrb[32].mxu0 %vm466_vm0, %v6599_v19 }
 0x36d   : > { %2930 = vmatprep.mubr.bf16.mxu0 %v5811_v63 }
 0x374   : > { %4811 = vmatmul.mubr.msk.bf16.vlgmr.msra.gmra.mrb[36].mxu0 %vm466_vm0, %v6585_v9  ;;  %v5689_v9 = vld [vmem:[%s6995_s5 + $0x1ac] ss:$16 sps:$4 sm:$0xff]  }
 0x375   : > { %3032 = vmatpush1.bf16.msra.mxu0 %v5642_v21  ;;  %2940 = vmatprep.mubr.bf16.mxu0 %v5811_v63  ;;  %v5698_v21 = vld [vmem:[%s6995_s5 + $0x1cc] ss:$16 sps:$4 sm:$0xff]  }
 0x376   : > { %3033 = vmatprep.subr.bf16.mxu0 %v5647_v25  ;;  %v5701_v25 = vld [vmem:[%s6995_s5 + $0x1ec] ss:$16 sps:$4 sm:$0xff]  }
 0x379   : > { %3034 = vmatpush1.bf16.msra.mxu0 %v5645_v26  ;;  %v5699_v26 = vld [vmem:[%s6995_s5 + $0x1e8] ss:$16 sps:$4 sm:$0xff]  }
 0x37a   : > { %3084 = vmatprep.subr.bf16.mxu0 %v5650_v27  ;;  %v5704_v27 = vld [vmem:[%s6995_s5 + $0x204] ss:$16 sps:$4 sm:$0xff]  }
 0x37c   : > { %4812 = vmatmul.mubr.msk.bf16.gmra.mrb[40].mxu0 %vm466_vm0, %v6599_v19 }
 0x37d   : > { %3063 = vmatprep.mubr.bf16.mxu0 %v5811_v63 }
 0x384   : > { %4829 = vmatmul.mubr.msk.bf16.vlgmr.msra.gmra.mrb[28].mxu0 %vm466_vm0, %v2982_v46 }
 0x385   : > { %3085 = vmatpush1.bf16.msra.mxu0 %v5648_v29  ;;  %3073 = vmatprep.mubr.bf16.mxu0 %v5811_v63  ;;  %v5710_v29 = vld [vmem:[%s6995_s5 + $0x20c] ss:$16 sps:$4 sm:$0xff]  }
 0x386   : > { %3086 = vmatprep.subr.bf16.mxu0 %v5653_v12  ;;  %v5711_v12 = vld [vmem:[%s6995_s5 + $0x228] ss:$16 sps:$4 sm:$0xff]  }
 0x389   : > { %3087 = vmatpush1.bf16.msra.mxu0 %v5651_v3  ;;  %v5716_v3 = vld [vmem:[%s6997_s7 + $0x48] sm:$0xff]  }
 0x38a   : > { %3216 = vmatprep.subr.bf16.mxu0 %v5656_v6  ;;  %v5719_v6 = vld [vmem:[%s6997_s7 + $0x10] sm:$0xff]  }
 0x38c   : > { %4830 = vmatmul.mubr.msk.bf16.gmra.mrb[32].mxu0 %vm466_vm0, %v2984_v14 }
 0x38d   : > { %3116 = vmatprep.mubr.bf16.mxu0 %v5811_v63 }
 0x394   : > { %4831 = vmatmul.mubr.msk.bf16.vlgmr.msra.gmra.mrb[36].mxu0 %vm466_vm0, %v2982_v46  ;;  %v5714_v46 = vld [vmem:[%s6997_s7 + $0x40] sm:$0xff]  }
 0x395   : > { %3217 = vmatpush1.bf16.msra.mxu0 %v5654_v20  ;;  %3126 = vmatprep.mubr.bf16.mxu0 %v5811_v63  ;;  %v5722_v20 = vld [vmem:[%s6997_s7 + $0x60] sm:$0xff]  }
 0x396   : > { %3218 = vmatprep.subr.bf16.mxu0 %v5659_v32  ;;  %5068 = vmatprep.subr.bf16.mxu1 %v5714_v46  ;;  %v5723_v32 = vld [vmem:[%s6997_s7 + $0x20] sm:$0xff]  }
 0x399   : > { %3219 = vmatpush1.bf16.msra.mxu0 %v5657_v33  ;;  %v5724_v33 = vld [vmem:[%s6997_s7 + $0x68] sm:$0xff]  }
 0x39a   : > { %3269 = vmatprep.subr.bf16.mxu0 %v5662_v34  ;;  %v5725_v34 = vld [vmem:[%s6997_s7 + $0x28] sm:$0xff]  }
 0x39c   : > { %4832 = vmatmul.mubr.msk.bf16.gmra.mrb[40].mxu0 %vm466_vm0, %v2984_v14  ;;  %v5721_v14 = vld [vmem:[%s6997_s7 + $0x18] sm:$0xff]  }
 0x39d   : > { %3248 = vmatprep.mubr.bf16.mxu0 %v5811_v63 }
 0x3a4   : > { %4849 = vmatmul.mubr.msk.bf16.vlgmr.msra.gmra.mrb[28].mxu0 %vm466_vm0, %v3167_v39 }
 0x3a5   : > { %3270 = vmatpush1.bf16.msra.mxu0 %v5660_v36  ;;  %3258 = vmatprep.mubr.bf16.mxu0 %v5811_v63  ;;  %v5729_v36 = vld [vmem:[%s6997_s7 + $0x38] sm:$0xff]  }
 0x3a6   : > { %3271 = vmatprep.subr.bf16.mxu0 %v5665_v38  ;;  %v4047_v38 = vlaneseq }
 0x3a9   : > { %3272 = vmatpush1.bf16.msra.mxu0 %v5663_v42 }
 0x3aa   : > { %3401 = vmatprep.subr.bf16.mxu0 %v5668_v17  ;;  %v4045_v17 = vld [vmem:[%s6996_s6] sm:$0xf] }
 0x3ac   : > { %4850 = vmatmul.mubr.msk.bf16.gmra.mrb[32].mxu0 %vm466_vm0, %v3169_v47 }
 0x3ad   : > { %3301 = vmatprep.mubr.bf16.mxu0 %v5811_v63 }
 0x3b4   : > { %4851 = vmatmul.mubr.msk.bf16.vlgmr.msra.gmra.mrb[36].mxu0 %vm466_vm0, %v3167_v39  ;;  %v4048_v39 = vshrl.u32 %v4047_v38, 7 }
 0x3b5   : > { %3402 = vmatpush1.bf16.msra.mxu0 %v5666_v48  ;;  %3311 = vmatprep.mubr.bf16.mxu0 %v5811_v63 }
 0x3b6   : > { %3403 = vmatprep.subr.bf16.mxu0 %v5671_v24  ;;  %v4101_v42 = vadd.s32 8, %v4048_v39  ;;  %v4053_v45 = vsub.s32 1, %v4048_v39  ;;  %v4108_v48 = vand.u32 7, %v4048_v39 }
 0x3b8   : > { %v4115_v24 = vand.u32 7, %v4101_v42  ;;  %vm4152_vm7 = vcmp.lt.s32.totalorder %v4108_v48, 4 }
 0x3b9   : > { %3404 = vmatpush1.bf16.msra.mxu0 %v5669_v50  ;;  %v4054_v50 = vrot.slane %v4045_v17, %v4053_v45  ;;  %v4156_v1 = vsel %vm4152_vm7, 0.0625, %v5810_v18 }
 0x3ba   : > { %3454 = vmatprep.subr.bf16.mxu0 %v5674_v51  ;;  %v4102_v51 = vadd.s32 16, %v4048_v39  ;;  %vm4153_vm8 = vcmp.lt.s32.totalorder %v4115_v24, 4 }
 0x3bc   : > { %4852 = vmatmul.mubr.msk.bf16.gmra.mrb[40].mxu0 %vm466_vm0, %v3169_v47 }
 0x3bd   : > { %3433 = vmatprep.mubr.bf16.mxu0 %v5811_v63 }
 0x3c4   : > { %4869 = vmatmul.mubr.msk.bf16.vlgmr.msra.gmra.mrb[28].mxu0 %vm466_vm0, %v3352_v58 }
 0x3c5   : > { %3455 = vmatpush1.bf16.msra.mxu0 %v5672_v55  ;;  %3443 = vmatprep.mubr.bf16.mxu0 %v5811_v63  ;;  %v4103_v55 = vadd.s32 24, %v4048_v39 }
 0x3c6   : > { %3456 = vmatprep.subr.bf16.mxu0 %v5677_v57 }
 0x3c9   : > { %3457 = vmatpush1.bf16.msra.mxu0 %v5675_v60 }
 0x3ca   : > { %3575 = vmatprep.subr.bf16.mxu0 %v5680_v0  ;;  %v4122_v0 = vand.u32 7, %v4102_v51 }
 0x3cc   : > { %4870 = vmatmul.mubr.msk.bf16.gmra.mrb[32].mxu0 %vm466_vm0, %v3354_v23  ;;  %vm4154_vm9 = vcmp.lt.s32.totalorder %v4122_v0, 4 }
 0x3cd   : > { %3486 = vmatprep.mubr.bf16.mxu0 %v5811_v63 }
 0x3d4   : > { %4871 = vmatmul.mubr.msk.bf16.vlgmr.msra.gmra.mrb[36].mxu0 %vm466_vm0, %v3352_v58 }
 0x3d5   : > { %3576 = vmatpush1.bf16.msra.mxu0 %v5678_v2  ;;  %3496 = vmatprep.mubr.bf16.mxu0 %v5811_v63  ;;  %v4157_v2 = vsel %vm4153_vm8, 0.0625, %v5810_v18 }
 0x3d6   : > { %3577 = vmatprep.subr.bf16.mxu0 %v5683_v40 }
 0x3d9   : > { %3578 = vmatpush1.bf16.msra.mxu0 %v5681_v4 }
 0x3da   : > { %3628 = vmatprep.subr.bf16.mxu0 %v5686_v5  ;;  %v4129_v5 = vand.u32 7, %v4103_v55 }
 0x3dc   : > { %4872 = vmatmul.mubr.msk.bf16.gmra.mrb[40].mxu0 %vm466_vm0, %v3354_v23  ;;  %vm4155_vm10 = vcmp.lt.s32.totalorder %v4129_v5, 4 }
 0x3dd   : > { %3607 = vmatprep.mubr.bf16.mxu0 %v5811_v63  ;;  %v4159_v46 = vsel %vm4155_vm10, 0.0625, %v5810_v18 }
 0x3e4   : > { %4889 = vmatmul.mubr.msk.bf16.vlgmr.msra.gmra.mrb[28].mxu0 %vm466_vm0, %v6559_v61 }
 0x3e5   : > { %3629 = vmatpush1.bf16.msra.mxu0 %v5684_v8  ;;  %3617 = vmatprep.mubr.bf16.mxu0 %v5811_v63 }
 0x3e6   : > { %3630 = vmatprep.subr.bf16.mxu0 %v5689_v9 }
 0x3e9   : > { %3631 = vmatpush1.bf16.msra.mxu0 %v5687_v10 }
 0x3ea   : > { %3749 = vmatprep.subr.bf16.mxu0 %v5692_v11 }
 0x3ec   : > { %4890 = vmatmul.mubr.msk.bf16.gmra.mrb[32].mxu0 %vm466_vm0, %v6631_v31 }
 0x3ed   : > { %3660 = vmatprep.mubr.bf16.mxu0 %v5811_v63 }
 0x3f4   : > { %4891 = vmatmul.mubr.msk.bf16.vlgmr.msra.gmra.mrb[36].mxu0 %vm466_vm0, %v6559_v61  ;;  %v5696_v61 = vld [vmem:[%s6995_s5 + $0x1c8] ss:$16 sps:$4 sm:$0xff]  }
 0x3f5   : > { %3750 = vmatpush1.bf16.msra.mxu0 %v5690_v13  ;;  %3670 = vmatprep.mubr.bf16.mxu0 %v5811_v63 }
 0x3f6   : > { %3751 = vmatprep.subr.bf16.mxu0 %v5695_v43 }
 0x3f9   : > { %3752 = vmatpush1.bf16.msra.mxu0 %v5693_v15 }
 0x3fa   : > { %3802 = vmatprep.subr.bf16.mxu0 %v5698_v21 }
 0x3fc   : > { %4892 = vmatmul.mubr.msk.bf16.gmra.mrb[40].mxu0 %vm466_vm0, %v6631_v31  ;;  %v5715_v31 = vld [vmem:[%s6997_s7] sm:$0xff]  }
 0x3fd   : > { %3781 = vmatprep.mubr.bf16.mxu0 %v5811_v63  ;;  %5069 = vmatpush3.bf16.msra.mxu1 %v5715_v31 }
 0x3fe   : > { %5070 = vmatprep.subr.bf16.mxu1 %v5716_v3 }
 0x404   : > { %4909 = vmatmul.mubr.msk.bf16.vlgmr.msra.gmra.mrb[28].mxu0 %vm466_vm0, %v6519_v49 }
 0x405   : > { %3803 = vmatpush1.bf16.msra.mxu0 %v5696_v61  ;;  %3791 = vmatprep.mubr.bf16.mxu0 %v5811_v63 }
 0x406   : > { %3804 = vmatprep.subr.bf16.mxu0 %v5701_v25  ;;  %v4057_v25 = vsub.s32 2, %v4048_v39 }
 0x409   : > { %3805 = vmatpush1.bf16.msra.mxu0 %v5699_v26 }
 0x40a   : > { %3923 = vmatprep.subr.bf16.mxu0 %v5704_v27  ;;  %v6888_v27 = vsel %vm4154_vm9, 0.0625, %v5810_v18 }
 0x40c   : > { %4910 = vmatmul.mubr.msk.bf16.gmra.mrb[32].mxu0 %vm466_vm0, %v6670_v41 }
 0x40d   : > { %3834 = vmatprep.mubr.bf16.mxu0 %v5811_v63 }
 0x414   : > { %4911 = vmatmul.mubr.msk.bf16.vlgmr.msra.gmra.mrb[36].mxu0 %vm466_vm0, %v6519_v49  ;;  %v5708_v49 = vld [vmem:[%s6995_s5 + $0x208] ss:$16 sps:$4 sm:$0xff]  }
 0x415   : > { %3924 = vmatpush1.bf16.msra.mxu0 %v5702_v28  ;;  %3844 = vmatprep.mubr.bf16.mxu0 %v5811_v63 }
 0x416   : > { %3925 = vmatprep.subr.bf16.mxu0 %v5707_v62 }
 0x419   : > { %3926 = vmatpush1.bf16.msra.mxu0 %v5705_v7  ;;  %v4061_v7 = vsub.s32 3, %v4048_v39 }
 0x41a   : > { %3976 = vmatprep.subr.bf16.mxu0 %v5710_v29 }
 0x41c   : > { %4912 = vmatmul.mubr.msk.bf16.gmra.mrb[40].mxu0 %vm466_vm0, %v6670_v41  ;;  %v4049_v41 = vsub.s32 0, %v4048_v39 }
 0x41d   : > { %3955 = vmatprep.mubr.bf16.mxu0 %v5811_v63 }
 0x41e   : > { %v4050_v47 = vrot.slane %v4045_v17, %v4049_v41 }
 0x424   : > { %4929 = vmatmul.mubr.msk.bf16.vlgmr.msra.gmra.mrb[28].mxu0 %vm466_vm0, %v6599_v19 }
 0x425   : > { %3965 = vmatprep.mubr.bf16.mxu0 %v5811_v63  ;;  %3977 = vmatpush1.bf16.msra.mxu0 %v5708_v49 }
 0x426   : > { %3978 = vmatprep.subr.bf16.mxu0 %v5713_v30 }
 0x429   : > { %3979 = vmatpush1.bf16.msra.mxu0 %v5711_v12 }
 0x42c   : > { %4930 = vmatmul.mubr.msk.bf16.gmra.mrb[32].mxu0 %vm466_vm0, %v6709_v59 }
 0x42d   : > { %4008 = vmatprep.mubr.bf16.mxu0 %v5811_v63 }
 0x434   : > { %4931 = vmatmul.mubr.msk.bf16.vlgmr.msra.gmra.mrb[36].mxu0 %vm466_vm0, %v6599_v19  ;;  %v5718_v19 = vld [vmem:[%s6997_s7 + $0x50] sm:$0xff]  }
 0x435   : > { %4018 = vmatprep.mubr.bf16.mxu0 %v5811_v63  ;;  %v5717_v63 = vld [vmem:[%s6997_s7 + $0x8] sm:$0xff]  }
 0x436   : > { %5071 = vmatpush3.bf16.msra.mxu1 %v5717_v63 }
 0x437   : > { %5072 = vmatprep.subr.bf16.mxu1 %v5718_v19  ;;  %v4058_v19 = vrot.slane %v4045_v17, %v4057_v25 }
 0x43a   : > { %5073 = vmatpush3.bf16.msra.mxu1 %v5719_v6 }
 0x43b   : > { %5074 = vmatprep.subr.bf16.mxu1 %v5720_v16 }
 0x43c   : > { %4932 = vmatmul.mubr.msk.bf16.gmra.mrb[40].mxu0 %vm466_vm0, %v6709_v59 }
 0x43e   : > { %5075 = vmatpush3.bf16.msra.mxu1 %v5721_v14  ;;  %v4062_v14 = vrot.slane %v4045_v17, %v4061_v7 }
 0x43f   : > { %5076 = vmatprep.subr.bf16.mxu1 %v5722_v20 }
 0x442   : > { %5077 = vmatpush3.bf16.msra.mxu1 %v5723_v32 }
 0x443   : > { %5078 = vmatprep.subr.bf16.mxu1 %v5724_v33 }
 0x446   : > { %5079 = vmatpush3.bf16.msra.mxu1 %v5725_v34 }
 0x447   : > { %5080 = vmatprep.subr.bf16.mxu1 %v5726_v22 }
 0x44a   : > { %5081 = vmatpush3.bf16.msra.mxu1 %v5727_v44 }
 0x44b   : > { %5082 = vmatprep.subr.bf16.mxu1 %v5728_v35 }
 0x44e   : > { %5083 = vmatpush3.bf16.msra.mxu1 %v5729_v36 }
 0x44f   : > { %5090 = vmatprep.subr.bf16.mxu1 %v5730_v37 }
 0x4f7   : > { %v3957_v52 = vpop.f32.mrb[28].mxu0 }
 0x4f8   : > { %v4067_v53 = vadd.f32 %v4050_v47, %v3957_v52  ;;  %v3959_v54 = vpop.f32.mrb[29].mxu0 }
 0x4f9   : > { %v4068_v56 = vadd.f32 %v4054_v50, %v3959_v54  ;;  %v3961_v57 = vpop.f32.mrb[30].mxu0 }
 0x4fa   : > { %v4083_v58 = vmax.f32 %v4067_v53, 0.0  ;;  %v4071_v59 = vadd.f32 %v4050_v47, %v3961_v57  ;;  %v3963_v60 = vpop.f32.mrb[31].mxu0 }
 0x4fb   : > { %v4084_v23 = vmax.f32 %v4068_v56, 0.0  ;;  %v4072_v40 = vadd.f32 %v4054_v50, %v3963_v60 }
 0x4fc   : > { %v4087_v4 = vmax.f32 %v4071_v59, 0.0  ;;  %v4160_v9 = vmul.f32 %v4156_v1, %v4083_v58 }
 0x4fd   : > { %v4088_v8 = vmax.f32 %v4072_v40, 0.0  ;;  %v4161_v11 = vmul.f32 %v4156_v1, %v4084_v23 }
 0x4fe   : > { %v4164_v10 = vmul.f32 %v4157_v2, %v4087_v4 }
 0x4ff   : > { %v4165_v13 = vmul.f32 %v4157_v2, %v4088_v8  ;;  %v3967_v43 = vpop.f32.mrb[32].mxu0 }
 0x500   : > { %v4176_v15 = vadd.f32 %v4164_v10, %v4160_v9  ;;  %v4075_v21 = vadd.f32 %v4050_v47, %v3967_v43  ;;  %v3969_v61 = vpop.f32.mrb[33].mxu0 }
 0x501   : > { %v4185_v26 = vadd.f32 %v4165_v13, %v4161_v11  ;;  %v4076_v28 = vadd.f32 %v4054_v50, %v3969_v61  ;;  %v3971_v62 = vpop.f32.mrb[34].mxu0 }
 0x502   : > { %v4091_v29 = vmax.f32 %v4075_v21, 0.0  ;;  %v4079_v49 = vadd.f32 %v4050_v47, %v3971_v62  ;;  %v3973_v30 = vpop.f32.mrb[35].mxu0 }
 0x503   : > { %v4092_v12 = vmax.f32 %v4076_v28, 0.0  ;;  %v4080_v31 = vadd.f32 %v4054_v50, %v3973_v30 }
 0x504   : > { %v4168_v3 = vmul.f32 %v6888_v27, %v4091_v29  ;;  %v4095_v63 = vmax.f32 %v4079_v49, 0.0 }
 0x505   : > { %v4169_v6 = vmul.f32 %v6888_v27, %v4092_v12  ;;  %v4096_v16 = vmax.f32 %v4080_v31, 0.0  ;;  %v5731_v31 = vld [vmem:[%s6997_s7 + $0x80] sm:$0xff]  }
 0x506   : > { %v4177_v20 = vadd.f32 %v4176_v15, %v4168_v3  ;;  %v4172_v32 = vmul.f32 %v4159_v46, %v4095_v63 }
 0x507   : > { %v4186_v33 = vadd.f32 %v4185_v26, %v4169_v6  ;;  %v4173_v34 = vmul.f32 %v4159_v46, %v4096_v16  ;;  %v4010_v22 = vpop.f32.mrb[36].mxu0  ;;  %v5734_v16 = vld [vmem:[%s6997_s7 + $0xd0] sm:$0xff]  }
 0x508   : > { %v4178_v44 = vadd.f32 %v4177_v20, %v4172_v32  ;;  %v4069_v35 = vadd.f32 %v4058_v19, %v4010_v22  ;;  %v4012_v36 = vpop.f32.mrb[37].mxu0  ;;  %v5735_v20 = vld [vmem:[%s6997_s7 + $0x90] sm:$0xff]  }
 0x509   : > { %v4187_v37 = vadd.f32 %v4186_v33, %v4173_v34  ;;  %v4070_v38 = vadd.f32 %v4062_v14, %v4012_v36  ;;  %v4014_v18 = vpop.f32.mrb[38].mxu0  ;;  %v5736_v34 = vld [vmem:[%s6997_s7 + $0xd8] sm:$0xff]  }
 0x50a   : > { %v4179_v39 = vrot.slane %v4178_v44, 4  ;;  %v4085_v41 = vmax.f32 %v4069_v35, 0.0  ;;  %v4073_v42 = vadd.f32 %v4058_v19, %v4014_v18  ;;  %v4016_v45 = vpop.f32.mrb[39].mxu0 }
 0x50b   : > { %v4188_v47 = vrot.slane %v4187_v37, 4  ;;  %v4086_v48 = vmax.f32 %v4070_v38, 0.0  ;;  %v4074_v24 = vadd.f32 %v4062_v14, %v4016_v45  ;;  %v5741_v45 = vld [vmem:[%s6997_s7 + $0xa8] sm:$0xff]  }
 0x50c   : > { %v4180_v50 = vadd.f32 %v4179_v39, %v4178_v44  ;;  %v4089_v17 = vmax.f32 %v4073_v42, 0.0  ;;  %v4162_v54 = vmul.f32 %v4156_v1, %v4085_v41  ;;  %v5737_v44 = vld [vmem:[%s6997_s7 + $0x98] sm:$0xff]   ;;  %v5739_v39 = vld [vmem:[%s6997_s7 + $0xa0] sm:$0xff]   ;;  %v5740_v42 = vld [vmem:[%s6997_s7 + $0xe8] sm:$0xff]  }
 0x50d   : > { %v4189_v51 = vadd.f32 %v4188_v47, %v4187_v37  ;;  %v4090_v52 = vmax.f32 %v4074_v24, 0.0  ;;  %v4163_v56 = vmul.f32 %v4156_v1, %v4086_v48  ;;  %v5738_v37 = vld [vmem:[%s6997_s7 + $0xe0] sm:$0xff]   ;;  %v5742_v48 = vld [vmem:[%s6997_s7 + $0xf0] sm:$0xff]  }
 0x50e   : > { %v4181_v53 = vrot.slane %v4180_v50, 2  ;;  %v4166_v55 = vmul.f32 %v4157_v2, %v4089_v17  ;;  %v5743_v24 = vld [vmem:[%s6997_s7 + $0xb0] sm:$0xff]  }
 0x50f   : > { %v4167_v57 = vmul.f32 %v4157_v2, %v4090_v52  ;;  %v4020_v58 = vpop.f32.mrb[40].mxu0  ;;  %v4190_v59 = vrot.slane %v4189_v51, 2 }
 0x510   : > { %v4182_v60 = vadd.f32 %v4181_v53, %v4180_v50  ;;  %v4194_v0 = vadd.f32 %v4166_v55, %v4162_v54  ;;  %v4077_v23 = vadd.f32 %v4058_v19, %v4020_v58  ;;  %v4022_v40 = vpop.f32.mrb[41].mxu0  ;;  %v5744_v50 = vld [vmem:[%s6997_s7 + $0xf8] sm:$0xff]  }
 0x511   : > { %v4203_v4 = vadd.f32 %v4167_v57, %v4163_v56  ;;  %v4078_v5 = vadd.f32 %v4062_v14, %v4022_v40  ;;  %v4024_v8 = vpop.f32.mrb[42].mxu0  ;;  %v4191_v9 = vadd.f32 %v4190_v59, %v4189_v51  ;;  %v5745_v51 = vld [vmem:[%s6997_s7 + $0xb8] sm:$0xff]   ;;  %v4280_v59 = vld [vmem:[%s6998_s8] sm:$0x1] }
 0x512   : > { %v4183_v10 = vrot.slane %v4182_v60, 1  ;;  %v4093_v11 = vmax.f32 %v4077_v23, 0.0  ;;  %v4081_v13 = vadd.f32 %v4058_v19, %v4024_v8  ;;  %v4026_v43 = vpop.f32.mrb[43].mxu0  ;;  %v5732_v19 = vld [vmem:[%s6997_s7 + $0xc8] sm:$0xff]  }
 0x513   : > { %v4094_v15 = vmax.f32 %v4078_v5, 0.0  ;;  %v4082_v21 = vadd.f32 %v4062_v14, %v4026_v43  ;;  %v4192_v61 = vrot.slane %v4191_v9, 1 }
 0x514   : > { %v4184_v25 = vadd.f32 %v4183_v10, %v4182_v60  ;;  %v4170_v1 = vmul.f32 %v6888_v27, %v4093_v11  ;;  %v4097_v2 = vmax.f32 %v4081_v13, 0.0 }
 0x515   : > { %v4171_v26 = vmul.f32 %v6888_v27, %v4094_v15  ;;  %v4098_v28 = vmax.f32 %v4082_v21, 0.0  ;;  %v4193_v62 = vadd.f32 %v4192_v61, %v4191_v9 }
 0x516   : > { %v4195_v7 = vadd.f32 %v4194_v0, %v4170_v1  ;;  %v4174_v29 = vmul.f32 %v4159_v46, %v4097_v2  ;;  %v4212_v3 = vpack.c.bf16 %v4184_v25, %v4184_v25 }
 0x517   : > { %v4204_v49 = vadd.f32 %v4203_v4, %v4171_v26  ;;  %v4175_v30 = vmul.f32 %v4159_v46, %v4098_v28  ;;  %v4213_v12 = vpack.c.bf16 %v4193_v62, %v4193_v62  ;;  %v5733_v46 = vld [vmem:[%s6997_s7 + $0x88] sm:$0xff]  }
 0x518   : > { %v4196_v63 = vadd.f32 %v4195_v7, %v4174_v29 }
 0x519   : > { %v4205_v6 = vadd.f32 %v4204_v49, %v4175_v30  ;;  %4505 = vmatprep.mubr.bf16.mxu1 %v4213_v12 }
 0x51a   : > { %4506 = vmatmul.mubr.bf16.vlgmr.msra.gmra.mrb[52].mxu1 %v4212_v3  ;;  %v4197_v33 = vrot.slane %v4196_v63, 4 }
 0x51b   : > { %v4206_v27 = vrot.slane %v4205_v6, 4  ;;  %5091 = vmatpush3.bf16.msra.mxu1 %v5731_v31 }
 0x51c   : > { %5092 = vmatprep.subr.bf16.mxu1 %v5732_v19  ;;  %v4198_v36 = vadd.f32 %v4197_v33, %v4196_v63 }
 0x51d   : > { %v4207_v14 = vadd.f32 %v4206_v27, %v4205_v6 }
 0x51e   : > { %v4199_v41 = vrot.slane %v4198_v36, 2 }
 0x51f   : > { %5093 = vmatpush3.bf16.msra.mxu1 %v5733_v46  ;;  %v4208_v32 = vrot.slane %v4207_v14, 2 }
 0x520   : > { %5094 = vmatprep.subr.bf16.mxu1 %v5734_v16  ;;  %v4200_v47 = vadd.f32 %v4199_v41, %v4198_v36 }
 0x521   : > { %v4209_v22 = vadd.f32 %v4208_v32, %v4207_v14 }
 0x522   : > { %v4201_v17 = vrot.slane %v4200_v47, 1 }
 0x523   : > { %5095 = vmatpush3.bf16.msra.mxu1 %v5735_v20  ;;  %v4210_v35 = vrot.slane %v4209_v22, 1 }
 0x524   : > { %5096 = vmatprep.subr.bf16.mxu1 %v5736_v34  ;;  %v4202_v52 = vadd.f32 %v4201_v17, %v4200_v47 }
 0x525   : > { %v4211_v38 = vadd.f32 %v4210_v35, %v4209_v22 }
 0x526   : > { %v4214_v53 = vpack.c.bf16 %v4202_v52, %v4202_v52 }
 0x527   : > { %5097 = vmatpush3.bf16.msra.mxu1 %v5737_v44  ;;  %v4215_v18 = vpack.c.bf16 %v4211_v38, %v4211_v38 }
 0x528   : > { %5098 = vmatprep.subr.bf16.mxu1 %v5738_v37 }
 0x529   : > { %4545 = vmatprep.mubr.bf16.mxu1 %v4215_v18 }
 0x52b   : > { %5099 = vmatpush3.bf16.msra.mxu1 %v5739_v39 }
 0x52c   : > { %5100 = vmatprep.subr.bf16.mxu1 %v5740_v42 }
 0x52f   : > { %5101 = vmatpush3.bf16.msra.mxu1 %v5741_v45 }
 0x530   : > { %5102 = vmatprep.subr.bf16.mxu1 %v5742_v48 }
 0x533   : > { %5103 = vmatpush3.bf16.msra.mxu1 %v5743_v24 }
 0x534   : > { %5104 = vmatprep.subr.bf16.mxu1 %v5744_v50 }
 0x537   : > { %5105 = vmatpush3.bf16.msra.mxu1 %v5745_v51 }
 0x53a   : > { %4546 = vmatmul.mubr.bf16.vlgmr.msra.gmra.mrb[56].mxu1 %v4214_v53 }
 0x5ed   : > { %v5084_v54 = vpop.f32.mrb[52].mxu1 }
 0x5ee   : > { %v5085_v55 = vpop.f32.mrb[53].mxu1 }
 0x5ef   : > { %v5086_v56 = vadd.f32 %v5085_v55, %v5084_v54  ;;  %v5087_v57 = vpop.f32.mrb[54].mxu1 }
 0x5f0   : > { %v5088_v58 = vpop.f32.mrb[55].mxu1 }
 0x5f1   : > { %v4508_v23 = vadd.f32 %v5086_v56, %v4280_v59 }
 0x60d   : > { %v5106_v60 = vpop.f32.mrb[56].mxu1 }
 0x60e   : > { %v5107_v0 = vpop.f32.mrb[57].mxu1 }
 0x60f   : > { %v5108_v40 = vadd.f32 %v5107_v0, %v5106_v60  ;;  %v5109_v4 = vpop.f32.mrb[58].mxu1 }
 0x610   : > { %v5110_v5 = vpop.f32.mrb[59].mxu1 }
 0x611   : > { %v4548_v8 = vadd.f32 %v5108_v40, %v4508_v23 }
 0x613   : > { %4553 = vst [vmem:[%s324_s26] sm:$0x1] %v4548_v8 }
 0x614   : > { %5759 = shalt.err (!%p5756_p3)
}
 0x615   : > { %s5760_s22 = scalar_lea.hbm %s6948_s14, 16  ;;  %s5764_s26 = scalar_lea.hbm %s6999_s9, 32 }
 0x616   : > { %p5761_p4 = scmp.ne.s32.totalorder %s6948_s14, %s5760_s22  ;;  %p5765_p9 = scmp.lt.u32.totalorder %s6948_s14, %s6999_s9 }
 0x617   : > { %p5766_p10 = scmp.lt.u32.totalorder %s5764_s26, %s5760_s22  ;;  %p5768_p12 = scmp.lt.u32.totalorder %s5760_s22, %s6948_s14 }
 0x618   : > { %p5762_p7 = pnand %p5761_p4, %p5901_p5 }
 0x619   : > { %p5767_p11 = por %p5766_p10, %p5765_p9 }
 0x61a   : > { %p5763_p8 = pneg %p5762_p7 }
 0x61b   : > { %p5769_p13 = por %p5768_p12, %p5767_p11 }
 0x61d   : > { %p5770_p0 = pnand %p5769_p13, %p5763_p8 }
 0x61f   : > { %5773 = shalt.err (!%p5770_p0)
}
 0x620   : > { %5538 = dma.vmem_to_hbm [thread:$0]  (%p5901_p5), %s6950_s27, 16, %s6948_s14, %s4555_s16  }
 0x621 PF: > { %p5544_p1 = scmp.ge.s32.totalorder %s5808_s12, 2  ;;  %s4579_s13 = sand.u32 1, %s5796_s30  }
 0x622   : > { %s4580_s17 = scalar_lea.sflag [#allocation7], %s4579_s13 }
 0x623   : > { %p5541_p2 = pnand %p5544_p1, %p5905_p6 }
 0x625   : > { %5791 = dma.done.wait (!%p5541_p2), %s4580_s17, 16  }
 0x626   : > { %5793 = vsyncadd (!%p5541_p2), %s4580_s17, 4294967280  ;;  %p19_p3 = scmp.ge.s32.totalorder %s5888_s15, 4   ;;  %s7002_s30 = smov %s5800_s10 }
 0x627   : > { %s7003_s10 = smov %s5804_s11  ;;  %s7004_s11 = smov %s5899_s18 }
 0x628   : > { %s7005_s12 = smov %s5888_s15  ;;  %21 = sbr.rel (!%p19_p3) target bundleno = 3 (0x3), region = 121 }
 0x62f   :  { %4584 = vsyncpa [#allocation7], 1 }
 0x630   :  { %4586 = vsyncpa [#allocation7 + $0x1], 1 }

</bundles_post_ra>
